<compile_context>
chip_gen: v7x
topology: tpu7x:2x2x1
jax: 0.10.0
libtpu: 0.0.40
codegen_flags: <defaults>
</compile_context>

<pallas_src>
import functools

import jax
import jax.numpy as jnp
from jax.experimental import pallas as pl
from jax.experimental.pallas import tpu as pltpu

_EPS = 1e-5  # nn.GroupNorm default eps


def _gelu(x):
    # tanh GELU: transcendental goes to the EUP (own bundle slot) instead of a
    # long VALU erf polynomial.  Max |diff| vs torch's erf GELU ~3e-4.
    c = 0.7978845608028654  # sqrt(2/pi)
    return 0.5 * x * (1.0 + jnp.tanh(c * (x + 0.044715 * x * x * x)))


# ---------------------------------------------------------------------------
# Fused Down kernel (per-sample)
# ---------------------------------------------------------------------------
def _make_down_kernel(H2, W2, CP, c_in, c_out):
    """H2,W2: post-pool spatial dims; CP: padded channel width (mult of 128);
    c_in / c_out: real channel counts of layers 1-2 / 3-4."""
    HW = H2 * W2
    P0 = W2 + 8                 # front halo rows (>= W2+1; 8-aligned if W2%8==0)
    PB = W2 + 8                 # back halo rows
    NPAD = P0 + HW + PB

    def kernel(x_ref, w1, g1, b1, w2, g2, b2, w3, g3, b3, w4, g4, b4,
               t_ref, ew_ref, eb_ref, o_ref, pad_ref, res_ref):
        f32 = jnp.float32

        # column masks for the dx = +-1 taps (exclude wrap-around across W).
        wcol = jax.lax.broadcasted_iota(jnp.int32, (HW, 1), 0) % W2
        mask_l = (wcol > 0).astype(f32)
        mask_r = (wcol < (W2 - 1)).astype(f32)

        # Zero ONLY the halo rows; the interior [P0, P0+HW) is fully rewritten
        # by every stage.  (Not gated on program_id==0: the parallel batch axis
        # may be split across TensorCores, each with its own scratch.)
        pad_ref[pl.ds(0, P0), :] = jnp.zeros((P0, CP), pad_ref.dtype)
        pad_ref[pl.ds(P0 + HW, PB), :] = jnp.zeros((PB, CP), pad_ref.dtype)

        def conv3x3(w_ref):
            # 3x3 conv (padding=1, no bias) as 9 shifted (HW,CP)x(CP,CP) MXU
            # matmuls over the flat activation at row offset P0.  The boundary
            # masks are applied once per dx side on the summed matmul output
            # (row-wise, hence equivalent to masking the inputs).
            def tap_sum(dx):
                acc = None
                for ky in range(3):
                    dy = ky - 1
                    v = pad_ref[pl.ds(P0 + dy * W2 + dx, HW), :]       # bf16
                    c = jnp.dot(v, w_ref[ky * 3 + (dx + 1)],
                                preferred_element_type=f32)
                    acc = c if acc is None else acc + c
                return acc
            out = tap_sum(0)
            out = out + tap_sum(-1) * mask_l
            out = out + tap_sum(1) * mask_r
            return out

        def group_norm(y, c_real, g_ref, b_ref):
            # One-pass stats: padded lanes of y are exactly 0, so the sums over
            # all CP lanes equal the sums over the c_real real lanes.
            n = float(HW * c_real)
            s1 = jnp.sum(y, keepdims=True)
            s2 = jnp.sum(y * y, keepdims=True)
            mu = s1 * (1.0 / n)
            var = s2 * (1.0 / n) - mu * mu
            yn = (y - mu) * jax.lax.rsqrt(var + _EPS)
            return yn * g_ref[...] + b_ref[...]      # padded gamma/beta are 0

        def stash(y):                                # next conv's input
            pad_ref[pl.ds(P0, HW), :] = y.astype(pad_ref.dtype)

        # ---- fused MaxPool2d(2): pooled rows go straight into pad_ref ------
        top = x_ref[0, :, 0]                         # (H2, W2, 2*c_in) f32
        bot = x_ref[0, :, 1]
        m = jnp.maximum(top, bot)
        pooled = jnp.maximum(m[..., :c_in], m[..., c_in:])      # (H2, W2, c_in)
        pooled = jnp.concatenate(                                # lane-extend to CP
            [pooled, jnp.zeros((H2, W2, CP - c_in), f32)], axis=-1
        ).astype(pad_ref.dtype)
        for h in range(H2):    # W2-row stores (full 8 sublanes when W2 % 8 == 0)
            pad_ref[pl.ds(P0 + h * W2, W2), :] = pooled[h]
            res_ref[pl.ds(h * W2, W2), :] = pooled[h]

        # ---- DoubleConv(in, in, residual=True) ------------------------------
        y = _gelu(group_norm(conv3x3(w1), c_in, g1, b1))
        stash(y)
        y = _gelu(res_ref[...].astype(f32) + group_norm(conv3x3(w2), c_in, g2, b2))
        stash(y)

        # ---- DoubleConv(in, out) ---------------------------------------------
        y = _gelu(group_norm(conv3x3(w3), c_out, g3, b3))
        stash(y)
        y = group_norm(conv3x3(w4), c_out, g4, b4)

        # ---- time embedding: SiLU -> Linear, broadcast over spatial ---------
        tv = t_ref[0]                                # (1, E) f32
        s = tv * (1.0 / (1.0 + jnp.exp(-tv)))        # SiLU
        emb = jnp.dot(s.astype(ew_ref.dtype), ew_ref[...],
                      preferred_element_type=f32) + eb_ref[...]
        # unpadded (HW, c_out) store -> no 16x padded HBM write
        o_ref[0] = (y + emb)[:, :c_out]

    return kernel, NPAD


# ---------------------------------------------------------------------------
# Forward wrapper
# ---------------------------------------------------------------------------
def _const_spec(shape):
    """BlockSpec for operands whose block never changes across the grid.
    Requests single-buffering (no point double-buffering a constant block);
    falls back gracefully if this jax has no pipeline_mode."""
    idx = lambda i: (0,) * len(shape)
    try:
        return pl.BlockSpec(shape, idx, pipeline_mode=pl.Buffered(1))
    except Exception:  # pragma: no cover - older jax without pipeline_mode
        return pl.BlockSpec(shape, idx)


def down_forward(x_nchw, t, params, *, cin, cout):
    """Down.forward(x, t): x (B, Cin, H, W), t (B, emb_dim) -> (B, Cout, H/2, W/2)."""
    CP = params['w1'].shape[1]                       # padded channel width
    E = params['emb_w'].shape[0]
    B, _, H, W = x_nchw.shape
    H2, W2 = H // 2, W // 2
    HW = H2 * W2
    # TODO(synk): odd H/W (PyTorch MaxPool2d floors) is not handled here.

    # NHWC, NO lane padding in HBM (avoid 32x wasted DMA for small cin);
    # the (H2,2,W2,2*cin) regrouping is a free contiguous reshape.
    x = jnp.transpose(x_nchw, (0, 2, 3, 1)).astype(jnp.float32)
    x5 = x.reshape(B, H2, 2, W2, 2 * cin)
    t3 = t.astype(jnp.float32).reshape(B, 1, E)

    kernel, npad = _make_down_kernel(H2, W2, CP, cin, cout)

    wspec = _const_spec((9, CP, CP))
    vspec = _const_spec((1, CP))
    espec = _const_spec((E, CP))

    # Explicit VMEM budget (bf16 weights/scratch + small double-buffered I/O).
    vmem_need = (
        4 * 9 * CP * CP * 2 + E * CP * 2          # bf16 conv + emb weights
        + 9 * CP * 4                              # f32 gamma/beta/emb bias
        + (npad + HW) * CP * 2                    # bf16 activation scratch
        + 2 * (H2 * 2 * W2 * 2 * cin) * 4         # double-buffered x block
        + 2 * HW * cout * 4 + 2 * E * 4           # double-buffered out + t
    )
    vmem_limit = int(min(48 * 2**20, max(16 * 2**20, 2 * vmem_need)))

    out = pl.pallas_call(
        kernel,
        out_shape=jax.ShapeDtypeStruct((B, HW, cout), jnp.float32),
        grid=(B,),
        in_specs=[
            pl.BlockSpec((1, H2, 2, W2, 2 * cin), lambda i: (i, 0, 0, 0, 0)),
            wspec, vspec, vspec,
            wspec, vspec, vspec,
            wspec, vspec, vspec,
            wspec, vspec, vspec,
            pl.BlockSpec((1, 1, E), lambda i: (i, 0, 0)),
            espec,
            vspec,
        ],
        out_specs=pl.BlockSpec((1, HW, cout), lambda i: (i, 0, 0)),
        scratch_shapes=[pltpu.VMEM((npad, CP), jnp.bfloat16),   # halo'd activation
                        pltpu.VMEM((HW, CP), jnp.bfloat16)],    # pooled (residual)
        compiler_params=pltpu.CompilerParams(
            # TODO(synk): when B == 1 on v7x, add a second parallel axis
            # (e.g. split H2) so both TensorCores are busy.
            dimension_semantics=("parallel",),
            vmem_limit_bytes=vmem_limit),
    )(x5,
      params['w1'], params['g1'], params['b1'],
      params['w2'], params['g2'], params['b2'],
      params['w3'], params['g3'], params['b3'],
      params['w4'], params['g4'], params['b4'],
      t3, params['emb_w'], params['emb_b'])

    out = out.reshape(B, H2, W2, cout)
    return jnp.transpose(out, (0, 3, 1, 2))          # back to NCHW


# ---------------------------------------------------------------------------
# Parameters: raw (torch layouts) + one-time kernel-layout preparation
# ---------------------------------------------------------------------------
def init_params(key, in_ch, out_ch, emb_dim):
    ks = jax.random.split(key, 10)

    def conv(k, o, i):
        return 0.2 * jax.random.normal(k, (o, i, 3, 3), jnp.float32)

    def gn(k, c):
        kg, kb = jax.random.split(k)
        return (1.0 + 0.1 * jax.random.normal(kg, (1, c), jnp.float32),
                0.1 * jax.random.normal(kb, (1, c), jnp.float32))

    p = {}
    p['w1'] = conv(ks[0], in_ch, in_ch);   p['g1'], p['b1'] = gn(ks[1], in_ch)
    p['w2'] = conv(ks[2], in_ch, in_ch);   p['g2'], p['b2'] = gn(ks[3], in_ch)
    p['w3'] = conv(ks[4], out_ch, in_ch);  p['g3'], p['b3'] = gn(ks[5], out_ch)
    p['w4'] = conv(ks[6], out_ch, out_ch); p['g4'], p['b4'] = gn(ks[7], out_ch)
    # nn.Linear(emb_dim, out_ch): weight (out_ch, emb_dim), bias (out_ch,)
    p['emb_w'] = (1.0 / jnp.sqrt(emb_dim)) * jax.random.normal(
        ks[8], (out_ch, emb_dim), jnp.float32)
    p['emb_b'] = 0.1 * jax.random.normal(ks[9], (1, out_ch), jnp.float32)
    return p


def prepare_params(raw, in_ch, out_ch):
    """One-time conversion to kernel layouts (hoisted out of the forward)."""
    cp = max(128, ((max(in_ch, out_ch) + 127) // 128) * 128)

    def conv_w(w):                     # (O,I,3,3) -> (9, cp, cp) tap-major bf16
        o, i = w.shape[0], w.shape[1]
        wt = jnp.transpose(w, (2, 3, 1, 0)).reshape(9, i, o)
        wt = jnp.pad(wt, ((0, 0), (0, cp - i), (0, cp - o)))
        return wt.astype(jnp.bfloat16)          # MXU-native, halves VMEM/DMA

    def vec(v):                        # (1, c) -> (1, cp) f32, zero-padded lanes
        return jnp.pad(v, ((0, 0), (0, cp - v.shape[1]))).astype(jnp.float32)

    p = {}
    for n in ('w1', 'w2', 'w3', 'w4'):
        p[n] = conv_w(raw[n])
    for n in ('g1', 'b1', 'g2', 'b2', 'g3', 'b3', 'g4', 'b4'):
        p[n] = vec(raw[n])
    p['emb_w'] = jnp.pad(raw['emb_w'].T,
                         ((0, 0), (0, cp - out_ch))).astype(jnp.bfloat16)
    p['emb_b'] = vec(raw['emb_b'])
    return p


# ---------------------------------------------------------------------------
# Pure-JAX reference (PyTorch semantics, fp32 HIGHEST) for validation
# ---------------------------------------------------------------------------
def _ref_down(x, t, raw):
    def conv(a, w):
        return jax.lax.conv_general_dilated(
            a, w, (1, 1), ((1, 1), (1, 1)),
            dimension_numbers=('NCHW', 'OIHW', 'NCHW'),
            precision=jax.lax.Precision.HIGHEST)

    def gn(a, g, b):
        mu = jnp.mean(a, axis=(1, 2, 3), keepdims=True)
        var = jnp.mean((a - mu) ** 2, axis=(1, 2, 3), keepdims=True)
        an = (a - mu) * jax.lax.rsqrt(var + _EPS)
        return an * g.reshape(1, -1, 1, 1) + b.reshape(1, -1, 1, 1)

    def gelu(a):
        return 0.5 * a * (1.0 + jax.scipy.special.erf(a / jnp.sqrt(2.0)))

    def double_conv(a, w1, g1, b1, w2, g2, b2, residual):
        y = gelu(gn(conv(a, w1), g1, b1))
        y = gn(conv(y, w2), g2, b2)
        return gelu(a + y) if residual else y

    B, C, H, W = x.shape
    p = x.reshape(B, C, H // 2, 2, W // 2, 2).max(axis=(3, 5))
    h = double_conv(p, raw['w1'], raw['g1'], raw['b1'],
                    raw['w2'], raw['g2'], raw['b2'], True)
    h = double_conv(h, raw['w3'], raw['g3'], raw['b3'],
                    raw['w4'], raw['g4'], raw['b4'], False)
    s = t * jax.nn.sigmoid(t)
    emb = s @ raw['emb_w'].T + raw['emb_b']          # (B, Cout)
    return h + emb[:, :, None, None]


if __name__ == "__main__":
    key = jax.random.PRNGKey(0)
    kx, kt, kp = jax.random.split(key, 3)
    B, Cin, Cout, H, W, E = 2, 4, 8, 16, 16, 256

    x = jax.random.normal(kx, (B, Cin, H, W), jnp.float32)
    t = jax.random.normal(kt, (B, E), jnp.float32)
    raw = init_params(kp, Cin, Cout, E)
    params = prepare_params(raw, Cin, Cout)          # one-time layout prep

    fwd = jax.jit(functools.partial(down_forward, cin=Cin, cout=Cout))
    out = jax.block_until_ready(fwd(x, t, params))

    assert out.shape == (B, Cout, H // 2, W // 2), out.shape
    assert bool(jnp.all(jnp.isfinite(out)))

    ref = _ref_down(x, t, raw)
    err_max = float(jnp.max(jnp.abs(out - ref)))
    err_mean = float(jnp.mean(jnp.abs(out - ref)))
    # bf16 MXU + bf16 inter-stage activations by design -> bf16-level accuracy
    # vs the fp32 HIGHEST reference.
    assert err_max < 1e-1 and err_mean < 2.5e-2, (err_max, err_mean)
    print("KERNEL_OK")
</pallas_src>

<mosaic_0001>
module attributes {stable_mosaic.version = 11 : i64} {
  func.func @kernel(%arg0: i32, %arg1: memref<1x8x2x8x8xf32, #tpu.memory_space<vmem>>, %arg2: memref<9x128x128xbf16, #tpu.memory_space<vmem>>, %arg3: memref<1x128xf32, #tpu.memory_space<vmem>>, %arg4: memref<1x128xf32, #tpu.memory_space<vmem>>, %arg5: memref<9x128x128xbf16, #tpu.memory_space<vmem>>, %arg6: memref<1x128xf32, #tpu.memory_space<vmem>>, %arg7: memref<1x128xf32, #tpu.memory_space<vmem>>, %arg8: memref<9x128x128xbf16, #tpu.memory_space<vmem>>, %arg9: memref<1x128xf32, #tpu.memory_space<vmem>>, %arg10: memref<1x128xf32, #tpu.memory_space<vmem>>, %arg11: memref<9x128x128xbf16, #tpu.memory_space<vmem>>, %arg12: memref<1x128xf32, #tpu.memory_space<vmem>>, %arg13: memref<1x128xf32, #tpu.memory_space<vmem>>, %arg14: memref<1x1x256xf32, #tpu.memory_space<vmem>>, %arg15: memref<256x128xbf16, #tpu.memory_space<vmem>>, %arg16: memref<1x128xf32, #tpu.memory_space<vmem>>, %arg17: memref<1x64x8xf32, #tpu.memory_space<vmem>>, %arg18: memref<96x128xbf16, #tpu.memory_space<vmem>>, %arg19: memref<64x128xbf16, #tpu.memory_space<vmem>>) attributes {dimension_semantics = [#tpu.dimension_semantics<parallel>], iteration_bounds = array<i64: 2>, scalar_prefetch = 0 : i64, scratch_operands = 2 : i64, tpu.core_type = #tpu.core_type<tc>, window_params = [{transform_indices = @transform_0, window_bounds = array<i64: 1, 8, 2, 8, 8>}, {pipeline_mode = #tpu.pipeline_mode<synchronous>, transform_indices = @transform_1, window_bounds = array<i64: 9, 128, 128>}, {pipeline_mode = #tpu.pipeline_mode<synchronous>, transform_indices = @transform_2, window_bounds = array<i64: 1, 128>}, {pipeline_mode = #tpu.pipeline_mode<synchronous>, transform_indices = @transform_3, window_bounds = array<i64: 1, 128>}, {pipeline_mode = #tpu.pipeline_mode<synchronous>, transform_indices = @transform_4, window_bounds = array<i64: 9, 128, 128>}, {pipeline_mode = #tpu.pipeline_mode<synchronous>, transform_indices = @transform_5, window_bounds = array<i64: 1, 128>}, {pipeline_mode = #tpu.pipeline_mode<synchronous>, transform_indices = @transform_6, window_bounds = array<i64: 1, 128>}, {pipeline_mode = #tpu.pipeline_mode<synchronous>, transform_indices = @transform_7, window_bounds = array<i64: 9, 128, 128>}, {pipeline_mode = #tpu.pipeline_mode<synchronous>, transform_indices = @transform_8, window_bounds = array<i64: 1, 128>}, {pipeline_mode = #tpu.pipeline_mode<synchronous>, transform_indices = @transform_9, window_bounds = array<i64: 1, 128>}, {pipeline_mode = #tpu.pipeline_mode<synchronous>, transform_indices = @transform_10, window_bounds = array<i64: 9, 128, 128>}, {pipeline_mode = #tpu.pipeline_mode<synchronous>, transform_indices = @transform_11, window_bounds = array<i64: 1, 128>}, {pipeline_mode = #tpu.pipeline_mode<synchronous>, transform_indices = @transform_12, window_bounds = array<i64: 1, 128>}, {transform_indices = @transform_13, window_bounds = array<i64: 1, 1, 256>}, {pipeline_mode = #tpu.pipeline_mode<synchronous>, transform_indices = @transform_14, window_bounds = array<i64: 256, 128>}, {pipeline_mode = #tpu.pipeline_mode<synchronous>, transform_indices = @transform_15, window_bounds = array<i64: 1, 128>}, {transform_indices = @transform_16, window_bounds = array<i64: 1, 64, 8>}]} {
    %0 = tpu.iota {dimensions = array<i32: 0>} : vector<64x1xi32>
    %c8_i32 = arith.constant 8 : i32
    %c0_i32 = arith.constant 0 : i32
    %1 = arith.cmpi eq, %c8_i32, %c0_i32 : i32
    %c1_i32 = arith.constant 1 : i32
    %2 = arith.select %1, %c1_i32, %c8_i32 : i32
    %3 = vector.broadcast %2 : i32 to vector<64x1xi32>
    %4 = arith.remsi %0, %3 : vector<64x1xi32>
    %c0_i32_0 = arith.constant 0 : i32
    %5 = vector.broadcast %c0_i32_0 : i32 to vector<64x1xi32>
    %6 = arith.cmpi ne, %4, %5 : vector<64x1xi32>
    %c0_i32_1 = arith.constant 0 : i32
    %7 = vector.broadcast %c0_i32_1 : i32 to vector<64x1xi32>
    %8 = arith.cmpi slt, %4, %7 : vector<64x1xi32>
    %c0_i32_2 = arith.constant 0 : i32
    %9 = arith.cmpi slt, %2, %c0_i32_2 : i32
    %10 = vector.broadcast %9 : i1 to vector<64x1xi1>
    %11 = vector.broadcast %10 : vector<64x1xi1> to vector<64x1xi1>
    %12 = arith.xori %8, %11 : vector<64x1xi1>
    %13 = arith.andi %12, %6 : vector<64x1xi1>
    %14 = vector.broadcast %2 : i32 to vector<64x1xi32>
    %15 = arith.addi %4, %14 : vector<64x1xi32>
    %16 = arith.select %13, %15, %4 : vector<64x1xi1>, vector<64x1xi32>
    %c0_i32_3 = arith.constant 0 : i32
    %17 = vector.broadcast %c0_i32_3 : i32 to vector<64x1xi32>
    %18 = arith.cmpi sgt, %16, %17 : vector<64x1xi32>
    %19 = arith.extui %18 : vector<64x1xi1> to vector<64x1xi32>
    %20 = arith.sitofp %19 : vector<64x1xi32> to vector<64x1xf32>
    %c7_i32 = arith.constant 7 : i32
    %21 = vector.broadcast %c7_i32 : i32 to vector<64x1xi32>
    %22 = arith.cmpi slt, %16, %21 : vector<64x1xi32>
    %23 = arith.extui %22 : vector<64x1xi1> to vector<64x1xi32>
    %24 = arith.sitofp %23 : vector<64x1xi32> to vector<64x1xf32>
    %cst = arith.constant 0.000000e+00 : bf16
    %25 = vector.broadcast %cst : bf16 to vector<16x128xbf16>
    %c0 = arith.constant 0 : index
    %c0_4 = arith.constant 0 : index
    %26 = vector.load %arg18[%c0, %c0_4] : memref<96x128xbf16, #tpu.memory_space<vmem>>, vector<16x128xbf16>
    tpu.vector_store %arg18[%c0, %c0_4], %25 {strides = array<i32>} : memref<96x128xbf16, #tpu.memory_space<vmem>>, vector<16x128xbf16>,
    %cst_5 = arith.constant 0.000000e+00 : bf16
    %27 = vector.broadcast %cst_5 : bf16 to vector<16x128xbf16>
    %c80 = arith.constant 80 : index
    %c0_6 = arith.constant 0 : index
    %28 = vector.load %arg18[%c80, %c0_6] : memref<96x128xbf16, #tpu.memory_space<vmem>>, vector<16x128xbf16>
    tpu.vector_store %arg18[%c80, %c0_6], %27 {strides = array<i32>} : memref<96x128xbf16, #tpu.memory_space<vmem>>, vector<16x128xbf16>,
    %c0_7 = arith.constant 0 : index
    %c0_8 = arith.constant 0 : index
    %c0_9 = arith.constant 0 : index
    %c0_10 = arith.constant 0 : index
    %c0_11 = arith.constant 0 : index
    %29 = vector.load %arg1[%c0_7, %c0_8, %c0_9, %c0_10, %c0_11] : memref<1x8x2x8x8xf32, #tpu.memory_space<vmem>>, vector<1x8x1x8x8xf32>
    %30 = vector.shape_cast %29 : vector<1x8x1x8x8xf32> to vector<8x8x8xf32>
    %c0_12 = arith.constant 0 : index
    %c0_13 = arith.constant 0 : index
    %c1 = arith.constant 1 : index
    %c0_14 = arith.constant 0 : index
    %c0_15 = arith.constant 0 : index
    %31 = vector.load %arg1[%c0_12, %c0_13, %c1, %c0_14, %c0_15] : memref<1x8x2x8x8xf32, #tpu.memory_space<vmem>>, vector<1x8x1x8x8xf32>
    %32 = vector.shape_cast %31 : vector<1x8x1x8x8xf32> to vector<8x8x8xf32>
    %33 = arith.maximumf %30, %32 : vector<8x8x8xf32>
    %34 = vector.extract_strided_slice %33 {offsets = [0, 0, 0], sizes = [8, 8, 4], strides = [1, 1, 1]} : vector<8x8x8xf32> to vector<8x8x4xf32>
    %35 = vector.extract_strided_slice %33 {offsets = [0, 0, 4], sizes = [8, 8, 4], strides = [1, 1, 1]} : vector<8x8x8xf32> to vector<8x8x4xf32>
    %36 = arith.maximumf %34, %35 : vector<8x8x4xf32>
    %cst_16 = arith.constant 0.000000e+00 : f32
    %37 = vector.broadcast %cst_16 : f32 to vector<8x8x124xf32>
    %38 = tpu.concatenate %36, %37 in 2 : vector<8x8x4xf32>, vector<8x8x124xf32> -> vector<8x8x128xf32>
    %39 = arith.truncf %38 : vector<8x8x128xf32> to vector<8x8x128xbf16>
    %40 = vector.extract_strided_slice %39 {offsets = [0, 0, 0], sizes = [1, 8, 128], strides = [1, 1, 1]} : vector<8x8x128xbf16> to vector<1x8x128xbf16>
    %41 = vector.shape_cast %40 : vector<1x8x128xbf16> to vector<8x128xbf16>
    %c16 = arith.constant 16 : index
    %c0_17 = arith.constant 0 : index
    %42 = vector.load %arg18[%c16, %c0_17] : memref<96x128xbf16, #tpu.memory_space<vmem>>, vector<8x128xbf16>
    tpu.vector_store %arg18[%c16, %c0_17], %41 {strides = array<i32>} : memref<96x128xbf16, #tpu.memory_space<vmem>>, vector<8x128xbf16>,
    %43 = vector.extract_strided_slice %39 {offsets = [0, 0, 0], sizes = [1, 8, 128], strides = [1, 1, 1]} : vector<8x8x128xbf16> to vector<1x8x128xbf16>
    %44 = vector.shape_cast %43 : vector<1x8x128xbf16> to vector<8x128xbf16>
    %c0_18 = arith.constant 0 : index
    %c0_19 = arith.constant 0 : index
    %45 = vector.load %arg19[%c0_18, %c0_19] : memref<64x128xbf16, #tpu.memory_space<vmem>>, vector<8x128xbf16>
    tpu.vector_store %arg19[%c0_18, %c0_19], %44 {strides = array<i32>} : memref<64x128xbf16, #tpu.memory_space<vmem>>, vector<8x128xbf16>,
    %46 = vector.extract_strided_slice %39 {offsets = [1, 0, 0], sizes = [1, 8, 128], strides = [1, 1, 1]} : vector<8x8x128xbf16> to vector<1x8x128xbf16>
    %47 = vector.shape_cast %46 : vector<1x8x128xbf16> to vector<8x128xbf16>
    %c24 = arith.constant 24 : index
    %c0_20 = arith.constant 0 : index
    %48 = vector.load %arg18[%c24, %c0_20] : memref<96x128xbf16, #tpu.memory_space<vmem>>, vector<8x128xbf16>
    tpu.vector_store %arg18[%c24, %c0_20], %47 {strides = array<i32>} : memref<96x128xbf16, #tpu.memory_space<vmem>>, vector<8x128xbf16>,
    %49 = vector.extract_strided_slice %39 {offsets = [1, 0, 0], sizes = [1, 8, 128], strides = [1, 1, 1]} : vector<8x8x128xbf16> to vector<1x8x128xbf16>
    %50 = vector.shape_cast %49 : vector<1x8x128xbf16> to vector<8x128xbf16>
    %c8 = arith.constant 8 : index
    %c0_21 = arith.constant 0 : index
    %51 = vector.load %arg19[%c8, %c0_21] : memref<64x128xbf16, #tpu.memory_space<vmem>>, vector<8x128xbf16>
    tpu.vector_store %arg19[%c8, %c0_21], %50 {strides = array<i32>} : memref<64x128xbf16, #tpu.memory_space<vmem>>, vector<8x128xbf16>,
    %52 = vector.extract_strided_slice %39 {offsets = [2, 0, 0], sizes = [1, 8, 128], strides = [1, 1, 1]} : vector<8x8x128xbf16> to vector<1x8x128xbf16>
    %53 = vector.shape_cast %52 : vector<1x8x128xbf16> to vector<8x128xbf16>
    %c32 = arith.constant 32 : index
    %c0_22 = arith.constant 0 : index
    %54 = vector.load %arg18[%c32, %c0_22] : memref<96x128xbf16, #tpu.memory_space<vmem>>, vector<8x128xbf16>
    tpu.vector_store %arg18[%c32, %c0_22], %53 {strides = array<i32>} : memref<96x128xbf16, #tpu.memory_space<vmem>>, vector<8x128xbf16>,
    %55 = vector.extract_strided_slice %39 {offsets = [2, 0, 0], sizes = [1, 8, 128], strides = [1, 1, 1]} : vector<8x8x128xbf16> to vector<1x8x128xbf16>
    %56 = vector.shape_cast %55 : vector<1x8x128xbf16> to vector<8x128xbf16>
    %c16_23 = arith.constant 16 : index
    %c0_24 = arith.constant 0 : index
    %57 = vector.load %arg19[%c16_23, %c0_24] : memref<64x128xbf16, #tpu.memory_space<vmem>>, vector<8x128xbf16>
    tpu.vector_store %arg19[%c16_23, %c0_24], %56 {strides = array<i32>} : memref<64x128xbf16, #tpu.memory_space<vmem>>, vector<8x128xbf16>,
    %58 = vector.extract_strided_slice %39 {offsets = [3, 0, 0], sizes = [1, 8, 128], strides = [1, 1, 1]} : vector<8x8x128xbf16> to vector<1x8x128xbf16>
    %59 = vector.shape_cast %58 : vector<1x8x128xbf16> to vector<8x128xbf16>
    %c40 = arith.constant 40 : index
    %c0_25 = arith.constant 0 : index
    %60 = vector.load %arg18[%c40, %c0_25] : memref<96x128xbf16, #tpu.memory_space<vmem>>, vector<8x128xbf16>
    tpu.vector_store %arg18[%c40, %c0_25], %59 {strides = array<i32>} : memref<96x128xbf16, #tpu.memory_space<vmem>>, vector<8x128xbf16>,
    %61 = vector.extract_strided_slice %39 {offsets = [3, 0, 0], sizes = [1, 8, 128], strides = [1, 1, 1]} : vector<8x8x128xbf16> to vector<1x8x128xbf16>
    %62 = vector.shape_cast %61 : vector<1x8x128xbf16> to vector<8x128xbf16>
    %c24_26 = arith.constant 24 : index
    %c0_27 = arith.constant 0 : index
    %63 = vector.load %arg19[%c24_26, %c0_27] : memref<64x128xbf16, #tpu.memory_space<vmem>>, vector<8x128xbf16>
    tpu.vector_store %arg19[%c24_26, %c0_27], %62 {strides = array<i32>} : memref<64x128xbf16, #tpu.memory_space<vmem>>, vector<8x128xbf16>,
    %64 = vector.extract_strided_slice %39 {offsets = [4, 0, 0], sizes = [1, 8, 128], strides = [1, 1, 1]} : vector<8x8x128xbf16> to vector<1x8x128xbf16>
    %65 = vector.shape_cast %64 : vector<1x8x128xbf16> to vector<8x128xbf16>
    %c48 = arith.constant 48 : index
    %c0_28 = arith.constant 0 : index
    %66 = vector.load %arg18[%c48, %c0_28] : memref<96x128xbf16, #tpu.memory_space<vmem>>, vector<8x128xbf16>
    tpu.vector_store %arg18[%c48, %c0_28], %65 {strides = array<i32>} : memref<96x128xbf16, #tpu.memory_space<vmem>>, vector<8x128xbf16>,
    %67 = vector.extract_strided_slice %39 {offsets = [4, 0, 0], sizes = [1, 8, 128], strides = [1, 1, 1]} : vector<8x8x128xbf16> to vector<1x8x128xbf16>
    %68 = vector.shape_cast %67 : vector<1x8x128xbf16> to vector<8x128xbf16>
    %c32_29 = arith.constant 32 : index
    %c0_30 = arith.constant 0 : index
    %69 = vector.load %arg19[%c32_29, %c0_30] : memref<64x128xbf16, #tpu.memory_space<vmem>>, vector<8x128xbf16>
    tpu.vector_store %arg19[%c32_29, %c0_30], %68 {strides = array<i32>} : memref<64x128xbf16, #tpu.memory_space<vmem>>, vector<8x128xbf16>,
    %70 = vector.extract_strided_slice %39 {offsets = [5, 0, 0], sizes = [1, 8, 128], strides = [1, 1, 1]} : vector<8x8x128xbf16> to vector<1x8x128xbf16>
    %71 = vector.shape_cast %70 : vector<1x8x128xbf16> to vector<8x128xbf16>
    %c56 = arith.constant 56 : index
    %c0_31 = arith.constant 0 : index
    %72 = vector.load %arg18[%c56, %c0_31] : memref<96x128xbf16, #tpu.memory_space<vmem>>, vector<8x128xbf16>
    tpu.vector_store %arg18[%c56, %c0_31], %71 {strides = array<i32>} : memref<96x128xbf16, #tpu.memory_space<vmem>>, vector<8x128xbf16>,
    %73 = vector.extract_strided_slice %39 {offsets = [5, 0, 0], sizes = [1, 8, 128], strides = [1, 1, 1]} : vector<8x8x128xbf16> to vector<1x8x128xbf16>
    %74 = vector.shape_cast %73 : vector<1x8x128xbf16> to vector<8x128xbf16>
    %c40_32 = arith.constant 40 : index
    %c0_33 = arith.constant 0 : index
    %75 = vector.load %arg19[%c40_32, %c0_33] : memref<64x128xbf16, #tpu.memory_space<vmem>>, vector<8x128xbf16>
    tpu.vector_store %arg19[%c40_32, %c0_33], %74 {strides = array<i32>} : memref<64x128xbf16, #tpu.memory_space<vmem>>, vector<8x128xbf16>,
    %76 = vector.extract_strided_slice %39 {offsets = [6, 0, 0], sizes = [1, 8, 128], strides = [1, 1, 1]} : vector<8x8x128xbf16> to vector<1x8x128xbf16>
    %77 = vector.shape_cast %76 : vector<1x8x128xbf16> to vector<8x128xbf16>
    %c64 = arith.constant 64 : index
    %c0_34 = arith.constant 0 : index
    %78 = vector.load %arg18[%c64, %c0_34] : memref<96x128xbf16, #tpu.memory_space<vmem>>, vector<8x128xbf16>
    tpu.vector_store %arg18[%c64, %c0_34], %77 {strides = array<i32>} : memref<96x128xbf16, #tpu.memory_space<vmem>>, vector<8x128xbf16>,
    %79 = vector.extract_strided_slice %39 {offsets = [6, 0, 0], sizes = [1, 8, 128], strides = [1, 1, 1]} : vector<8x8x128xbf16> to vector<1x8x128xbf16>
    %80 = vector.shape_cast %79 : vector<1x8x128xbf16> to vector<8x128xbf16>
    %c48_35 = arith.constant 48 : index
    %c0_36 = arith.constant 0 : index
    %81 = vector.load %arg19[%c48_35, %c0_36] : memref<64x128xbf16, #tpu.memory_space<vmem>>, vector<8x128xbf16>
    tpu.vector_store %arg19[%c48_35, %c0_36], %80 {strides = array<i32>} : memref<64x128xbf16, #tpu.memory_space<vmem>>, vector<8x128xbf16>,
    %82 = vector.extract_strided_slice %39 {offsets = [7, 0, 0], sizes = [1, 8, 128], strides = [1, 1, 1]} : vector<8x8x128xbf16> to vector<1x8x128xbf16>
    %83 = vector.shape_cast %82 : vector<1x8x128xbf16> to vector<8x128xbf16>
    %c72 = arith.constant 72 : index
    %c0_37 = arith.constant 0 : index
    %84 = vector.load %arg18[%c72, %c0_37] : memref<96x128xbf16, #tpu.memory_space<vmem>>, vector<8x128xbf16>
    tpu.vector_store %arg18[%c72, %c0_37], %83 {strides = array<i32>} : memref<96x128xbf16, #tpu.memory_space<vmem>>, vector<8x128xbf16>,
    %85 = vector.extract_strided_slice %39 {offsets = [7, 0, 0], sizes = [1, 8, 128], strides = [1, 1, 1]} : vector<8x8x128xbf16> to vector<1x8x128xbf16>
    %86 = vector.shape_cast %85 : vector<1x8x128xbf16> to vector<8x128xbf16>
    %c56_38 = arith.constant 56 : index
    %c0_39 = arith.constant 0 : index
    %87 = vector.load %arg19[%c56_38, %c0_39] : memref<64x128xbf16, #tpu.memory_space<vmem>>, vector<8x128xbf16>
    tpu.vector_store %arg19[%c56_38, %c0_39], %86 {strides = array<i32>} : memref<64x128xbf16, #tpu.memory_space<vmem>>, vector<8x128xbf16>,
    %c8_40 = arith.constant 8 : index
    %c0_41 = arith.constant 0 : index
    %88 = vector.load %arg18[%c8_40, %c0_41] : memref<96x128xbf16, #tpu.memory_space<vmem>>, vector<64x128xbf16>
    %c1_42 = arith.constant 1 : index
    %c0_43 = arith.constant 0 : index
    %c0_44 = arith.constant 0 : index
    %89 = vector.load %arg2[%c1_42, %c0_43, %c0_44] : memref<9x128x128xbf16, #tpu.memory_space<vmem>>, vector<1x128x128xbf16>
    %90 = vector.shape_cast %89 : vector<1x128x128xbf16> to vector<128x128xbf16>
    %cst_45 = arith.constant dense<0.000000e+00> : vector<64x128xf32>
    %91 = tpu.matmul %88, %90, %cst_45 {dimension_numbers = #tpu.dot_dimension_numbers<[1], [0], [0], [1], [0, 0, 1, 1], [], []>} : vector<64x128xbf16>, vector<128x128xbf16>, vector<64x128xf32> -> vector<64x128xf32>
    %c16_46 = arith.constant 16 : index
    %c0_47 = arith.constant 0 : index
    %92 = vector.load %arg18[%c16_46, %c0_47] : memref<96x128xbf16, #tpu.memory_space<vmem>>, vector<64x128xbf16>
    %c4 = arith.constant 4 : index
    %c0_48 = arith.constant 0 : index
    %c0_49 = arith.constant 0 : index
    %93 = vector.load %arg2[%c4, %c0_48, %c0_49] : memref<9x128x128xbf16, #tpu.memory_space<vmem>>, vector<1x128x128xbf16>
    %94 = vector.shape_cast %93 : vector<1x128x128xbf16> to vector<128x128xbf16>
    %cst_50 = arith.constant dense<0.000000e+00> : vector<64x128xf32>
    %95 = tpu.matmul %92, %94, %cst_50 {dimension_numbers = #tpu.dot_dimension_numbers<[1], [0], [0], [1], [0, 0, 1, 1], [], []>} : vector<64x128xbf16>, vector<128x128xbf16>, vector<64x128xf32> -> vector<64x128xf32>
    %96 = arith.addf %91, %95 : vector<64x128xf32>
    %c24_51 = arith.constant 24 : index
    %c0_52 = arith.constant 0 : index
    %97 = vector.load %arg18[%c24_51, %c0_52] : memref<96x128xbf16, #tpu.memory_space<vmem>>, vector<64x128xbf16>
    %c7 = arith.constant 7 : index
    %c0_53 = arith.constant 0 : index
    %c0_54 = arith.constant 0 : index
    %98 = vector.load %arg2[%c7, %c0_53, %c0_54] : memref<9x128x128xbf16, #tpu.memory_space<vmem>>, vector<1x128x128xbf16>
    %99 = vector.shape_cast %98 : vector<1x128x128xbf16> to vector<128x128xbf16>
    %cst_55 = arith.constant dense<0.000000e+00> : vector<64x128xf32>
    %100 = tpu.matmul %97, %99, %cst_55 {dimension_numbers = #tpu.dot_dimension_numbers<[1], [0], [0], [1], [0, 0, 1, 1], [], []>} : vector<64x128xbf16>, vector<128x128xbf16>, vector<64x128xf32> -> vector<64x128xf32>
    %101 = arith.addf %96, %100 : vector<64x128xf32>
    %c7_56 = arith.constant 7 : index
    %c0_57 = arith.constant 0 : index
    %102 = vector.load %arg18[%c7_56, %c0_57] : memref<96x128xbf16, #tpu.memory_space<vmem>>, vector<64x128xbf16>
    %c0_58 = arith.constant 0 : index
    %c0_59 = arith.constant 0 : index
    %c0_60 = arith.constant 0 : index
    %103 = vector.load %arg2[%c0_58, %c0_59, %c0_60] : memref<9x128x128xbf16, #tpu.memory_space<vmem>>, vector<1x128x128xbf16>
    %104 = vector.shape_cast %103 : vector<1x128x128xbf16> to vector<128x128xbf16>
    %cst_61 = arith.constant dense<0.000000e+00> : vector<64x128xf32>
    %105 = tpu.matmul %102, %104, %cst_61 {dimension_numbers = #tpu.dot_dimension_numbers<[1], [0], [0], [1], [0, 0, 1, 1], [], []>} : vector<64x128xbf16>, vector<128x128xbf16>, vector<64x128xf32> -> vector<64x128xf32>
    %c15 = arith.constant 15 : index
    %c0_62 = arith.constant 0 : index
    %106 = vector.load %arg18[%c15, %c0_62] : memref<96x128xbf16, #tpu.memory_space<vmem>>, vector<64x128xbf16>
    %c3 = arith.constant 3 : index
    %c0_63 = arith.constant 0 : index
    %c0_64 = arith.constant 0 : index
    %107 = vector.load %arg2[%c3, %c0_63, %c0_64] : memref<9x128x128xbf16, #tpu.memory_space<vmem>>, vector<1x128x128xbf16>
    %108 = vector.shape_cast %107 : vector<1x128x128xbf16> to vector<128x128xbf16>
    %cst_65 = arith.constant dense<0.000000e+00> : vector<64x128xf32>
    %109 = tpu.matmul %106, %108, %cst_65 {dimension_numbers = #tpu.dot_dimension_numbers<[1], [0], [0], [1], [0, 0, 1, 1], [], []>} : vector<64x128xbf16>, vector<128x128xbf16>, vector<64x128xf32> -> vector<64x128xf32>
    %110 = arith.addf %105, %109 : vector<64x128xf32>
    %c23 = arith.constant 23 : index
    %c0_66 = arith.constant 0 : index
    %111 = vector.load %arg18[%c23, %c0_66] : memref<96x128xbf16, #tpu.memory_space<vmem>>, vector<64x128xbf16>
    %c6 = arith.constant 6 : index
    %c0_67 = arith.constant 0 : index
    %c0_68 = arith.constant 0 : index
    %112 = vector.load %arg2[%c6, %c0_67, %c0_68] : memref<9x128x128xbf16, #tpu.memory_space<vmem>>, vector<1x128x128xbf16>
    %113 = vector.shape_cast %112 : vector<1x128x128xbf16> to vector<128x128xbf16>
    %cst_69 = arith.constant dense<0.000000e+00> : vector<64x128xf32>
    %114 = tpu.matmul %111, %113, %cst_69 {dimension_numbers = #tpu.dot_dimension_numbers<[1], [0], [0], [1], [0, 0, 1, 1], [], []>} : vector<64x128xbf16>, vector<128x128xbf16>, vector<64x128xf32> -> vector<64x128xf32>
    %115 = arith.addf %110, %114 : vector<64x128xf32>
    %116 = vector.broadcast %20 : vector<64x1xf32> to vector<64x128xf32>
    %117 = arith.mulf %115, %116 : vector<64x128xf32>
    %118 = arith.addf %101, %117 : vector<64x128xf32>
    %c9 = arith.constant 9 : index
    %c0_70 = arith.constant 0 : index
    %119 = vector.load %arg18[%c9, %c0_70] : memref<96x128xbf16, #tpu.memory_space<vmem>>, vector<64x128xbf16>
    %c2 = arith.constant 2 : index
    %c0_71 = arith.constant 0 : index
    %c0_72 = arith.constant 0 : index
    %120 = vector.load %arg2[%c2, %c0_71, %c0_72] : memref<9x128x128xbf16, #tpu.memory_space<vmem>>, vector<1x128x128xbf16>
    %121 = vector.shape_cast %120 : vector<1x128x128xbf16> to vector<128x128xbf16>
    %cst_73 = arith.constant dense<0.000000e+00> : vector<64x128xf32>
    %122 = tpu.matmul %119, %121, %cst_73 {dimension_numbers = #tpu.dot_dimension_numbers<[1], [0], [0], [1], [0, 0, 1, 1], [], []>} : vector<64x128xbf16>, vector<128x128xbf16>, vector<64x128xf32> -> vector<64x128xf32>
    %c17 = arith.constant 17 : index
    %c0_74 = arith.constant 0 : index
    %123 = vector.load %arg18[%c17, %c0_74] : memref<96x128xbf16, #tpu.memory_space<vmem>>, vector<64x128xbf16>
    %c5 = arith.constant 5 : index
    %c0_75 = arith.constant 0 : index
    %c0_76 = arith.constant 0 : index
    %124 = vector.load %arg2[%c5, %c0_75, %c0_76] : memref<9x128x128xbf16, #tpu.memory_space<vmem>>, vector<1x128x128xbf16>
    %125 = vector.shape_cast %124 : vector<1x128x128xbf16> to vector<128x128xbf16>
    %cst_77 = arith.constant dense<0.000000e+00> : vector<64x128xf32>
    %126 = tpu.matmul %123, %125, %cst_77 {dimension_numbers = #tpu.dot_dimension_numbers<[1], [0], [0], [1], [0, 0, 1, 1], [], []>} : vector<64x128xbf16>, vector<128x128xbf16>, vector<64x128xf32> -> vector<64x128xf32>
    %127 = arith.addf %122, %126 : vector<64x128xf32>
    %c25 = arith.constant 25 : index
    %c0_78 = arith.constant 0 : index
    %128 = vector.load %arg18[%c25, %c0_78] : memref<96x128xbf16, #tpu.memory_space<vmem>>, vector<64x128xbf16>
    %c8_79 = arith.constant 8 : index
    %c0_80 = arith.constant 0 : index
    %c0_81 = arith.constant 0 : index
    %129 = vector.load %arg2[%c8_79, %c0_80, %c0_81] : memref<9x128x128xbf16, #tpu.memory_space<vmem>>, vector<1x128x128xbf16>
    %130 = vector.shape_cast %129 : vector<1x128x128xbf16> to vector<128x128xbf16>
    %cst_82 = arith.constant dense<0.000000e+00> : vector<64x128xf32>
    %131 = tpu.matmul %128, %130, %cst_82 {dimension_numbers = #tpu.dot_dimension_numbers<[1], [0], [0], [1], [0, 0, 1, 1], [], []>} : vector<64x128xbf16>, vector<128x128xbf16>, vector<64x128xf32> -> vector<64x128xf32>
    %132 = arith.addf %127, %131 : vector<64x128xf32>
    %133 = vector.broadcast %24 : vector<64x1xf32> to vector<64x128xf32>
    %134 = arith.mulf %132, %133 : vector<64x128xf32>
    %135 = arith.addf %118, %134 : vector<64x128xf32>
    %136 = vector.shape_cast %135 : vector<64x128xf32> to vector<1x64x128xf32>
    %cst_83 = arith.constant dense<0.000000e+00> : vector<1xf32>
    %137 = vector.multi_reduction <add>, %136, %cst_83 [1, 2] : vector<1x64x128xf32> to vector<1xf32>
    %138 = vector.shape_cast %137 : vector<1xf32> to vector<1x1x1xf32>
    %139 = vector.extract %138[0, 0, 0] : f32 from vector<1x1x1xf32>
    %140 = vector.broadcast %139 : f32 to vector<1x1xf32>
    %141 = arith.mulf %135, %135 : vector<64x128xf32>
    %142 = vector.shape_cast %141 : vector<64x128xf32> to vector<1x64x128xf32>
    %cst_84 = arith.constant dense<0.000000e+00> : vector<1xf32>
    %143 = vector.multi_reduction <add>, %142, %cst_84 [1, 2] : vector<1x64x128xf32> to vector<1xf32>
    %144 = vector.shape_cast %143 : vector<1xf32> to vector<1x1x1xf32>
    %145 = vector.extract %144[0, 0, 0] : f32 from vector<1x1x1xf32>
    %146 = vector.broadcast %145 : f32 to vector<1x1xf32>
    %cst_85 = arith.constant 3.906250e-03 : f32
    %147 = vector.broadcast %cst_85 : f32 to vector<1x1xf32>
    %148 = arith.mulf %140, %147 : vector<1x1xf32>
    %cst_86 = arith.constant 3.906250e-03 : f32
    %149 = vector.broadcast %cst_86 : f32 to vector<1x1xf32>
    %150 = arith.mulf %146, %149 : vector<1x1xf32>
    %151 = arith.mulf %148, %148 : vector<1x1xf32>
    %152 = arith.subf %150, %151 : vector<1x1xf32>
    %153 = vector.broadcast %148 : vector<1x1xf32> to vector<64x128xf32>
    %154 = arith.subf %135, %153 : vector<64x128xf32>
    %cst_87 = arith.constant 9.99999974E-6 : f32
    %155 = vector.broadcast %cst_87 : f32 to vector<1x1xf32>
    %156 = arith.addf %152, %155 : vector<1x1xf32>
    %157 = math.rsqrt %156 : vector<1x1xf32>
    %158 = vector.broadcast %157 : vector<1x1xf32> to vector<64x128xf32>
    %159 = arith.mulf %154, %158 : vector<64x128xf32>
    %c0_88 = arith.constant 0 : index
    %c0_89 = arith.constant 0 : index
    %160 = vector.load %arg3[%c0_88, %c0_89] : memref<1x128xf32, #tpu.memory_space<vmem>>, vector<1x128xf32>
    %161 = vector.broadcast %160 : vector<1x128xf32> to vector<64x128xf32>
    %162 = arith.mulf %159, %161 : vector<64x128xf32>
    %c0_90 = arith.constant 0 : index
    %c0_91 = arith.constant 0 : index
    %163 = vector.load %arg4[%c0_90, %c0_91] : memref<1x128xf32, #tpu.memory_space<vmem>>, vector<1x128xf32>
    %164 = vector.broadcast %163 : vector<1x128xf32> to vector<64x128xf32>
    %165 = arith.addf %162, %164 : vector<64x128xf32>
    %cst_92 = arith.constant 5.000000e-01 : f32
    %166 = vector.broadcast %cst_92 : f32 to vector<64x128xf32>
    %167 = arith.mulf %166, %165 : vector<64x128xf32>
    %cst_93 = arith.constant 4.471500e-02 : f32
    %168 = vector.broadcast %cst_93 : f32 to vector<64x128xf32>
    %169 = arith.mulf %168, %165 : vector<64x128xf32>
    %170 = arith.mulf %169, %165 : vector<64x128xf32>
    %171 = arith.mulf %170, %165 : vector<64x128xf32>
    %172 = arith.addf %165, %171 : vector<64x128xf32>
    %cst_94 = arith.constant 0.797884583 : f32
    %173 = vector.broadcast %cst_94 : f32 to vector<64x128xf32>
    %174 = arith.mulf %173, %172 : vector<64x128xf32>
    %175 = math.tanh %174 : vector<64x128xf32>
    %cst_95 = arith.constant 1.000000e+00 : f32
    %176 = vector.broadcast %cst_95 : f32 to vector<64x128xf32>
    %177 = arith.addf %176, %175 : vector<64x128xf32>
    %178 = arith.mulf %167, %177 : vector<64x128xf32>
    %179 = arith.truncf %178 : vector<64x128xf32> to vector<64x128xbf16>
    %c16_96 = arith.constant 16 : index
    %c0_97 = arith.constant 0 : index
    %180 = vector.load %arg18[%c16_96, %c0_97] : memref<96x128xbf16, #tpu.memory_space<vmem>>, vector<64x128xbf16>
    tpu.vector_store %arg18[%c16_96, %c0_97], %179 {strides = array<i32>} : memref<96x128xbf16, #tpu.memory_space<vmem>>, vector<64x128xbf16>,
    %c0_98 = arith.constant 0 : index
    %c0_99 = arith.constant 0 : index
    %181 = vector.load %arg19[%c0_98, %c0_99] : memref<64x128xbf16, #tpu.memory_space<vmem>>, vector<64x128xbf16>
    %182 = arith.extf %181 : vector<64x128xbf16> to vector<64x128xf32>
    %c8_100 = arith.constant 8 : index
    %c0_101 = arith.constant 0 : index
    %183 = vector.load %arg18[%c8_100, %c0_101] : memref<96x128xbf16, #tpu.memory_space<vmem>>, vector<64x128xbf16>
    %c1_102 = arith.constant 1 : index
    %c0_103 = arith.constant 0 : index
    %c0_104 = arith.constant 0 : index
    %184 = vector.load %arg5[%c1_102, %c0_103, %c0_104] : memref<9x128x128xbf16, #tpu.memory_space<vmem>>, vector<1x128x128xbf16>
    %185 = vector.shape_cast %184 : vector<1x128x128xbf16> to vector<128x128xbf16>
    %cst_105 = arith.constant dense<0.000000e+00> : vector<64x128xf32>
    %186 = tpu.matmul %183, %185, %cst_105 {dimension_numbers = #tpu.dot_dimension_numbers<[1], [0], [0], [1], [0, 0, 1, 1], [], []>} : vector<64x128xbf16>, vector<128x128xbf16>, vector<64x128xf32> -> vector<64x128xf32>
    %c16_106 = arith.constant 16 : index
    %c0_107 = arith.constant 0 : index
    %187 = vector.load %arg18[%c16_106, %c0_107] : memref<96x128xbf16, #tpu.memory_space<vmem>>, vector<64x128xbf16>
    %c4_108 = arith.constant 4 : index
    %c0_109 = arith.constant 0 : index
    %c0_110 = arith.constant 0 : index
    %188 = vector.load %arg5[%c4_108, %c0_109, %c0_110] : memref<9x128x128xbf16, #tpu.memory_space<vmem>>, vector<1x128x128xbf16>
    %189 = vector.shape_cast %188 : vector<1x128x128xbf16> to vector<128x128xbf16>
    %cst_111 = arith.constant dense<0.000000e+00> : vector<64x128xf32>
    %190 = tpu.matmul %187, %189, %cst_111 {dimension_numbers = #tpu.dot_dimension_numbers<[1], [0], [0], [1], [0, 0, 1, 1], [], []>} : vector<64x128xbf16>, vector<128x128xbf16>, vector<64x128xf32> -> vector<64x128xf32>
    %191 = arith.addf %186, %190 : vector<64x128xf32>
    %c24_112 = arith.constant 24 : index
    %c0_113 = arith.constant 0 : index
    %192 = vector.load %arg18[%c24_112, %c0_113] : memref<96x128xbf16, #tpu.memory_space<vmem>>, vector<64x128xbf16>
    %c7_114 = arith.constant 7 : index
    %c0_115 = arith.constant 0 : index
    %c0_116 = arith.constant 0 : index
    %193 = vector.load %arg5[%c7_114, %c0_115, %c0_116] : memref<9x128x128xbf16, #tpu.memory_space<vmem>>, vector<1x128x128xbf16>
    %194 = vector.shape_cast %193 : vector<1x128x128xbf16> to vector<128x128xbf16>
    %cst_117 = arith.constant dense<0.000000e+00> : vector<64x128xf32>
    %195 = tpu.matmul %192, %194, %cst_117 {dimension_numbers = #tpu.dot_dimension_numbers<[1], [0], [0], [1], [0, 0, 1, 1], [], []>} : vector<64x128xbf16>, vector<128x128xbf16>, vector<64x128xf32> -> vector<64x128xf32>
    %196 = arith.addf %191, %195 : vector<64x128xf32>
    %c7_118 = arith.constant 7 : index
    %c0_119 = arith.constant 0 : index
    %197 = vector.load %arg18[%c7_118, %c0_119] : memref<96x128xbf16, #tpu.memory_space<vmem>>, vector<64x128xbf16>
    %c0_120 = arith.constant 0 : index
    %c0_121 = arith.constant 0 : index
    %c0_122 = arith.constant 0 : index
    %198 = vector.load %arg5[%c0_120, %c0_121, %c0_122] : memref<9x128x128xbf16, #tpu.memory_space<vmem>>, vector<1x128x128xbf16>
    %199 = vector.shape_cast %198 : vector<1x128x128xbf16> to vector<128x128xbf16>
    %cst_123 = arith.constant dense<0.000000e+00> : vector<64x128xf32>
    %200 = tpu.matmul %197, %199, %cst_123 {dimension_numbers = #tpu.dot_dimension_numbers<[1], [0], [0], [1], [0, 0, 1, 1], [], []>} : vector<64x128xbf16>, vector<128x128xbf16>, vector<64x128xf32> -> vector<64x128xf32>
    %c15_124 = arith.constant 15 : index
    %c0_125 = arith.constant 0 : index
    %201 = vector.load %arg18[%c15_124, %c0_125] : memref<96x128xbf16, #tpu.memory_space<vmem>>, vector<64x128xbf16>
    %c3_126 = arith.constant 3 : index
    %c0_127 = arith.constant 0 : index
    %c0_128 = arith.constant 0 : index
    %202 = vector.load %arg5[%c3_126, %c0_127, %c0_128] : memref<9x128x128xbf16, #tpu.memory_space<vmem>>, vector<1x128x128xbf16>
    %203 = vector.shape_cast %202 : vector<1x128x128xbf16> to vector<128x128xbf16>
    %cst_129 = arith.constant dense<0.000000e+00> : vector<64x128xf32>
    %204 = tpu.matmul %201, %203, %cst_129 {dimension_numbers = #tpu.dot_dimension_numbers<[1], [0], [0], [1], [0, 0, 1, 1], [], []>} : vector<64x128xbf16>, vector<128x128xbf16>, vector<64x128xf32> -> vector<64x128xf32>
    %205 = arith.addf %200, %204 : vector<64x128xf32>
    %c23_130 = arith.constant 23 : index
    %c0_131 = arith.constant 0 : index
    %206 = vector.load %arg18[%c23_130, %c0_131] : memref<96x128xbf16, #tpu.memory_space<vmem>>, vector<64x128xbf16>
    %c6_132 = arith.constant 6 : index
    %c0_133 = arith.constant 0 : index
    %c0_134 = arith.constant 0 : index
    %207 = vector.load %arg5[%c6_132, %c0_133, %c0_134] : memref<9x128x128xbf16, #tpu.memory_space<vmem>>, vector<1x128x128xbf16>
    %208 = vector.shape_cast %207 : vector<1x128x128xbf16> to vector<128x128xbf16>
    %cst_135 = arith.constant dense<0.000000e+00> : vector<64x128xf32>
    %209 = tpu.matmul %206, %208, %cst_135 {dimension_numbers = #tpu.dot_dimension_numbers<[1], [0], [0], [1], [0, 0, 1, 1], [], []>} : vector<64x128xbf16>, vector<128x128xbf16>, vector<64x128xf32> -> vector<64x128xf32>
    %210 = arith.addf %205, %209 : vector<64x128xf32>
    %211 = vector.broadcast %20 : vector<64x1xf32> to vector<64x128xf32>
    %212 = arith.mulf %210, %211 : vector<64x128xf32>
    %213 = arith.addf %196, %212 : vector<64x128xf32>
    %c9_136 = arith.constant 9 : index
    %c0_137 = arith.constant 0 : index
    %214 = vector.load %arg18[%c9_136, %c0_137] : memref<96x128xbf16, #tpu.memory_space<vmem>>, vector<64x128xbf16>
    %c2_138 = arith.constant 2 : index
    %c0_139 = arith.constant 0 : index
    %c0_140 = arith.constant 0 : index
    %215 = vector.load %arg5[%c2_138, %c0_139, %c0_140] : memref<9x128x128xbf16, #tpu.memory_space<vmem>>, vector<1x128x128xbf16>
    %216 = vector.shape_cast %215 : vector<1x128x128xbf16> to vector<128x128xbf16>
    %cst_141 = arith.constant dense<0.000000e+00> : vector<64x128xf32>
    %217 = tpu.matmul %214, %216, %cst_141 {dimension_numbers = #tpu.dot_dimension_numbers<[1], [0], [0], [1], [0, 0, 1, 1], [], []>} : vector<64x128xbf16>, vector<128x128xbf16>, vector<64x128xf32> -> vector<64x128xf32>
    %c17_142 = arith.constant 17 : index
    %c0_143 = arith.constant 0 : index
    %218 = vector.load %arg18[%c17_142, %c0_143] : memref<96x128xbf16, #tpu.memory_space<vmem>>, vector<64x128xbf16>
    %c5_144 = arith.constant 5 : index
    %c0_145 = arith.constant 0 : index
    %c0_146 = arith.constant 0 : index
    %219 = vector.load %arg5[%c5_144, %c0_145, %c0_146] : memref<9x128x128xbf16, #tpu.memory_space<vmem>>, vector<1x128x128xbf16>
    %220 = vector.shape_cast %219 : vector<1x128x128xbf16> to vector<128x128xbf16>
    %cst_147 = arith.constant dense<0.000000e+00> : vector<64x128xf32>
    %221 = tpu.matmul %218, %220, %cst_147 {dimension_numbers = #tpu.dot_dimension_numbers<[1], [0], [0], [1], [0, 0, 1, 1], [], []>} : vector<64x128xbf16>, vector<128x128xbf16>, vector<64x128xf32> -> vector<64x128xf32>
    %222 = arith.addf %217, %221 : vector<64x128xf32>
    %c25_148 = arith.constant 25 : index
    %c0_149 = arith.constant 0 : index
    %223 = vector.load %arg18[%c25_148, %c0_149] : memref<96x128xbf16, #tpu.memory_space<vmem>>, vector<64x128xbf16>
    %c8_150 = arith.constant 8 : index
    %c0_151 = arith.constant 0 : index
    %c0_152 = arith.constant 0 : index
    %224 = vector.load %arg5[%c8_150, %c0_151, %c0_152] : memref<9x128x128xbf16, #tpu.memory_space<vmem>>, vector<1x128x128xbf16>
    %225 = vector.shape_cast %224 : vector<1x128x128xbf16> to vector<128x128xbf16>
    %cst_153 = arith.constant dense<0.000000e+00> : vector<64x128xf32>
    %226 = tpu.matmul %223, %225, %cst_153 {dimension_numbers = #tpu.dot_dimension_numbers<[1], [0], [0], [1], [0, 0, 1, 1], [], []>} : vector<64x128xbf16>, vector<128x128xbf16>, vector<64x128xf32> -> vector<64x128xf32>
    %227 = arith.addf %222, %226 : vector<64x128xf32>
    %228 = vector.broadcast %24 : vector<64x1xf32> to vector<64x128xf32>
    %229 = arith.mulf %227, %228 : vector<64x128xf32>
    %230 = arith.addf %213, %229 : vector<64x128xf32>
    %231 = vector.shape_cast %230 : vector<64x128xf32> to vector<1x64x128xf32>
    %cst_154 = arith.constant dense<0.000000e+00> : vector<1xf32>
    %232 = vector.multi_reduction <add>, %231, %cst_154 [1, 2] : vector<1x64x128xf32> to vector<1xf32>
    %233 = vector.shape_cast %232 : vector<1xf32> to vector<1x1x1xf32>
    %234 = vector.extract %233[0, 0, 0] : f32 from vector<1x1x1xf32>
    %235 = vector.broadcast %234 : f32 to vector<1x1xf32>
    %236 = arith.mulf %230, %230 : vector<64x128xf32>
    %237 = vector.shape_cast %236 : vector<64x128xf32> to vector<1x64x128xf32>
    %cst_155 = arith.constant dense<0.000000e+00> : vector<1xf32>
    %238 = vector.multi_reduction <add>, %237, %cst_155 [1, 2] : vector<1x64x128xf32> to vector<1xf32>
    %239 = vector.shape_cast %238 : vector<1xf32> to vector<1x1x1xf32>
    %240 = vector.extract %239[0, 0, 0] : f32 from vector<1x1x1xf32>
    %241 = vector.broadcast %240 : f32 to vector<1x1xf32>
    %cst_156 = arith.constant 3.906250e-03 : f32
    %242 = vector.broadcast %cst_156 : f32 to vector<1x1xf32>
    %243 = arith.mulf %235, %242 : vector<1x1xf32>
    %cst_157 = arith.constant 3.906250e-03 : f32
    %244 = vector.broadcast %cst_157 : f32 to vector<1x1xf32>
    %245 = arith.mulf %241, %244 : vector<1x1xf32>
    %246 = arith.mulf %243, %243 : vector<1x1xf32>
    %247 = arith.subf %245, %246 : vector<1x1xf32>
    %248 = vector.broadcast %243 : vector<1x1xf32> to vector<64x128xf32>
    %249 = arith.subf %230, %248 : vector<64x128xf32>
    %cst_158 = arith.constant 9.99999974E-6 : f32
    %250 = vector.broadcast %cst_158 : f32 to vector<1x1xf32>
    %251 = arith.addf %247, %250 : vector<1x1xf32>
    %252 = math.rsqrt %251 : vector<1x1xf32>
    %253 = vector.broadcast %252 : vector<1x1xf32> to vector<64x128xf32>
    %254 = arith.mulf %249, %253 : vector<64x128xf32>
    %c0_159 = arith.constant 0 : index
    %c0_160 = arith.constant 0 : index
    %255 = vector.load %arg6[%c0_159, %c0_160] : memref<1x128xf32, #tpu.memory_space<vmem>>, vector<1x128xf32>
    %256 = vector.broadcast %255 : vector<1x128xf32> to vector<64x128xf32>
    %257 = arith.mulf %254, %256 : vector<64x128xf32>
    %c0_161 = arith.constant 0 : index
    %c0_162 = arith.constant 0 : index
    %258 = vector.load %arg7[%c0_161, %c0_162] : memref<1x128xf32, #tpu.memory_space<vmem>>, vector<1x128xf32>
    %259 = vector.broadcast %258 : vector<1x128xf32> to vector<64x128xf32>
    %260 = arith.addf %257, %259 : vector<64x128xf32>
    %261 = arith.addf %182, %260 : vector<64x128xf32>
    %cst_163 = arith.constant 5.000000e-01 : f32
    %262 = vector.broadcast %cst_163 : f32 to vector<64x128xf32>
    %263 = arith.mulf %262, %261 : vector<64x128xf32>
    %cst_164 = arith.constant 4.471500e-02 : f32
    %264 = vector.broadcast %cst_164 : f32 to vector<64x128xf32>
    %265 = arith.mulf %264, %261 : vector<64x128xf32>
    %266 = arith.mulf %265, %261 : vector<64x128xf32>
    %267 = arith.mulf %266, %261 : vector<64x128xf32>
    %268 = arith.addf %261, %267 : vector<64x128xf32>
    %cst_165 = arith.constant 0.797884583 : f32
    %269 = vector.broadcast %cst_165 : f32 to vector<64x128xf32>
    %270 = arith.mulf %269, %268 : vector<64x128xf32>
    %271 = math.tanh %270 : vector<64x128xf32>
    %cst_166 = arith.constant 1.000000e+00 : f32
    %272 = vector.broadcast %cst_166 : f32 to vector<64x128xf32>
    %273 = arith.addf %272, %271 : vector<64x128xf32>
    %274 = arith.mulf %263, %273 : vector<64x128xf32>
    %275 = arith.truncf %274 : vector<64x128xf32> to vector<64x128xbf16>
    %c16_167 = arith.constant 16 : index
    %c0_168 = arith.constant 0 : index
    %276 = vector.load %arg18[%c16_167, %c0_168] : memref<96x128xbf16, #tpu.memory_space<vmem>>, vector<64x128xbf16>
    tpu.vector_store %arg18[%c16_167, %c0_168], %275 {strides = array<i32>} : memref<96x128xbf16, #tpu.memory_space<vmem>>, vector<64x128xbf16>,
    %c8_169 = arith.constant 8 : index
    %c0_170 = arith.constant 0 : index
    %277 = vector.load %arg18[%c8_169, %c0_170] : memref<96x128xbf16, #tpu.memory_space<vmem>>, vector<64x128xbf16>
    %c1_171 = arith.constant 1 : index
    %c0_172 = arith.constant 0 : index
    %c0_173 = arith.constant 0 : index
    %278 = vector.load %arg8[%c1_171, %c0_172, %c0_173] : memref<9x128x128xbf16, #tpu.memory_space<vmem>>, vector<1x128x128xbf16>
    %279 = vector.shape_cast %278 : vector<1x128x128xbf16> to vector<128x128xbf16>
    %cst_174 = arith.constant dense<0.000000e+00> : vector<64x128xf32>
    %280 = tpu.matmul %277, %279, %cst_174 {dimension_numbers = #tpu.dot_dimension_numbers<[1], [0], [0], [1], [0, 0, 1, 1], [], []>} : vector<64x128xbf16>, vector<128x128xbf16>, vector<64x128xf32> -> vector<64x128xf32>
    %c16_175 = arith.constant 16 : index
    %c0_176 = arith.constant 0 : index
    %281 = vector.load %arg18[%c16_175, %c0_176] : memref<96x128xbf16, #tpu.memory_space<vmem>>, vector<64x128xbf16>
    %c4_177 = arith.constant 4 : index
    %c0_178 = arith.constant 0 : index
    %c0_179 = arith.constant 0 : index
    %282 = vector.load %arg8[%c4_177, %c0_178, %c0_179] : memref<9x128x128xbf16, #tpu.memory_space<vmem>>, vector<1x128x128xbf16>
    %283 = vector.shape_cast %282 : vector<1x128x128xbf16> to vector<128x128xbf16>
    %cst_180 = arith.constant dense<0.000000e+00> : vector<64x128xf32>
    %284 = tpu.matmul %281, %283, %cst_180 {dimension_numbers = #tpu.dot_dimension_numbers<[1], [0], [0], [1], [0, 0, 1, 1], [], []>} : vector<64x128xbf16>, vector<128x128xbf16>, vector<64x128xf32> -> vector<64x128xf32>
    %285 = arith.addf %280, %284 : vector<64x128xf32>
    %c24_181 = arith.constant 24 : index
    %c0_182 = arith.constant 0 : index
    %286 = vector.load %arg18[%c24_181, %c0_182] : memref<96x128xbf16, #tpu.memory_space<vmem>>, vector<64x128xbf16>
    %c7_183 = arith.constant 7 : index
    %c0_184 = arith.constant 0 : index
    %c0_185 = arith.constant 0 : index
    %287 = vector.load %arg8[%c7_183, %c0_184, %c0_185] : memref<9x128x128xbf16, #tpu.memory_space<vmem>>, vector<1x128x128xbf16>
    %288 = vector.shape_cast %287 : vector<1x128x128xbf16> to vector<128x128xbf16>
    %cst_186 = arith.constant dense<0.000000e+00> : vector<64x128xf32>
    %289 = tpu.matmul %286, %288, %cst_186 {dimension_numbers = #tpu.dot_dimension_numbers<[1], [0], [0], [1], [0, 0, 1, 1], [], []>} : vector<64x128xbf16>, vector<128x128xbf16>, vector<64x128xf32> -> vector<64x128xf32>
    %290 = arith.addf %285, %289 : vector<64x128xf32>
    %c7_187 = arith.constant 7 : index
    %c0_188 = arith.constant 0 : index
    %291 = vector.load %arg18[%c7_187, %c0_188] : memref<96x128xbf16, #tpu.memory_space<vmem>>, vector<64x128xbf16>
    %c0_189 = arith.constant 0 : index
    %c0_190 = arith.constant 0 : index
    %c0_191 = arith.constant 0 : index
    %292 = vector.load %arg8[%c0_189, %c0_190, %c0_191] : memref<9x128x128xbf16, #tpu.memory_space<vmem>>, vector<1x128x128xbf16>
    %293 = vector.shape_cast %292 : vector<1x128x128xbf16> to vector<128x128xbf16>
    %cst_192 = arith.constant dense<0.000000e+00> : vector<64x128xf32>
    %294 = tpu.matmul %291, %293, %cst_192 {dimension_numbers = #tpu.dot_dimension_numbers<[1], [0], [0], [1], [0, 0, 1, 1], [], []>} : vector<64x128xbf16>, vector<128x128xbf16>, vector<64x128xf32> -> vector<64x128xf32>
    %c15_193 = arith.constant 15 : index
    %c0_194 = arith.constant 0 : index
    %295 = vector.load %arg18[%c15_193, %c0_194] : memref<96x128xbf16, #tpu.memory_space<vmem>>, vector<64x128xbf16>
    %c3_195 = arith.constant 3 : index
    %c0_196 = arith.constant 0 : index
    %c0_197 = arith.constant 0 : index
    %296 = vector.load %arg8[%c3_195, %c0_196, %c0_197] : memref<9x128x128xbf16, #tpu.memory_space<vmem>>, vector<1x128x128xbf16>
    %297 = vector.shape_cast %296 : vector<1x128x128xbf16> to vector<128x128xbf16>
    %cst_198 = arith.constant dense<0.000000e+00> : vector<64x128xf32>
    %298 = tpu.matmul %295, %297, %cst_198 {dimension_numbers = #tpu.dot_dimension_numbers<[1], [0], [0], [1], [0, 0, 1, 1], [], []>} : vector<64x128xbf16>, vector<128x128xbf16>, vector<64x128xf32> -> vector<64x128xf32>
    %299 = arith.addf %294, %298 : vector<64x128xf32>
    %c23_199 = arith.constant 23 : index
    %c0_200 = arith.constant 0 : index
    %300 = vector.load %arg18[%c23_199, %c0_200] : memref<96x128xbf16, #tpu.memory_space<vmem>>, vector<64x128xbf16>
    %c6_201 = arith.constant 6 : index
    %c0_202 = arith.constant 0 : index
    %c0_203 = arith.constant 0 : index
    %301 = vector.load %arg8[%c6_201, %c0_202, %c0_203] : memref<9x128x128xbf16, #tpu.memory_space<vmem>>, vector<1x128x128xbf16>
    %302 = vector.shape_cast %301 : vector<1x128x128xbf16> to vector<128x128xbf16>
    %cst_204 = arith.constant dense<0.000000e+00> : vector<64x128xf32>
    %303 = tpu.matmul %300, %302, %cst_204 {dimension_numbers = #tpu.dot_dimension_numbers<[1], [0], [0], [1], [0, 0, 1, 1], [], []>} : vector<64x128xbf16>, vector<128x128xbf16>, vector<64x128xf32> -> vector<64x128xf32>
    %304 = arith.addf %299, %303 : vector<64x128xf32>
    %305 = vector.broadcast %20 : vector<64x1xf32> to vector<64x128xf32>
    %306 = arith.mulf %304, %305 : vector<64x128xf32>
    %307 = arith.addf %290, %306 : vector<64x128xf32>
    %c9_205 = arith.constant 9 : index
    %c0_206 = arith.constant 0 : index
    %308 = vector.load %arg18[%c9_205, %c0_206] : memref<96x128xbf16, #tpu.memory_space<vmem>>, vector<64x128xbf16>
    %c2_207 = arith.constant 2 : index
    %c0_208 = arith.constant 0 : index
    %c0_209 = arith.constant 0 : index
    %309 = vector.load %arg8[%c2_207, %c0_208, %c0_209] : memref<9x128x128xbf16, #tpu.memory_space<vmem>>, vector<1x128x128xbf16>
    %310 = vector.shape_cast %309 : vector<1x128x128xbf16> to vector<128x128xbf16>
    %cst_210 = arith.constant dense<0.000000e+00> : vector<64x128xf32>
    %311 = tpu.matmul %308, %310, %cst_210 {dimension_numbers = #tpu.dot_dimension_numbers<[1], [0], [0], [1], [0, 0, 1, 1], [], []>} : vector<64x128xbf16>, vector<128x128xbf16>, vector<64x128xf32> -> vector<64x128xf32>
    %c17_211 = arith.constant 17 : index
    %c0_212 = arith.constant 0 : index
    %312 = vector.load %arg18[%c17_211, %c0_212] : memref<96x128xbf16, #tpu.memory_space<vmem>>, vector<64x128xbf16>
    %c5_213 = arith.constant 5 : index
    %c0_214 = arith.constant 0 : index
    %c0_215 = arith.constant 0 : index
    %313 = vector.load %arg8[%c5_213, %c0_214, %c0_215] : memref<9x128x128xbf16, #tpu.memory_space<vmem>>, vector<1x128x128xbf16>
    %314 = vector.shape_cast %313 : vector<1x128x128xbf16> to vector<128x128xbf16>
    %cst_216 = arith.constant dense<0.000000e+00> : vector<64x128xf32>
    %315 = tpu.matmul %312, %314, %cst_216 {dimension_numbers = #tpu.dot_dimension_numbers<[1], [0], [0], [1], [0, 0, 1, 1], [], []>} : vector<64x128xbf16>, vector<128x128xbf16>, vector<64x128xf32> -> vector<64x128xf32>
    %316 = arith.addf %311, %315 : vector<64x128xf32>
    %c25_217 = arith.constant 25 : index
    %c0_218 = arith.constant 0 : index
    %317 = vector.load %arg18[%c25_217, %c0_218] : memref<96x128xbf16, #tpu.memory_space<vmem>>, vector<64x128xbf16>
    %c8_219 = arith.constant 8 : index
    %c0_220 = arith.constant 0 : index
    %c0_221 = arith.constant 0 : index
    %318 = vector.load %arg8[%c8_219, %c0_220, %c0_221] : memref<9x128x128xbf16, #tpu.memory_space<vmem>>, vector<1x128x128xbf16>
    %319 = vector.shape_cast %318 : vector<1x128x128xbf16> to vector<128x128xbf16>
    %cst_222 = arith.constant dense<0.000000e+00> : vector<64x128xf32>
    %320 = tpu.matmul %317, %319, %cst_222 {dimension_numbers = #tpu.dot_dimension_numbers<[1], [0], [0], [1], [0, 0, 1, 1], [], []>} : vector<64x128xbf16>, vector<128x128xbf16>, vector<64x128xf32> -> vector<64x128xf32>
    %321 = arith.addf %316, %320 : vector<64x128xf32>
    %322 = vector.broadcast %24 : vector<64x1xf32> to vector<64x128xf32>
    %323 = arith.mulf %321, %322 : vector<64x128xf32>
    %324 = arith.addf %307, %323 : vector<64x128xf32>
    %325 = vector.shape_cast %324 : vector<64x128xf32> to vector<1x64x128xf32>
    %cst_223 = arith.constant dense<0.000000e+00> : vector<1xf32>
    %326 = vector.multi_reduction <add>, %325, %cst_223 [1, 2] : vector<1x64x128xf32> to vector<1xf32>
    %327 = vector.shape_cast %326 : vector<1xf32> to vector<1x1x1xf32>
    %328 = vector.extract %327[0, 0, 0] : f32 from vector<1x1x1xf32>
    %329 = vector.broadcast %328 : f32 to vector<1x1xf32>
    %330 = arith.mulf %324, %324 : vector<64x128xf32>
    %331 = vector.shape_cast %330 : vector<64x128xf32> to vector<1x64x128xf32>
    %cst_224 = arith.constant dense<0.000000e+00> : vector<1xf32>
    %332 = vector.multi_reduction <add>, %331, %cst_224 [1, 2] : vector<1x64x128xf32> to vector<1xf32>
    %333 = vector.shape_cast %332 : vector<1xf32> to vector<1x1x1xf32>
    %334 = vector.extract %333[0, 0, 0] : f32 from vector<1x1x1xf32>
    %335 = vector.broadcast %334 : f32 to vector<1x1xf32>
    %cst_225 = arith.constant 0.001953125 : f32
    %336 = vector.broadcast %cst_225 : f32 to vector<1x1xf32>
    %337 = arith.mulf %329, %336 : vector<1x1xf32>
    %cst_226 = arith.constant 0.001953125 : f32
    %338 = vector.broadcast %cst_226 : f32 to vector<1x1xf32>
    %339 = arith.mulf %335, %338 : vector<1x1xf32>
    %340 = arith.mulf %337, %337 : vector<1x1xf32>
    %341 = arith.subf %339, %340 : vector<1x1xf32>
    %342 = vector.broadcast %337 : vector<1x1xf32> to vector<64x128xf32>
    %343 = arith.subf %324, %342 : vector<64x128xf32>
    %cst_227 = arith.constant 9.99999974E-6 : f32
    %344 = vector.broadcast %cst_227 : f32 to vector<1x1xf32>
    %345 = arith.addf %341, %344 : vector<1x1xf32>
    %346 = math.rsqrt %345 : vector<1x1xf32>
    %347 = vector.broadcast %346 : vector<1x1xf32> to vector<64x128xf32>
    %348 = arith.mulf %343, %347 : vector<64x128xf32>
    %c0_228 = arith.constant 0 : index
    %c0_229 = arith.constant 0 : index
    %349 = vector.load %arg9[%c0_228, %c0_229] : memref<1x128xf32, #tpu.memory_space<vmem>>, vector<1x128xf32>
    %350 = vector.broadcast %349 : vector<1x128xf32> to vector<64x128xf32>
    %351 = arith.mulf %348, %350 : vector<64x128xf32>
    %c0_230 = arith.constant 0 : index
    %c0_231 = arith.constant 0 : index
    %352 = vector.load %arg10[%c0_230, %c0_231] : memref<1x128xf32, #tpu.memory_space<vmem>>, vector<1x128xf32>
    %353 = vector.broadcast %352 : vector<1x128xf32> to vector<64x128xf32>
    %354 = arith.addf %351, %353 : vector<64x128xf32>
    %cst_232 = arith.constant 5.000000e-01 : f32
    %355 = vector.broadcast %cst_232 : f32 to vector<64x128xf32>
    %356 = arith.mulf %355, %354 : vector<64x128xf32>
    %cst_233 = arith.constant 4.471500e-02 : f32
    %357 = vector.broadcast %cst_233 : f32 to vector<64x128xf32>
    %358 = arith.mulf %357, %354 : vector<64x128xf32>
    %359 = arith.mulf %358, %354 : vector<64x128xf32>
    %360 = arith.mulf %359, %354 : vector<64x128xf32>
    %361 = arith.addf %354, %360 : vector<64x128xf32>
    %cst_234 = arith.constant 0.797884583 : f32
    %362 = vector.broadcast %cst_234 : f32 to vector<64x128xf32>
    %363 = arith.mulf %362, %361 : vector<64x128xf32>
    %364 = math.tanh %363 : vector<64x128xf32>
    %cst_235 = arith.constant 1.000000e+00 : f32
    %365 = vector.broadcast %cst_235 : f32 to vector<64x128xf32>
    %366 = arith.addf %365, %364 : vector<64x128xf32>
    %367 = arith.mulf %356, %366 : vector<64x128xf32>
    %368 = arith.truncf %367 : vector<64x128xf32> to vector<64x128xbf16>
    %c16_236 = arith.constant 16 : index
    %c0_237 = arith.constant 0 : index
    %369 = vector.load %arg18[%c16_236, %c0_237] : memref<96x128xbf16, #tpu.memory_space<vmem>>, vector<64x128xbf16>
    tpu.vector_store %arg18[%c16_236, %c0_237], %368 {strides = array<i32>} : memref<96x128xbf16, #tpu.memory_space<vmem>>, vector<64x128xbf16>,
    %c8_238 = arith.constant 8 : index
    %c0_239 = arith.constant 0 : index
    %370 = vector.load %arg18[%c8_238, %c0_239] : memref<96x128xbf16, #tpu.memory_space<vmem>>, vector<64x128xbf16>
    %c1_240 = arith.constant 1 : index
    %c0_241 = arith.constant 0 : index
    %c0_242 = arith.constant 0 : index
    %371 = vector.load %arg11[%c1_240, %c0_241, %c0_242] : memref<9x128x128xbf16, #tpu.memory_space<vmem>>, vector<1x128x128xbf16>
    %372 = vector.shape_cast %371 : vector<1x128x128xbf16> to vector<128x128xbf16>
    %cst_243 = arith.constant dense<0.000000e+00> : vector<64x128xf32>
    %373 = tpu.matmul %370, %372, %cst_243 {dimension_numbers = #tpu.dot_dimension_numbers<[1], [0], [0], [1], [0, 0, 1, 1], [], []>} : vector<64x128xbf16>, vector<128x128xbf16>, vector<64x128xf32> -> vector<64x128xf32>
    %c16_244 = arith.constant 16 : index
    %c0_245 = arith.constant 0 : index
    %374 = vector.load %arg18[%c16_244, %c0_245] : memref<96x128xbf16, #tpu.memory_space<vmem>>, vector<64x128xbf16>
    %c4_246 = arith.constant 4 : index
    %c0_247 = arith.constant 0 : index
    %c0_248 = arith.constant 0 : index
    %375 = vector.load %arg11[%c4_246, %c0_247, %c0_248] : memref<9x128x128xbf16, #tpu.memory_space<vmem>>, vector<1x128x128xbf16>
    %376 = vector.shape_cast %375 : vector<1x128x128xbf16> to vector<128x128xbf16>
    %cst_249 = arith.constant dense<0.000000e+00> : vector<64x128xf32>
    %377 = tpu.matmul %374, %376, %cst_249 {dimension_numbers = #tpu.dot_dimension_numbers<[1], [0], [0], [1], [0, 0, 1, 1], [], []>} : vector<64x128xbf16>, vector<128x128xbf16>, vector<64x128xf32> -> vector<64x128xf32>
    %378 = arith.addf %373, %377 : vector<64x128xf32>
    %c24_250 = arith.constant 24 : index
    %c0_251 = arith.constant 0 : index
    %379 = vector.load %arg18[%c24_250, %c0_251] : memref<96x128xbf16, #tpu.memory_space<vmem>>, vector<64x128xbf16>
    %c7_252 = arith.constant 7 : index
    %c0_253 = arith.constant 0 : index
    %c0_254 = arith.constant 0 : index
    %380 = vector.load %arg11[%c7_252, %c0_253, %c0_254] : memref<9x128x128xbf16, #tpu.memory_space<vmem>>, vector<1x128x128xbf16>
    %381 = vector.shape_cast %380 : vector<1x128x128xbf16> to vector<128x128xbf16>
    %cst_255 = arith.constant dense<0.000000e+00> : vector<64x128xf32>
    %382 = tpu.matmul %379, %381, %cst_255 {dimension_numbers = #tpu.dot_dimension_numbers<[1], [0], [0], [1], [0, 0, 1, 1], [], []>} : vector<64x128xbf16>, vector<128x128xbf16>, vector<64x128xf32> -> vector<64x128xf32>
    %383 = arith.addf %378, %382 : vector<64x128xf32>
    %c7_256 = arith.constant 7 : index
    %c0_257 = arith.constant 0 : index
    %384 = vector.load %arg18[%c7_256, %c0_257] : memref<96x128xbf16, #tpu.memory_space<vmem>>, vector<64x128xbf16>
    %c0_258 = arith.constant 0 : index
    %c0_259 = arith.constant 0 : index
    %c0_260 = arith.constant 0 : index
    %385 = vector.load %arg11[%c0_258, %c0_259, %c0_260] : memref<9x128x128xbf16, #tpu.memory_space<vmem>>, vector<1x128x128xbf16>
    %386 = vector.shape_cast %385 : vector<1x128x128xbf16> to vector<128x128xbf16>
    %cst_261 = arith.constant dense<0.000000e+00> : vector<64x128xf32>
    %387 = tpu.matmul %384, %386, %cst_261 {dimension_numbers = #tpu.dot_dimension_numbers<[1], [0], [0], [1], [0, 0, 1, 1], [], []>} : vector<64x128xbf16>, vector<128x128xbf16>, vector<64x128xf32> -> vector<64x128xf32>
    %c15_262 = arith.constant 15 : index
    %c0_263 = arith.constant 0 : index
    %388 = vector.load %arg18[%c15_262, %c0_263] : memref<96x128xbf16, #tpu.memory_space<vmem>>, vector<64x128xbf16>
    %c3_264 = arith.constant 3 : index
    %c0_265 = arith.constant 0 : index
    %c0_266 = arith.constant 0 : index
    %389 = vector.load %arg11[%c3_264, %c0_265, %c0_266] : memref<9x128x128xbf16, #tpu.memory_space<vmem>>, vector<1x128x128xbf16>
    %390 = vector.shape_cast %389 : vector<1x128x128xbf16> to vector<128x128xbf16>
    %cst_267 = arith.constant dense<0.000000e+00> : vector<64x128xf32>
    %391 = tpu.matmul %388, %390, %cst_267 {dimension_numbers = #tpu.dot_dimension_numbers<[1], [0], [0], [1], [0, 0, 1, 1], [], []>} : vector<64x128xbf16>, vector<128x128xbf16>, vector<64x128xf32> -> vector<64x128xf32>
    %392 = arith.addf %387, %391 : vector<64x128xf32>
    %c23_268 = arith.constant 23 : index
    %c0_269 = arith.constant 0 : index
    %393 = vector.load %arg18[%c23_268, %c0_269] : memref<96x128xbf16, #tpu.memory_space<vmem>>, vector<64x128xbf16>
    %c6_270 = arith.constant 6 : index
    %c0_271 = arith.constant 0 : index
    %c0_272 = arith.constant 0 : index
    %394 = vector.load %arg11[%c6_270, %c0_271, %c0_272] : memref<9x128x128xbf16, #tpu.memory_space<vmem>>, vector<1x128x128xbf16>
    %395 = vector.shape_cast %394 : vector<1x128x128xbf16> to vector<128x128xbf16>
    %cst_273 = arith.constant dense<0.000000e+00> : vector<64x128xf32>
    %396 = tpu.matmul %393, %395, %cst_273 {dimension_numbers = #tpu.dot_dimension_numbers<[1], [0], [0], [1], [0, 0, 1, 1], [], []>} : vector<64x128xbf16>, vector<128x128xbf16>, vector<64x128xf32> -> vector<64x128xf32>
    %397 = arith.addf %392, %396 : vector<64x128xf32>
    %398 = vector.broadcast %20 : vector<64x1xf32> to vector<64x128xf32>
    %399 = arith.mulf %397, %398 : vector<64x128xf32>
    %400 = arith.addf %383, %399 : vector<64x128xf32>
    %c9_274 = arith.constant 9 : index
    %c0_275 = arith.constant 0 : index
    %401 = vector.load %arg18[%c9_274, %c0_275] : memref<96x128xbf16, #tpu.memory_space<vmem>>, vector<64x128xbf16>
    %c2_276 = arith.constant 2 : index
    %c0_277 = arith.constant 0 : index
    %c0_278 = arith.constant 0 : index
    %402 = vector.load %arg11[%c2_276, %c0_277, %c0_278] : memref<9x128x128xbf16, #tpu.memory_space<vmem>>, vector<1x128x128xbf16>
    %403 = vector.shape_cast %402 : vector<1x128x128xbf16> to vector<128x128xbf16>
    %cst_279 = arith.constant dense<0.000000e+00> : vector<64x128xf32>
    %404 = tpu.matmul %401, %403, %cst_279 {dimension_numbers = #tpu.dot_dimension_numbers<[1], [0], [0], [1], [0, 0, 1, 1], [], []>} : vector<64x128xbf16>, vector<128x128xbf16>, vector<64x128xf32> -> vector<64x128xf32>
    %c17_280 = arith.constant 17 : index
    %c0_281 = arith.constant 0 : index
    %405 = vector.load %arg18[%c17_280, %c0_281] : memref<96x128xbf16, #tpu.memory_space<vmem>>, vector<64x128xbf16>
    %c5_282 = arith.constant 5 : index
    %c0_283 = arith.constant 0 : index
    %c0_284 = arith.constant 0 : index
    %406 = vector.load %arg11[%c5_282, %c0_283, %c0_284] : memref<9x128x128xbf16, #tpu.memory_space<vmem>>, vector<1x128x128xbf16>
    %407 = vector.shape_cast %406 : vector<1x128x128xbf16> to vector<128x128xbf16>
    %cst_285 = arith.constant dense<0.000000e+00> : vector<64x128xf32>
    %408 = tpu.matmul %405, %407, %cst_285 {dimension_numbers = #tpu.dot_dimension_numbers<[1], [0], [0], [1], [0, 0, 1, 1], [], []>} : vector<64x128xbf16>, vector<128x128xbf16>, vector<64x128xf32> -> vector<64x128xf32>
    %409 = arith.addf %404, %408 : vector<64x128xf32>
    %c25_286 = arith.constant 25 : index
    %c0_287 = arith.constant 0 : index
    %410 = vector.load %arg18[%c25_286, %c0_287] : memref<96x128xbf16, #tpu.memory_space<vmem>>, vector<64x128xbf16>
    %c8_288 = arith.constant 8 : index
    %c0_289 = arith.constant 0 : index
    %c0_290 = arith.constant 0 : index
    %411 = vector.load %arg11[%c8_288, %c0_289, %c0_290] : memref<9x128x128xbf16, #tpu.memory_space<vmem>>, vector<1x128x128xbf16>
    %412 = vector.shape_cast %411 : vector<1x128x128xbf16> to vector<128x128xbf16>
    %cst_291 = arith.constant dense<0.000000e+00> : vector<64x128xf32>
    %413 = tpu.matmul %410, %412, %cst_291 {dimension_numbers = #tpu.dot_dimension_numbers<[1], [0], [0], [1], [0, 0, 1, 1], [], []>} : vector<64x128xbf16>, vector<128x128xbf16>, vector<64x128xf32> -> vector<64x128xf32>
    %414 = arith.addf %409, %413 : vector<64x128xf32>
    %415 = vector.broadcast %24 : vector<64x1xf32> to vector<64x128xf32>
    %416 = arith.mulf %414, %415 : vector<64x128xf32>
    %417 = arith.addf %400, %416 : vector<64x128xf32>
    %418 = vector.shape_cast %417 : vector<64x128xf32> to vector<1x64x128xf32>
    %cst_292 = arith.constant dense<0.000000e+00> : vector<1xf32>
    %419 = vector.multi_reduction <add>, %418, %cst_292 [1, 2] : vector<1x64x128xf32> to vector<1xf32>
    %420 = vector.shape_cast %419 : vector<1xf32> to vector<1x1x1xf32>
    %421 = vector.extract %420[0, 0, 0] : f32 from vector<1x1x1xf32>
    %422 = vector.broadcast %421 : f32 to vector<1x1xf32>
    %423 = arith.mulf %417, %417 : vector<64x128xf32>
    %424 = vector.shape_cast %423 : vector<64x128xf32> to vector<1x64x128xf32>
    %cst_293 = arith.constant dense<0.000000e+00> : vector<1xf32>
    %425 = vector.multi_reduction <add>, %424, %cst_293 [1, 2] : vector<1x64x128xf32> to vector<1xf32>
    %426 = vector.shape_cast %425 : vector<1xf32> to vector<1x1x1xf32>
    %427 = vector.extract %426[0, 0, 0] : f32 from vector<1x1x1xf32>
    %428 = vector.broadcast %427 : f32 to vector<1x1xf32>
    %cst_294 = arith.constant 0.001953125 : f32
    %429 = vector.broadcast %cst_294 : f32 to vector<1x1xf32>
    %430 = arith.mulf %422, %429 : vector<1x1xf32>
    %cst_295 = arith.constant 0.001953125 : f32
    %431 = vector.broadcast %cst_295 : f32 to vector<1x1xf32>
    %432 = arith.mulf %428, %431 : vector<1x1xf32>
    %433 = arith.mulf %430, %430 : vector<1x1xf32>
    %434 = arith.subf %432, %433 : vector<1x1xf32>
    %435 = vector.broadcast %430 : vector<1x1xf32> to vector<64x128xf32>
    %436 = arith.subf %417, %435 : vector<64x128xf32>
    %cst_296 = arith.constant 9.99999974E-6 : f32
    %437 = vector.broadcast %cst_296 : f32 to vector<1x1xf32>
    %438 = arith.addf %434, %437 : vector<1x1xf32>
    %439 = math.rsqrt %438 : vector<1x1xf32>
    %440 = vector.broadcast %439 : vector<1x1xf32> to vector<64x128xf32>
    %441 = arith.mulf %436, %440 : vector<64x128xf32>
    %c0_297 = arith.constant 0 : index
    %c0_298 = arith.constant 0 : index
    %442 = vector.load %arg12[%c0_297, %c0_298] : memref<1x128xf32, #tpu.memory_space<vmem>>, vector<1x128xf32>
    %443 = vector.broadcast %442 : vector<1x128xf32> to vector<64x128xf32>
    %444 = arith.mulf %441, %443 : vector<64x128xf32>
    %c0_299 = arith.constant 0 : index
    %c0_300 = arith.constant 0 : index
    %445 = vector.load %arg13[%c0_299, %c0_300] : memref<1x128xf32, #tpu.memory_space<vmem>>, vector<1x128xf32>
    %446 = vector.broadcast %445 : vector<1x128xf32> to vector<64x128xf32>
    %447 = arith.addf %444, %446 : vector<64x128xf32>
    %c0_301 = arith.constant 0 : index
    %c0_302 = arith.constant 0 : index
    %c0_303 = arith.constant 0 : index
    %448 = vector.load %arg14[%c0_301, %c0_302, %c0_303] : memref<1x1x256xf32, #tpu.memory_space<vmem>>, vector<1x1x256xf32>
    %449 = vector.shape_cast %448 : vector<1x1x256xf32> to vector<1x256xf32>
    %cst_304 = arith.constant 0.000000e+00 : f32
    %450 = vector.broadcast %cst_304 : f32 to vector<1x256xf32>
    %451 = arith.subf %450, %449 : vector<1x256xf32>
    %452 = math.exp %451 : vector<1x256xf32>
    %cst_305 = arith.constant 1.000000e+00 : f32
    %453 = vector.broadcast %cst_305 : f32 to vector<1x256xf32>
    %454 = arith.addf %453, %452 : vector<1x256xf32>
    %cst_306 = arith.constant 1.000000e+00 : f32
    %455 = vector.broadcast %cst_306 : f32 to vector<1x256xf32>
    %456 = arith.divf %455, %454 : vector<1x256xf32>
    %457 = arith.mulf %449, %456 : vector<1x256xf32>
    %458 = arith.truncf %457 : vector<1x256xf32> to vector<1x256xbf16>
    %c0_307 = arith.constant 0 : index
    %c0_308 = arith.constant 0 : index
    %459 = vector.load %arg15[%c0_307, %c0_308] : memref<256x128xbf16, #tpu.memory_space<vmem>>, vector<256x128xbf16>
    %cst_309 = arith.constant dense<0.000000e+00> : vector<1x128xf32>
    %460 = tpu.matmul %458, %459, %cst_309 {dimension_numbers = #tpu.dot_dimension_numbers<[1], [0], [0], [1], [0, 0, 1, 1], [], []>} : vector<1x256xbf16>, vector<256x128xbf16>, vector<1x128xf32> -> vector<1x128xf32>
    %c0_310 = arith.constant 0 : index
    %c0_311 = arith.constant 0 : index
    %461 = vector.load %arg16[%c0_310, %c0_311] : memref<1x128xf32, #tpu.memory_space<vmem>>, vector<1x128xf32>
    %462 = arith.addf %460, %461 : vector<1x128xf32>
    %463 = vector.broadcast %462 : vector<1x128xf32> to vector<64x128xf32>
    %464 = arith.addf %447, %463 : vector<64x128xf32>
    %465 = vector.extract_strided_slice %464 {offsets = [0, 0], sizes = [64, 8], strides = [1, 1]} : vector<64x128xf32> to vector<64x8xf32>
    %c0_312 = arith.constant 0 : index
    %c0_313 = arith.constant 0 : index
    %c0_314 = arith.constant 0 : index
    %466 = vector.load %arg17[%c0_312, %c0_313, %c0_314] : memref<1x64x8xf32, #tpu.memory_space<vmem>>, vector<1x64x8xf32>
    %467 = vector.shape_cast %466 : vector<1x64x8xf32> to vector<64x8xf32>
    %468 = vector.shape_cast %465 : vector<64x8xf32> to vector<1x64x8xf32>
    tpu.vector_store %arg17[%c0_312, %c0_313, %c0_314], %468 {strides = array<i32>} : memref<1x64x8xf32, #tpu.memory_space<vmem>>, vector<1x64x8xf32>,
    return
  }
  func.func @transform_0(%arg0: i32) -> (i32, i32, i32, i32, i32) {
    %c0_i32 = arith.constant 0 : i32
    %c0_i32_0 = arith.constant 0 : i32
    %c0_i32_1 = arith.constant 0 : i32
    %c0_i32_2 = arith.constant 0 : i32
    %c0_i32_3 = arith.constant 0 : i32
    return %arg0, %c0_i32, %c0_i32_0, %c0_i32_1, %c0_i32_2 : i32, i32, i32, i32, i32
  }
  func.func @transform_1(%arg0: i32) -> (i32, i32, i32) {
    %c0_i32 = arith.constant 0 : i32
    %c0_i32_0 = arith.constant 0 : i32
    %c0_i32_1 = arith.constant 0 : i32
    %c0_i32_2 = arith.constant 0 : i32
    return %c0_i32, %c0_i32_0, %c0_i32_1 : i32, i32, i32
  }
  func.func @transform_2(%arg0: i32) -> (i32, i32) {
    %c0_i32 = arith.constant 0 : i32
    %c0_i32_0 = arith.constant 0 : i32
    %c0_i32_1 = arith.constant 0 : i32
    return %c0_i32, %c0_i32_0 : i32, i32
  }
  func.func @transform_3(%arg0: i32) -> (i32, i32) {
    %c0_i32 = arith.constant 0 : i32
    %c0_i32_0 = arith.constant 0 : i32
    %c0_i32_1 = arith.constant 0 : i32
    return %c0_i32, %c0_i32_0 : i32, i32
  }
  func.func @transform_4(%arg0: i32) -> (i32, i32, i32) {
    %c0_i32 = arith.constant 0 : i32
    %c0_i32_0 = arith.constant 0 : i32
    %c0_i32_1 = arith.constant 0 : i32
    %c0_i32_2 = arith.constant 0 : i32
    return %c0_i32, %c0_i32_0, %c0_i32_1 : i32, i32, i32
  }
  func.func @transform_5(%arg0: i32) -> (i32, i32) {
    %c0_i32 = arith.constant 0 : i32
    %c0_i32_0 = arith.constant 0 : i32
    %c0_i32_1 = arith.constant 0 : i32
    return %c0_i32, %c0_i32_0 : i32, i32
  }
  func.func @transform_6(%arg0: i32) -> (i32, i32) {
    %c0_i32 = arith.constant 0 : i32
    %c0_i32_0 = arith.constant 0 : i32
    %c0_i32_1 = arith.constant 0 : i32
    return %c0_i32, %c0_i32_0 : i32, i32
  }
  func.func @transform_7(%arg0: i32) -> (i32, i32, i32) {
    %c0_i32 = arith.constant 0 : i32
    %c0_i32_0 = arith.constant 0 : i32
    %c0_i32_1 = arith.constant 0 : i32
    %c0_i32_2 = arith.constant 0 : i32
    return %c0_i32, %c0_i32_0, %c0_i32_1 : i32, i32, i32
  }
  func.func @transform_8(%arg0: i32) -> (i32, i32) {
    %c0_i32 = arith.constant 0 : i32
    %c0_i32_0 = arith.constant 0 : i32
    %c0_i32_1 = arith.constant 0 : i32
    return %c0_i32, %c0_i32_0 : i32, i32
  }
  func.func @transform_9(%arg0: i32) -> (i32, i32) {
    %c0_i32 = arith.constant 0 : i32
    %c0_i32_0 = arith.constant 0 : i32
    %c0_i32_1 = arith.constant 0 : i32
    return %c0_i32, %c0_i32_0 : i32, i32
  }
  func.func @transform_10(%arg0: i32) -> (i32, i32, i32) {
    %c0_i32 = arith.constant 0 : i32
    %c0_i32_0 = arith.constant 0 : i32
    %c0_i32_1 = arith.constant 0 : i32
    %c0_i32_2 = arith.constant 0 : i32
    return %c0_i32, %c0_i32_0, %c0_i32_1 : i32, i32, i32
  }
  func.func @transform_11(%arg0: i32) -> (i32, i32) {
    %c0_i32 = arith.constant 0 : i32
    %c0_i32_0 = arith.constant 0 : i32
    %c0_i32_1 = arith.constant 0 : i32
    return %c0_i32, %c0_i32_0 : i32, i32
  }
  func.func @transform_12(%arg0: i32) -> (i32, i32) {
    %c0_i32 = arith.constant 0 : i32
    %c0_i32_0 = arith.constant 0 : i32
    %c0_i32_1 = arith.constant 0 : i32
    return %c0_i32, %c0_i32_0 : i32, i32
  }
  func.func @transform_13(%arg0: i32) -> (i32, i32, i32) {
    %c0_i32 = arith.constant 0 : i32
    %c0_i32_0 = arith.constant 0 : i32
    %c0_i32_1 = arith.constant 0 : i32
    return %arg0, %c0_i32, %c0_i32_0 : i32, i32, i32
  }
  func.func @transform_14(%arg0: i32) -> (i32, i32) {
    %c0_i32 = arith.constant 0 : i32
    %c0_i32_0 = arith.constant 0 : i32
    %c0_i32_1 = arith.constant 0 : i32
    return %c0_i32, %c0_i32_0 : i32, i32
  }
  func.func @transform_15(%arg0: i32) -> (i32, i32) {
    %c0_i32 = arith.constant 0 : i32
    %c0_i32_0 = arith.constant 0 : i32
    %c0_i32_1 = arith.constant 0 : i32
    return %c0_i32, %c0_i32_0 : i32, i32
  }
  func.func @transform_16(%arg0: i32) -> (i32, i32, i32) {
    %c0_i32 = arith.constant 0 : i32
    %c0_i32_0 = arith.constant 0 : i32
    %c0_i32_1 = arith.constant 0 : i32
    return %arg0, %c0_i32, %c0_i32_0 : i32, i32, i32
  }
}

</mosaic_0001>

<bundles_post_ra>
// kernel: down_forward.1
= control target key start
LH: loop header
LB: loop body
LE: loop exit
PB: predicated region body
PF: predicated region fallthrough
CT: control target
= control target key end

     0   :  { %s12360_s0 = inlined_call_operand.vmem [shape: f32[2,8,2,8,8], index: 0, kind: input, shape index: {}]   ;;  %s12361_s1 = inlined_call_operand.vmem [shape: bf16[9,128,128], index: 1, kind: input, shape index: {}]   ;;  %s12362_s2 = inlined_call_operand.vmem [shape: f32[1,128], index: 2, kind: input, shape index: {}]   ;;  %s12363_s3 = inlined_call_operand.vmem [shape: f32[1,128], index: 3, kind: input, shape index: {}]   ;;  %s12364_s4 = inlined_call_operand.vmem [shape: bf16[9,128,128], index: 4, kind: input, shape index: {}]   ;;  %s12365_s5 = inlined_call_operand.vmem [shape: f32[1,128], index: 5, kind: input, shape index: {}]   ;;  %s12366_s6 = inlined_call_operand.vmem [shape: f32[1,128], index: 6, kind: input, shape index: {}]   ;;  %s12367_s7 = inlined_call_operand.hbm [shape: bf16[9,128,128], index: 7, kind: input, shape index: {}]   ;;  %s12368_s8 = inlined_call_operand.vmem [shape: f32[1,128], index: 8, kind: input, shape index: {}]   ;;  %s12369_s9 = inlined_call_operand.vmem [shape: f32[1,128], index: 9, kind: input, shape index: {}]   ;;  %s12370_s10 = inlined_call_operand.hbm [shape: bf16[9,128,128], index: 10, kind: input, shape index: {}]   ;;  %s12371_s11 = inlined_call_operand.vmem [shape: f32[1,128], index: 11, kind: input, shape index: {}]   ;;  %s12372_s12 = inlined_call_operand.vmem [shape: f32[1,128], index: 12, kind: input, shape index: {}]   ;;  %s12373_s13 = inlined_call_operand.vmem [shape: f32[2,1,256], index: 13, kind: input, shape index: {}]   ;;  %s12374_s14 = inlined_call_operand.vmem [shape: bf16[256,128], index: 14, kind: input, shape index: {}]   ;;  %s12375_s15 = inlined_call_operand.vmem [shape: f32[1,128], index: 15, kind: input, shape index: {}]   ;;  %s12376_s16 = inlined_call_operand.vmem [shape: f32[2,64,8], index: 16, kind: output, shape index: {}]  }
   0x1   :  { %12380 = sst [smem:[#allocation11_spill]] %s12360_s0 }
   0x2   :  { %12381 = sst [smem:[#allocation12_spill]] %s12376_s16 }
   0x3   :  { %21 = vsyncpa [#allocation5], 0 }
   0x4   :  { %22 = vsyncpa [#allocation7], 0  ;;  %s10459_s21 = smov 0  }
   0x5 LB: > { %12382 = sst [smem:[#allocation10_spill]] %s10365_s21  ;;  %s10465_s22 = sadd.s32 4294967295, %s10365_s21   ;;  %s10365_s21 = sphi %s10459_s21, %s28_s21  }
   0x6   : > { %p7742_p0 = scmp.ge.s32.totalorder %s10365_s21, 1  ;;  %p405_p1 = scmp.lt.s32.totalorder %s10365_s21, 3 }
   0x7   : > { %s10367_s23 = smov [#allocation4]   ;;  %p12377_p3 = scmp.eq.s32.totalorder %s10465_s22, 0 }
   0x8   : > { %s435_s24 = sshll.u32 %s10367_s23, 4  ;;  %p10469_p2 = pnand %p7742_p0, %p405_p1  ;;  %s436_s24 = int_to_ptr.vmem [resolvable:$true] %s435_s24 }
   0x9   : > { %s10368_s26 = smov [#allocation6]   ;;  %s10295_s0 = scalar_lea.hbm %s12367_s7, 9216 }
   0xa   : > { %s12383_s25 = scalar_select %p10469_p2, 1, 0 }
   0xb   : > { %p9884_p4 = pneg %p10469_p2  ;;  %s454_s27 = sshll.u32 %s10368_s26, 4  ;;  %s10482_s27 = int_to_ptr.vmem [resolvable:$true] %s454_s27 }
   0xc   : > { %p10296_p6 = scmp.ne.s32.totalorder %s12367_s7, %s10295_s0  ;;  %p10302_p10 = scmp.lt.u32.totalorder %s10295_s0, %s12367_s7 }
   0xd   : > { %p10478_p5 = pnand %p12377_p3, %p9884_p4 }
   0xf   : > { %p10297_p7 = pneg %p10478_p5 }
  0x11   : > { %p10298_p8 = pnand %p10297_p7, %p10296_p6 }
  0x13   : > { %p10299_p9 = pneg %p10298_p8 }
  0x15   : > { %p10304_p11 = pnand %p10302_p10, %p10299_p9 }
  0x17   : > { %10307 = shalt.err (!%p10304_p11)
}
  0x18   : > { %s10308_s23 = scalar_lea.vmem %s436_s24, 9216  ;;  %p10316_p1 = scmp.lt.s32.totalorder %s436_s24, %s436_s24 }
  0x19   : > { %p10309_p12 = scmp.ne.s32.totalorder %s436_s24, %s10308_s23  ;;  %p10317_p4 = scmp.lt.s32.totalorder %s10308_s23, %s10308_s23 }
  0x1b   : > { %p10311_p13 = pnand %p10309_p12, %p10297_p7  ;;  %p10318_p3 = por %p10317_p4, %p10316_p1 }
  0x1d   : > { %p10312_p0 = pneg %p10311_p13 }
  0x1f   : > { %p10319_p2 = pnand %p10318_p3, %p10312_p0 }
  0x21   : > { %10322 = shalt.err (!%p10319_p2)
}
  0x22   : > { %s10369_s26 = smov 64   ;;  %s10370_s29 = smov 4  }
  0x23   : > { %9887 = dma.hbm_to_vmem [thread:$0]  (!%p10478_p5), %s12367_s7, 9216, %s436_s24, [#allocation5], %s10369_s26, %s10369_s26, %s10370_s29  }
  0x24   : > { %s10323_s19 = scalar_lea.hbm %s12370_s10, 9216 }
  0x25   : > { %p10324_p6 = scmp.ne.s32.totalorder %s12370_s10, %s10323_s19  ;;  %p10330_p8 = scmp.lt.u32.totalorder %s10323_s19, %s12370_s10 }
  0x27   : > { %p10326_p2 = pnand %p10324_p6, %p10297_p7 }
  0x29   : > { %p10327_p3 = pneg %p10326_p2 }
  0x2b   : > { %p10332_p9 = pnand %p10330_p8, %p10327_p3 }
  0x2d   : > { %10335 = shalt.err (!%p10332_p9)
}
  0x2e   : > { %s10336_s24 = scalar_lea.vmem %s10482_s27, 9216  ;;  %p10344_p13 = scmp.lt.s32.totalorder %s10482_s27, %s10482_s27 }
  0x2f   : > { %p10337_p10 = scmp.ne.s32.totalorder %s10482_s27, %s10336_s24  ;;  %p10345_p0 = scmp.lt.s32.totalorder %s10336_s24, %s10336_s24 }
  0x31   : > { %p10339_p11 = pnand %p10337_p10, %p10297_p7  ;;  %p10346_p1 = por %p10345_p0, %p10344_p13 }
  0x33   : > { %p10340_p12 = pneg %p10339_p11 }
  0x35   : > { %p10347_p4 = pnand %p10346_p1, %p10340_p12 }
  0x37   : > { %10350 = shalt.err (!%p10347_p4)
}
  0x38   : > { %9890 = dma.hbm_to_vmem [thread:$0]  (!%p10478_p5), %s12370_s10, 9216, %s10482_s27, [#allocation7], %s10369_s26, %s10369_s26, %s10370_s29  }
  0x39   : > { %p12385_p6 = scmp.ne.s32.totalorder %s12383_s25, 0 }
  0x3a   : > { %p12386_p2 = scmp.eq.s32.totalorder (!%p12385_p6), %s10465_s22, 0 }
  0x3b   : > { %497 = sbr.rel (%p12385_p6) target bundleno = 2820 (0xb04), region = 84 }
  0x42   : > { %10356 = dma.done.wait (%p12386_p2), [#allocation5], 9216   ;;  %p12387_p7 = pmov %p12386_p2 }
  0x43   : > { %p12388_p3 = pmov %p12386_p2 }
  0x44   : > { %10358 = vsyncadd (%p12387_p7), [#allocation5], 4294958080 }
  0x45   : > { %10360 = dma.done.wait (%p12388_p3), [#allocation7], 9216   ;;  %p12389_p8 = pmov %p12386_p2 }
  0x46   : > { %p555_p9 = scmp.lt.s32.totalorder %s10465_s22, 1  ;;  %s12390_s26 = sld [smem:[#allocation11_spill]]  ;;  %v9930_v27 = vld [vmem:[%s12361_s1 + $0x100] sm:$0xff]   ;;  %v9931_v28 = vld [vmem:[%s12361_s1 + $0x108] sm:$0xff]   ;;  %v10372_v31 = vmov 0   ;;  %v9933_v32 = vld [vmem:[%s12361_s1 + $0x110] sm:$0xff]  }
  0x47   : > { %10362 = vsyncadd (%p12389_p8), [#allocation7], 4294958080  ;;  %s10371_s30 = smov 124   ;;  %8804 = vmatprep.subr.bf16.mxu0 %v9930_v27  ;;  %v9932_v30 = vld [vmem:[%s12361_s1 + $0xc0] sm:$0xff]   ;;  %723 = vst [vmem:[#allocation2] sm:$0xff] %v10372_v31  ;;  %v9934_v33 = vld [vmem:[%s12361_s1 + $0xc8] sm:$0xff]  }
  0x48   : > { %s12394_s22 = smov (!%p555_p9, %s10465_s22), 1  ;;  %724 = vst [vmem:[#allocation2 + $0x28] sm:$0xff] %v10372_v31  ;;  %8805 = vmatpush3.bf16.msra.mxu0 %v9930_v27  ;;  %8876 = vmatprep.subr.bf16.mxu1 %v9932_v30  ;;  %v9936_v34 = vld [vmem:[%s12361_s1 + $0xd0] sm:$0xff]   ;;  %v9935_v35 = vld [vmem:[%s12361_s1 + $0x118] sm:$0xff]   ;;  %v9937_v37 = vld [vmem:[%s12361_s1 + $0x120] sm:$0xff]   ;;  %vm790_vm0 = vcmask 31744  }
  0x49   : > { %s8348_s25 = sshll.u32 %s12394_s22, 7  ;;  %8806 = vmatprep.subr.bf16.mxu0 %v9931_v28  ;;  %8877 = vmatpush3.bf16.msra.mxu1 %v9932_v30  ;;  %v9938_v36 = vld [vmem:[%s12361_s1 + $0xd8] sm:$0xff]   ;;  %v9940_v38 = vld [vmem:[%s12361_s1 + $0xe0] sm:$0xff]   ;;  %v9939_v39 = vld [vmem:[%s12361_s1 + $0x128] sm:$0xff]   ;;  %vm1316_vm1 = vsmask.f32 256 }
  0x4a   : > { %8878 = vmatprep.subr.bf16.mxu1 %v9934_v33  ;;  %v9942_v40 = vld [vmem:[%s12361_s1 + $0xe8] sm:$0xff]   ;;  %v9941_v41 = vld [vmem:[%s12361_s1 + $0x130] sm:$0xff]   ;;  %v9943_v43 = vld [vmem:[%s12361_s1 + $0x138] sm:$0xff]   ;;  %vm993_vm2 = vcmask 1043456   ;;  %vm1470_vm3 = vsmask.f32 4352 }
  0x4b   : > { %v9944_v42 = vld [vmem:[%s12361_s1 + $0xf0] sm:$0xff]   ;;  %v9946_v44 = vld [vmem:[%s12361_s1 + $0xf8] sm:$0xff]   ;;  %v10624_v45 = vld [vmem:[%s12361_s1 + $0x40] sm:$0xff]   ;;  %vm1857_vm4 = vsmask.f32 7424  ;;  %s8349_s23 = sshll.u32 %s12394_s22, 6 }
  0x4c   : > { %s559_s29 = scalar_lea.vmem %s12390_s26, %s8348_s25  ;;  %8807 = vmatpush3.bf16.msra.mxu0 %v9931_v28  ;;  %v10629_v46 = vld [vmem:[%s12361_s1] sm:$0xff]   ;;  %vm1996_vm5 = vsmask.f32 3328  ;;  %s12391_s21 = sld [smem:[#allocation12_spill]] }
  0x4d   : > { %v730_v0 = vld [vmem:[%s559_s29 + $0x50] sm:$0xff]  ;;  %v7775_v2 = vld [vmem:[%s559_s29 + $0x58] sm:$0xff]  ;;  %v729_v10 = vld [vmem:[%s559_s29 + $0x40] sm:$0xff]  ;;  %8808 = vmatprep.subr.bf16.mxu0 %v9933_v32  ;;  %8879 = vmatpush3.bf16.msra.mxu1 %v9934_v33 }
  0x4e   : > { %v732_v1 = vld [vmem:[%s559_s29 + $0x70] sm:$0xff]  ;;  %v7777_v3 = vld [vmem:[%s559_s29 + $0x78] sm:$0xff]  ;;  %v10549_v4 = vmax.f32 %v730_v0, %v7775_v2  ;;  %v731_v13 = vld [vmem:[%s559_s29 + $0x60] sm:$0xff]  ;;  %8880 = vmatprep.subr.bf16.mxu1 %v9936_v34 }
  0x4f   : > { %v726_v5 = vld [vmem:[%s559_s29 + $0x10] sm:$0xff]  ;;  %v10551_v7 = vmax.f32 %v732_v1, %v7777_v3  ;;  %v7771_v8 = vld [vmem:[%s559_s29 + $0x18] sm:$0xff]  ;;  %v7774_v14 = vld [vmem:[%s559_s29 + $0x48] sm:$0xff] }
  0x50   : > { %v728_v6 = vld [vmem:[%s559_s29 + $0x30] sm:$0xff]  ;;  %v7773_v9 = vld [vmem:[%s559_s29 + $0x38] sm:$0xff]  ;;  %v10553_v11 = vmax.f32 %v726_v5, %v7771_v8  ;;  %v7776_v15 = vld [vmem:[%s559_s29 + $0x68] sm:$0xff]  ;;  %v10559_v17 = vmax.f32 %v729_v10, %v7774_v14  ;;  %8809 = vmatpush3.bf16.msra.mxu0 %v9933_v32 }
  0x51   : > { %v10555_v12 = vmax.f32 %v728_v6, %v7773_v9  ;;  %v9920_v16 = vpack.i.bf16 %v10551_v7, %v10549_v4  ;;  %v10561_v18 = vmax.f32 %v731_v13, %v7776_v15  ;;  %v725_v19 = vld [vmem:[%s559_s29] sm:$0xff]  ;;  %v7770_v21 = vld [vmem:[%s559_s29 + $0x8] sm:$0xff]  ;;  %8810 = vmatprep.subr.bf16.mxu0 %v9935_v35  ;;  %8881 = vmatpush3.bf16.msra.mxu1 %v9936_v34 }
  0x52   : > { %v727_v20 = vld [vmem:[%s559_s29 + $0x20] sm:$0xff]  ;;  %v7772_v23 = vld [vmem:[%s559_s29 + $0x28] sm:$0xff]  ;;  %v10565_v24 = vmax.f32 %v725_v19, %v7770_v21  ;;  %8882 = vmatprep.subr.bf16.mxu1 %v9938_v36 }
  0x53   : > { %v9910_v22 = vpack.i.bf16 %v10555_v12, %v10553_v11  ;;  %9921 = vrot.lane.b32.xlu1 %v9920_v16, %s10371_s30  ;;  %v9925_v25 = vpack.i.bf16 %v10561_v18, %v10559_v17  ;;  %v10569_v26 = vmax.f32 %v727_v20, %v7772_v23  ;;  %v1298_v23 = vld [vmem:[#allocation2] sm:$0x80]  ;;  %v10660_v34 = vld [vmem:[#allocation2 + $0x28] sm:$0xf] }
  0x54   : > { %8811 = vmatpush3.bf16.msra.mxu0 %v9935_v35 }
  0x55   : > { %9911 = vrot.lane.b32.xlu0 %v9910_v22, %s10371_s30  ;;  %v9915_v29 = vpack.i.bf16 %v10569_v26, %v10565_v24  ;;  %8812 = vmatprep.subr.bf16.mxu0 %v9937_v37 }
  0x56   : > { %8883 = vmatpush3.bf16.msra.mxu1 %v9938_v36  ;;  %v9947_v36 = vld [vmem:[%s12361_s1 + $0x48] sm:$0xff]  }
  0x57   : > { %9926 = vrot.lane.b32.xlu1 %v9925_v25, %s10371_s30  ;;  %8884 = vmatprep.subr.bf16.mxu1 %v9940_v38  ;;  %v10649_v25 = vld [vmem:[#allocation2] sm:$0xf0] }
  0x58   : > { %8813 = vmatpush3.bf16.msra.mxu0 %v9937_v37  ;;  %v1998_v27 = vshrl.u32 %v10649_v25, 16  ;;  %v2001_v31 = vshll.u32 %v10649_v25, 16 }
  0x59   : > { %9916 = vrot.lane.b32.xlu0 %v9915_v29, %s10371_s30  ;;  %8814 = vmatprep.subr.bf16.mxu0 %v9939_v39 }
  0x5a   : > { %8885 = vmatpush3.bf16.msra.mxu1 %v9940_v38 }
  0x5b   : > { %8886 = vmatprep.subr.bf16.mxu1 %v9942_v40 }
  0x5c   : > { %8815 = vmatpush3.bf16.msra.mxu0 %v9939_v39  ;;  %v994_v39 = vrot.slane %v10649_v25, 4 }
  0x5d   : > { %8816 = vmatprep.subr.bf16.mxu0 %v9941_v41 }
  0x5e   : > { %8887 = vmatpush3.bf16.msra.mxu1 %v9942_v40  ;;  %v10671_v40 = vrot.slane %v1998_v27, 4 }
  0x5f   : > { %8888 = vmatprep.subr.bf16.mxu1 %v9944_v42 }
  0x60   : > { %8817 = vmatpush3.bf16.msra.mxu0 %v9941_v41 }
  0x61   : > { %8818 = vmatprep.subr.bf16.mxu0 %v9943_v43 }
  0x62   : > { %8889 = vmatpush3.bf16.msra.mxu1 %v9944_v42 }
  0x63   : > { %8890 = vmatprep.subr.bf16.mxu1 %v9946_v44 }
  0x64   : > { %8819 = vmatpush3.bf16.msra.mxu0 %v9943_v43 }
  0x65   : > { %8828 = vmatprep.subr.bf16.mxu0 %v10624_v45 }
  0x66   : > { %8891 = vmatpush3.bf16.msra.mxu1 %v9946_v44  ;;  %v10680_v44 = vrot.slane %v2001_v31, 5 }
  0x67   : > { %8900 = vmatprep.subr.bf16.mxu1 %v10629_v46 }
  0xc5   : > { %v9922_v47 = vpop.permute.xlu1 %9921 }
  0xc6   : > { %v9924_v48 = vunpack.i.h.bf16 %v9922_v47  ;;  %v9923_v49 = vunpack.i.l.bf16 %v9922_v47 }
  0xc7   : > { %v9912_v50 = vpop.permute.xlu0 %9911 }
  0xc8   : > { %v9914_v51 = vunpack.i.h.bf16 %v9912_v50  ;;  %v9913_v52 = vunpack.i.l.bf16 %v9912_v50  ;;  %v789_v53 = vmax.f32 %v10551_v7, %v9924_v48  ;;  %v787_v54 = vmax.f32 %v10549_v4, %v9923_v49 }
  0xc9   : > { %v9927_v57 = vpop.permute.xlu1 %9926  ;;  %v1671_v49 = vshrl.u32 %v10660_v34, 16  ;;  %v1674_v50 = vshll.u32 %v10660_v34, 16 }
  0xca   : > { %v785_v55 = vmax.f32 %v10555_v12, %v9914_v51  ;;  %v783_v56 = vmax.f32 %v10553_v11, %v9913_v52  ;;  %v798_v58 = vsel %vm790_vm0, %v789_v53, 0.0  ;;  %v796_v59 = vsel %vm790_vm0, %v787_v54, 0.0  ;;  %v9949_v52 = vld [vmem:[%s12361_s1 + $0x50] sm:$0xff]  }
  0xcb   : > { %v9929_v60 = vunpack.i.h.bf16 %v9927_v57  ;;  %v9928_v61 = vunpack.i.l.bf16 %v9927_v57  ;;  %v9917_v62 = vpop.permute.xlu0 %9916  ;;  %v806_v63 = vpack.c.bf16 %v798_v58, %v798_v58  ;;  %v804_v0 = vpack.c.bf16 %v796_v59, %v796_v59  ;;  %v1839_v59 = vld [vmem:[#allocation2 + $0x28] sm:$0x1] }
  0xcc   : > { %v794_v1 = vsel %vm790_vm0, %v785_v55, 0.0  ;;  %v792_v2 = vsel %vm790_vm0, %v783_v56, 0.0  ;;  %v9919_v9 = vunpack.i.h.bf16 %v9917_v62  ;;  %v9918_v10 = vunpack.i.l.bf16 %v9917_v62 }
  0xcd   : > { %v802_v3 = vpack.c.bf16 %v794_v1, %v794_v1  ;;  %v800_v4 = vpack.c.bf16 %v792_v2, %v792_v2  ;;  %v788_v5 = vmax.f32 %v10561_v18, %v9929_v60  ;;  %v786_v6 = vmax.f32 %v10559_v17, %v9928_v61  ;;  %v9951_v1 = vld [vmem:[%s12361_s1 + $0x58] sm:$0xff]  }
  0xce   : > { %v831_v7 = vrot.slane %v806_v63, 4  ;;  %v824_v8 = vrot.slane %v804_v0, 4  ;;  %v784_v18 = vmax.f32 %v10569_v26, %v9919_v9  ;;  %v782_v17 = vmax.f32 %v10565_v24, %v9918_v10  ;;  %v1281_v26 = vld [vmem:[#allocation2] sm:$0xf8]  ;;  %v9950_v0 = vld [vmem:[%s12361_s1 + $0x8] sm:$0xff]  }
  0xcf   : > { %v817_v11 = vrot.slane %v802_v3, 4  ;;  %v810_v12 = vrot.slane %v800_v4, 4  ;;  %v797_v13 = vsel %vm790_vm0, %v788_v5, 0.0  ;;  %v795_v14 = vsel %vm790_vm0, %v786_v6, 0.0 }
  0xd0   : > { %833 = vst [vmem:[#allocation2 + $0x20] sm:$0xf0] %v831_v7  ;;  %834 = vst [vmem:[#allocation3 + $0x18] sm:$0xf0] %v831_v7  ;;  %v805_v15 = vpack.c.bf16 %v797_v13, %v797_v13  ;;  %v803_v16 = vpack.c.bf16 %v795_v14, %v795_v14  ;;  %v793_v19 = vsel %vm790_vm0, %v784_v18, 0.0  ;;  %v791_v20 = vsel %vm790_vm0, %v782_v17, 0.0 }
  0xd1   : > { %826 = vst [vmem:[#allocation2 + $0x18] sm:$0xf0] %v824_v8  ;;  %827 = vst [vmem:[#allocation3 + $0x10] sm:$0xf0] %v824_v8  ;;  %v801_v21 = vpack.c.bf16 %v793_v19, %v793_v19  ;;  %v799_v22 = vpack.c.bf16 %v791_v20, %v791_v20  ;;  %v1318_v24 = vshrl.u32 %v1298_v23, 16  ;;  %v1472_v29 = vshrl.u32 %v1281_v26, 16 }
  0xd2   : > { %819 = vst [vmem:[#allocation2 + $0x10] sm:$0xf0] %v817_v11  ;;  %820 = vst [vmem:[#allocation3 + $0x8] sm:$0xf0] %v817_v11  ;;  %v1475_v30 = vshll.u32 %v1281_v26, 16  ;;  %v1875_v4 = vshll.u32 %v1839_v59, 16 }
  0xd3   : > { %812 = vst [vmem:[#allocation2 + $0x8] sm:$0xf0] %v810_v12  ;;  %813 = vst [vmem:[#allocation3] sm:$0xf0] %v810_v12  ;;  %v1320_v37 = vrot.slane %v1318_v24, 7  ;;  %v10676_v42 = vrot.slane %v1472_v29, 3 }
  0xd4   : > { %828 = vst [vmem:[#allocation2 + $0x20] sm:$0xf] %v805_v15  ;;  %829 = vst [vmem:[#allocation3 + $0x18] sm:$0xf] %v805_v15  ;;  %v10678_v43 = vrot.slane %v1475_v30, 4  ;;  %v1154_v10 = vrot.slane %v10660_v34, 4 }
  0xd5   : > { %821 = vst [vmem:[#allocation2 + $0x18] sm:$0xf] %v803_v16  ;;  %822 = vst [vmem:[#allocation3 + $0x10] sm:$0xf] %v803_v16  ;;  %v10733_v11 = vrot.slane %v1671_v49, 3  ;;  %v10740_v14 = vrot.slane %v1674_v50, 4 }
  0xd6   : > { %814 = vst [vmem:[#allocation2 + $0x10] sm:$0xf] %v801_v21  ;;  %815 = vst [vmem:[#allocation3 + $0x8] sm:$0xf] %v801_v21  ;;  %v10742_v15 = vrot.slane %v1875_v4, 1  ;;  %v9952_v16 = vld [vmem:[%s12361_s1 + $0x10] sm:$0xff]   ;;  %v1478_v21 = vor.u32 %v10678_v43, %v10676_v42  ;;  %v2004_v42 = vor.u32 %v10680_v44, %v10671_v40 }
  0xd7   : > { %807 = vst [vmem:[#allocation2 + $0x8] sm:$0xf] %v799_v22  ;;  %808 = vst [vmem:[#allocation3] sm:$0xf] %v799_v22  ;;  %v9954_v24 = vld [vmem:[%s12361_s1 + $0x18] sm:$0xff]   ;;  %v9955_v29 = vld [vmem:[%s12361_s1 + $0x68] sm:$0xff]   ;;  %v1677_v34 = vor.u32 %v10740_v14, %v10733_v11 }
  0xd8   : > { %v9957_v40 = vld [vmem:[%s12361_s1 + $0x70] sm:$0xff]   ;;  %v9986_v11 = vld [vmem:[%s12361_s1 + $0x80] sm:$0xff]   ;;  %v9987_v14 = vld [vmem:[%s12361_s1 + $0x88] sm:$0xff]  }
  0xda   : > { %v10724_v3 = vld [vmem:[#allocation2 + $0x8] sm:$0xf0] }
  0xdb   : > { %v10655_v32 = vld [vmem:[#allocation2 + $0x20] sm:$0xff]  ;;  %v1147_v19 = vrot.slane %v10724_v3, 4  ;;  %v9971_v3 = vld [vmem:[%s12361_s1 + $0x1e8] sm:$0xff]  }
  0xdc   : > { %v10652_v28 = vld [vmem:[#allocation2 + $0x18] sm:$0xff]  ;;  %v10668_v38 = vshrl.u32 %v10655_v32, 16  ;;  %v10700_v53 = vshll.u32 %v10655_v32, 16  ;;  %v10722_v2 = vld [vmem:[#allocation2 + $0x20] sm:$0xf] }
  0xdd   : > { %v10658_v33 = vshrl.u32 %v10652_v28, 16  ;;  %v10674_v41 = vld [vmem:[#allocation2 + $0x10] sm:$0xff]  ;;  %v10704_v55 = vshll.u32 %v10652_v28, 16  ;;  %v10751_v18 = vrot.slane %v10652_v28, 4  ;;  %v1001_v17 = vrot.slane %v10722_v2, 4 }
  0xde   : > { %v10662_v35 = vld [vmem:[#allocation2 + $0x8] sm:$0xff]  ;;  %v10684_v47 = vshrl.u32 %v10674_v41, 16  ;;  %v10709_v57 = vshll.u32 %v10674_v41, 16  ;;  %v1348_v58 = vrot.slane %v10668_v38, 7  ;;  %v1492_v20 = vshrl.u32 %v10722_v2, 16 }
  0xdf   : > { %8820 = vmatprep.mubr.bf16.mxu0 %v10662_v35  ;;  %v10687_v48 = vshrl.u32 %v10662_v35, 16  ;;  %v10693_v51 = vshll.u32 %v10662_v35, 16  ;;  %v1340_v54 = vrot.slane %v10658_v33, 7  ;;  %v995_v63 = vrot.slane %v10662_v35, 4  ;;  %v1617_v30 = vld [vmem:[#allocation2 + $0x8] sm:$0xf8] }
  0xe0   : > { %8821 = vmatmul.mubr.bf16.vlgmr.msra.gmra.mrb[0].mxu0 %v10674_v41  ;;  %v1332_v56 = vrot.slane %v10684_v47, 7  ;;  %v1351_v9 = vor.u32 %v10700_v53, %v1348_v58  ;;  %v10761_v23 = vrot.slane %v10674_v41, 4  ;;  %v1483_v27 = vrot.slane %v10684_v47, 3 }
  0xe1   : > { %8829 = vmatpush3.bf16.msra.mxu0 %v10624_v45  ;;  %8824 = vmatprep.mubr.bf16.mxu0 %v10652_v28  ;;  %v1324_v45 = vrot.slane %v10687_v48, 7  ;;  %v1343_v62 = vor.u32 %v10704_v55, %v1340_v54  ;;  %v1479_v7 = vrot.slane %v10687_v48, 3  ;;  %v1480_v8 = vrot.slane %v10693_v51, 4 }
  0xe2   : > { %8830 = vmatprep.subr.bf16.mxu0 %v9947_v36  ;;  %v1335_v61 = vor.u32 %v10709_v57, %v1332_v56  ;;  %v996_v13 = vsel %vm993_vm2, %v994_v39, %v995_v63  ;;  %v1863_v25 = vrot.slane %v10693_v51, 1  ;;  %v1352_v26 = vsel %vm1316_vm1, %v1340_v54, %v1351_v9  ;;  %v9958_v9 = vld [vmem:[%s12361_s1 + $0x28] sm:$0xff]  }
  0xe3   : > { %v1327_v60 = vor.u32 %v10693_v51, %v1324_v45  ;;  %v1344_v12 = vsel %vm1316_vm1, %v1332_v56, %v1343_v62  ;;  %v10758_v22 = vor.u32 %v1480_v8, %v1479_v7  ;;  %v1865_v28 = vrot.slane %v10709_v57, 1 }
  0xe4   : > { %v1336_v6 = vsel %vm1316_vm1, %v1324_v45, %v1335_v61  ;;  %v1864_v31 = vor.u32 %v1863_v25, %v10687_v48  ;;  %v2005_v39 = vrot.slane %v10687_v48, 4  ;;  %v1484_v41 = vrot.slane %v10709_v57, 4  ;;  %v9956_v48 = vld [vmem:[%s12361_s1 + $0x20] sm:$0xff]  }
  0xe5   : > { %8831 = vmatpush3.bf16.msra.mxu0 %v9947_v36  ;;  %v1328_v5 = vsel %vm1316_vm1, %v1320_v37, %v1327_v60  ;;  %v1868_v36 = vrot.slane %v10704_v55, 1  ;;  %v1871_v37 = vrot.slane %v10700_v53, 1  ;;  %v2006_v43 = vrot.slane %v10693_v51, 5 }
  0xe6   : > { %8832 = vmatprep.subr.bf16.mxu0 %v9949_v52  ;;  %8892 = vmatprep.mubr.bf16.mxu1 %v1328_v5  ;;  %v1482_v49 = vsel %vm1470_vm3, %v1478_v21, %v10758_v22  ;;  %v10784_v50 = vsel %vm1857_vm4, %v1864_v31, %v1865_v28  ;;  %v2009_v45 = vrot.slane %v10684_v47, 4  ;;  %v2010_v56 = vrot.slane %v10709_v57, 5 }
  0xe7   : > { %8893 = vmatmul.mubr.bf16.vlgmr.msra.gmra.mrb[0].mxu1 %v1336_v6  ;;  %v1870_v54 = vor.u32 %v1868_v36, %v10658_v33  ;;  %v10795_v44 = vor.u32 %v1871_v37, %v10668_v38  ;;  %v2007_v51 = vor.u32 %v2006_v43, %v2005_v39  ;;  %v2013_v60 = vrot.slane %v10658_v33, 4  ;;  %v9963_v39 = vld [vmem:[%s12361_s1 + $0x1c8] sm:$0xff]  }
  0xe8   : > { %8825 = vmatmul.mubr.bf16.gmra.mrb[4].mxu0 %v10655_v32  ;;  %8901 = vmatpush3.bf16.msra.mxu1 %v10629_v46  ;;  %v9953_v46 = vld [vmem:[%s12361_s1 + $0x60] sm:$0xff]   ;;  %v2014_v61 = vrot.slane %v10704_v55, 5  ;;  %v1495_v62 = vshll.u32 %v10722_v2, 16  ;;  %v10811_v4 = vor.u32 %v2010_v56, %v2009_v45  ;;  %v1487_v5 = vrot.slane %v10658_v33, 3  ;;  %v9973_v56 = vld [vmem:[%s12361_s1 + $0x1f0] sm:$0xff]  }
  0xe9   : > { %8833 = vmatpush3.bf16.msra.mxu0 %v9949_v52  ;;  %8896 = vmatprep.mubr.bf16.mxu1 %v1344_v12  ;;  %v1867_v52 = vor.u32 %v1865_v28, %v10684_v47  ;;  %v10803_v59 = vsel %vm1857_vm4, %v1870_v54, %v1871_v37  ;;  %v1488_v6 = vrot.slane %v10704_v55, 4  ;;  %v10815_v7 = vrot.slane %v1492_v20, 3  ;;  %v9959_v12 = vld [vmem:[%s12361_s1 + $0x78] sm:$0xff]   ;;  %v9966_v54 = vld [vmem:[%s12361_s1 + $0x188] sm:$0xff]   ;;  %v9972_v45 = vld [vmem:[%s12361_s1 + $0x1a0] sm:$0xff]  }
  0xea   : > { %8844 = vmatprep.mubr.bf16.mxu0 %v996_v13  ;;  %8902 = vmatprep.subr.bf16.mxu1 %v9950_v0  ;;  %v10817_v8 = vor.u32 %v2014_v61, %v2013_v60  ;;  %v1639_v13 = vshll.u32 %v1617_v30, 16  ;;  %v2177_v33 = vrot.slane %v10668_v38, 4  ;;  %v2178_v55 = vrot.slane %v10700_v53, 5  ;;  %v9962_v37 = vld [vmem:[%s12361_s1 + $0x38] sm:$0xff]   ;;  %v9974_v60 = vld [vmem:[%s12361_s1 + $0x1a8] sm:$0xff]  }
  0xeb   : > { %8834 = vmatprep.subr.bf16.mxu0 %v9951_v1  ;;  %v10800_v58 = vsel %vm1857_vm4, %v1867_v52, %v1868_v36  ;;  %v1664_v20 = vrot.slane %v10668_v38, 3  ;;  %v1497_v25 = vrot.slane %v1495_v62, 4  ;;  %v1667_v36 = vrot.slane %v10700_v53, 4  ;;  %v9965_v52 = vld [vmem:[%s12361_s1 + $0x1d0] sm:$0xff]   ;;  %v9975_v61 = vld [vmem:[%s12361_s1 + $0x1f8] sm:$0xff]   ;;  %v9982_v53 = vld [vmem:[%s12361_s1 + $0x160] sm:$0xff]  }
  0xec   : > { %8903 = vmatpush3.bf16.msra.mxu1 %v9950_v0  ;;  %v1636_v0 = vshrl.u32 %v1617_v30, 16  ;;  %v10836_v21 = vsel %vm1996_vm5, %v10811_v4, %v10817_v8  ;;  %v10838_v28 = vor.u32 %v2178_v55, %v2177_v33  ;;  %v1641_v31 = vrot.slane %v1639_v13, 4  ;;  %v9976_v62 = vld [vmem:[%s12361_s1 + $0x1b0] sm:$0xff]   ;;  %v9981_v13 = vld [vmem:[%s12361_s1 + $0x158] sm:$0xff]  }
  0xed   : > { %8835 = vmatpush3.bf16.msra.mxu0 %v9951_v1  ;;  %8904 = vmatprep.subr.bf16.mxu1 %v9952_v16  ;;  %v10809_v1 = vsel %vm1996_vm5, %v2004_v42, %v2007_v51  ;;  %v998_v42 = vsel %vm993_vm2, %v995_v63, %v10761_v23  ;;  %v10865_v43 = vsel %vm993_vm2, %v10761_v23, %v10751_v18  ;;  %v9984_v33 = vld [vmem:[%s12361_s1 + $0x170] sm:$0xff]  }
  0xee   : > { %8836 = vmatprep.subr.bf16.mxu0 %v9953_v46  ;;  %v10849_v30 = vsel %vm1996_vm5, %v10817_v8, %v10838_v28  ;;  %v1485_v35 = vor.u32 %v1484_v41, %v1483_v27  ;;  %v10878_v63 = vor.u32 %v1488_v6, %v1487_v5  ;;  %v1002_v47 = vsel %vm993_vm2, %v10751_v18, %v1001_v17  ;;  %v9968_v27 = vld [vmem:[%s12361_s1 + $0x190] sm:$0xff]   ;;  %v9969_v17 = vld [vmem:[%s12361_s1 + $0x1e0] sm:$0xff]   ;;  %v9978_v5 = vld [vmem:[%s12361_s1 + $0x1b8] sm:$0xff]  }
  0xef   : > { %8897 = vmatmul.mubr.bf16.gmra.mrb[4].mxu1 %v1352_v26  ;;  %v1638_v26 = vrot.slane %v1636_v0, 3  ;;  %v1149_v2 = vsel %vm993_vm2, %v1147_v19, %v10761_v23  ;;  %v9977_v0 = vld [vmem:[%s12361_s1 + $0x140] sm:$0xff]   ;;  %v9979_v6 = vld [vmem:[%s12361_s1 + $0x148] sm:$0xff]   ;;  %v9988_v55 = vld [vmem:[%s12361_s1 + $0x90] sm:$0xff]  }
  0xf0   : > { %8905 = vmatpush3.bf16.msra.mxu1 %v9952_v16  ;;  %8916 = vmatprep.mubr.bf16.mxu1 %v1482_v49  ;;  %v10827_v16 = vsel %vm1996_vm5, %v2007_v51, %v10811_v4  ;;  %v9964_v49 = vld [vmem:[%s12361_s1 + $0x180] sm:$0xff]   ;;  %v1490_v57 = vsel %vm1470_vm3, %v1485_v35, %v10878_v63  ;;  %v9970_v51 = vld [vmem:[%s12361_s1 + $0x198] sm:$0xff]  }
  0xf1   : > { %8837 = vmatpush3.bf16.msra.mxu0 %v9953_v46  ;;  %8906 = vmatprep.subr.bf16.mxu1 %v9954_v24  ;;  %v1152_v46 = vrot.slane %v10655_v32, 4  ;;  %v1642_v41 = vor.u32 %v1641_v31, %v1638_v26  ;;  %v9983_v32 = vld [vmem:[%s12361_s1 + $0x168] sm:$0xff]  }
  0xf2   : > { %8838 = vmatprep.subr.bf16.mxu0 %v9955_v29  ;;  %v10294_v31 = vld [vmem:[#allocation2 + $0x8] sm:$0xf0] }
  0xf3   : > { %v1651_v23 = vsel %vm1470_vm3, %v1642_v41, %v1485_v35 }
  0xf4   : > { %8907 = vmatpush3.bf16.msra.mxu1 %v9954_v24  ;;  %v9960_v24 = vld [vmem:[%s12361_s1 + $0x30] sm:$0xff]  }
  0xf5   : > { %8839 = vmatpush3.bf16.msra.mxu0 %v9955_v29  ;;  %8908 = vmatprep.subr.bf16.mxu1 %v9956_v48  ;;  %v9961_v29 = vld [vmem:[%s12361_s1 + $0x1c0] sm:$0xff]  }
  0xf6   : > { %8840 = vmatprep.subr.bf16.mxu0 %v9957_v40 }
  0xf8   : > { %8909 = vmatpush3.bf16.msra.mxu1 %v9956_v48  ;;  %v9967_v48 = vld [vmem:[%s12361_s1 + $0x1d8] sm:$0xff]  }
  0xf9   : > { %8841 = vmatpush3.bf16.msra.mxu0 %v9957_v40  ;;  %8910 = vmatprep.subr.bf16.mxu1 %v9958_v9  ;;  %v1486_v40 = vsel %vm1470_vm3, %v10758_v22, %v1485_v35  ;;  %v1498_v22 = vor.u32 %v1497_v25, %v10815_v7  ;;  %v1153_v7 = vsel %vm993_vm2, %v10751_v18, %v1152_v46  ;;  %v9994_v25 = vld [vmem:[%s12361_s1 + $0x200] sm:$0xff]  }
  0xfa   : > { %8842 = vmatprep.subr.bf16.mxu0 %v9959_v12  ;;  %v1155_v18 = vsel %vm993_vm2, %v1152_v46, %v1154_v10  ;;  %v9989_v46 = vld [vmem:[%s12361_s1 + $0x98] sm:$0xff]  }
  0xfb   : > { %v1499_v19 = vsel %vm1470_vm3, %v10878_v63, %v1498_v22 }
  0xfc   : > { %8911 = vmatpush3.bf16.msra.mxu1 %v9958_v9  ;;  %v9980_v9 = vld [vmem:[%s12361_s1 + $0x150] sm:$0xff]  }
  0xfd   : > { %8843 = vmatpush3.bf16.msra.mxu0 %v9959_v12  ;;  %8912 = vmatprep.subr.bf16.mxu1 %v9960_v24  ;;  %v1668_v12 = vor.u32 %v1667_v36, %v1664_v20  ;;  %v1878_v20 = vsel %vm1857_vm4, %v10795_v44, %v10742_v15  ;;  %v9992_v15 = vld [vmem:[%s12361_s1 + $0xb0] sm:$0xff]   ;;  %v9993_v44 = vld [vmem:[%s12361_s1 + $0xb8] sm:$0xff]   ;;  %v2162_v36 = vshrl.u32 %v10294_v31, 16 }
  0xfe   : > { %8852 = vmatprep.subr.bf16.mxu0 %v9961_v29 }
  0xff   : > { %v1669_v38 = vsel %vm1470_vm3, %v10878_v63, %v1668_v12  ;;  %v1678_v10 = vsel %vm1470_vm3, %v1668_v12, %v1677_v34  ;;  %v10373_v12 = vmov 0.0  }
 0x100   : > { %8845 = vmatmul.mubr.bf16.vlgmr.msra.gmra.mrb[0].mxu0 %v998_v42  ;;  %8913 = vmatpush3.bf16.msra.mxu1 %v9960_v24 }
 0x101   : > { %8848 = vmatprep.mubr.bf16.mxu0 %v10865_v43  ;;  %8853 = vmatpush3.bf16.msra.mxu0 %v9961_v29  ;;  %v9995_v29 = vld [vmem:[%s12361_s1 + $0x208] sm:$0xff]  }
 0x102   : > { %8914 = vmatprep.subr.bf16.mxu1 %v9962_v37  ;;  %8854 = vmatprep.subr.bf16.mxu0 %v9963_v39 }
 0x104   : > { %8915 = vmatpush3.bf16.msra.mxu1 %v9962_v37  ;;  %v2165_v37 = vshll.u32 %v10294_v31, 16 }
 0x105   : > { %8855 = vmatpush3.bf16.msra.mxu0 %v9963_v39  ;;  %8924 = vmatprep.subr.bf16.mxu1 %v9964_v49 }
 0x106   : > { %8856 = vmatprep.subr.bf16.mxu0 %v9965_v52 }
 0x107   : > { %8917 = vmatmul.mubr.bf16.vlgmr.msra.gmra.mrb[0].mxu1 %v1486_v40  ;;  %v9998_v40 = vld [vmem:[%s12361_s1 + $0x220] sm:$0xff]  }
 0x108   : > { %8849 = vmatmul.mubr.bf16.gmra.mrb[4].mxu0 %v1002_v47  ;;  %8920 = vmatprep.mubr.bf16.mxu1 %v1490_v57  ;;  %v9999_v47 = vld [vmem:[%s12361_s1 + $0x228] sm:$0xff]  }
 0x109   : > { %8925 = vmatpush3.bf16.msra.mxu1 %v9964_v49  ;;  %8857 = vmatpush3.bf16.msra.mxu0 %v9965_v52  ;;  %v2164_v49 = vrot.slane %v2162_v36, 4  ;;  %v2167_v52 = vrot.slane %v2165_v37, 5 }
 0x10a   : > { %8868 = vmatprep.mubr.bf16.mxu0 %v1149_v2  ;;  %8926 = vmatprep.subr.bf16.mxu1 %v9966_v54 }
 0x10b   : > { %8858 = vmatprep.subr.bf16.mxu0 %v9967_v48  ;;  %v2168_v63 = vor.u32 %v2167_v52, %v2164_v49 }
 0x10d   : > { %8927 = vmatpush3.bf16.msra.mxu1 %v9966_v54  ;;  %8859 = vmatpush3.bf16.msra.mxu0 %v9967_v48  ;;  %v9997_v54 = vld [vmem:[%s12361_s1 + $0x218] sm:$0xff]   ;;  %v2172_v48 = vsel %vm1996_vm5, %v2168_v63, %v10811_v4 }
 0x10e   : > { %8928 = vmatprep.subr.bf16.mxu1 %v9968_v27  ;;  %8860 = vmatprep.subr.bf16.mxu0 %v9969_v17  ;;  %v10001_v4 = vld [vmem:[%s12361_s1 + $0x238] sm:$0xff]  }
 0x10f   : > { %8921 = vmatmul.mubr.bf16.gmra.mrb[4].mxu1 %v1499_v19 }
 0x110   : > { %8940 = vmatprep.mubr.bf16.mxu1 %v1651_v23 }
 0x111   : > { %8929 = vmatpush3.bf16.msra.mxu1 %v9968_v27  ;;  %8861 = vmatpush3.bf16.msra.mxu0 %v9969_v17 }
 0x112   : > { %8930 = vmatprep.subr.bf16.mxu1 %v9970_v51  ;;  %8862 = vmatprep.subr.bf16.mxu0 %v9971_v3 }
 0x115   : > { %8931 = vmatpush3.bf16.msra.mxu1 %v9970_v51  ;;  %8863 = vmatpush3.bf16.msra.mxu0 %v9971_v3  ;;  %v570_v3 = vlaneseq }
 0x116   : > { %8932 = vmatprep.subr.bf16.mxu1 %v9972_v45  ;;  %8864 = vmatprep.subr.bf16.mxu0 %v9973_v56 }
 0x117   : > { %v11040_v19 = vshrl.u32 %v570_v3, 7 }
 0x119   : > { %8933 = vmatpush3.bf16.msra.mxu1 %v9972_v45  ;;  %8865 = vmatpush3.bf16.msra.mxu0 %v9973_v56  ;;  %v11043_v23 = vadd.s32 16, %v11040_v19  ;;  %v11046_v45 = vadd.s32 24, %v11040_v19  ;;  %v11049_v56 = vadd.s32 8, %v11040_v19 }
 0x11a   : > { %8934 = vmatprep.subr.bf16.mxu1 %v9974_v60  ;;  %8866 = vmatprep.subr.bf16.mxu0 %v9975_v61 }
 0x11d   : > { %8935 = vmatpush3.bf16.msra.mxu1 %v9974_v60  ;;  %8867 = vmatpush3.bf16.msra.mxu0 %v9975_v61 }
 0x11e   : > { %8936 = vmatprep.subr.bf16.mxu1 %v9976_v62  ;;  %8948 = vmatprep.subr.bf16.mxu0 %v9977_v0 }
 0x120   : > { %8869 = vmatmul.mubr.bf16.vlgmr.msra.gmra.mrb[0].mxu0 %v10865_v43  ;;  %v9996_v43 = vld [vmem:[%s12361_s1 + $0x210] sm:$0xff]  }
 0x121   : > { %8937 = vmatpush3.bf16.msra.mxu1 %v9976_v62  ;;  %8872 = vmatprep.mubr.bf16.mxu0 %v1153_v7  ;;  %v590_v62 = vand.u32 7, %v11049_v56  ;;  %v11059_v7 = vadd.s32 32, %v11040_v19 }
 0x122   : > { %8949 = vmatpush3.bf16.msra.mxu0 %v9977_v0  ;;  %8938 = vmatprep.subr.bf16.mxu1 %v9978_v5 }
 0x123   : > { %8950 = vmatprep.subr.bf16.mxu0 %v9979_v6  ;;  %vm676_vm9 = vcmp.gt.s32.totalorder %v590_v62, 0 }
 0x125   : > { %8939 = vmatpush3.bf16.msra.mxu1 %v9978_v5  ;;  %v11056_v5 = vadd.s32 48, %v11040_v19 }
 0x126   : > { %8951 = vmatpush3.bf16.msra.mxu0 %v9979_v6 }
 0x127   : > { %8952 = vmatprep.subr.bf16.mxu0 %v9980_v9 }
 0x128   : > { %8941 = vmatmul.mubr.bf16.vlgmr.msra.gmra.mrb[0].mxu1 %v1490_v57  ;;  %8873 = vmatmul.mubr.bf16.gmra.mrb[4].mxu0 %v1155_v18  ;;  %v2143_v57 = vld [vmem:[#allocation2 + $0x28] sm:$0x1f]  ;;  %v11068_v18 = vadd.s32 40, %v11040_v19 }
 0x129   : > { %8944 = vmatprep.mubr.bf16.mxu1 %v1669_v38  ;;  %8964 = vmatprep.mubr.bf16.mxu0 %v10784_v50  ;;  %v9985_v50 = vld [vmem:[%s12361_s1 + $0x178] sm:$0xff]   ;;  %v2182_v27 = vshrl.u32 %v2143_v57, 16  ;;  %v2185_v2 = vshll.u32 %v2143_v57, 16 }
 0x12a   : > { %8953 = vmatpush3.bf16.msra.mxu0 %v9980_v9  ;;  %v11062_v9 = vadd.s32 56, %v11040_v19 }
 0x12b   : > { %8954 = vmatprep.subr.bf16.mxu0 %v9981_v13  ;;  %v2184_v17 = vrot.slane %v2182_v27, 4  ;;  %v2187_v22 = vrot.slane %v2185_v2, 5 }
 0x12d   : > { %v2188_v41 = vor.u32 %v2187_v22, %v2184_v17 }
 0x12e   : > { %8955 = vmatpush3.bf16.msra.mxu0 %v9981_v13 }
 0x12f   : > { %8956 = vmatprep.subr.bf16.mxu0 %v9982_v53  ;;  %v2189_v51 = vsel %vm1996_vm5, %v10838_v28, %v2188_v41  ;;  %v604_v28 = vand.u32 7, %v11046_v45 }
 0x130   : > { %8945 = vmatmul.mubr.bf16.gmra.mrb[4].mxu1 %v1678_v10  ;;  %v611_v10 = vand.u32 7, %v11059_v7 }
 0x131   : > { %vm678_vm8 = vcmp.gt.s32.totalorder %v604_v28, 0  ;;  %vm702_vm0 = vcmp.lt.s32.totalorder %v604_v28, 7 }
 0x132   : > { %8957 = vmatpush3.bf16.msra.mxu0 %v9982_v53  ;;  %v625_v53 = vand.u32 7, %v11056_v5  ;;  %vm679_vm11 = vcmp.gt.s32.totalorder %v611_v10, 0  ;;  %v11110_v22 = vsel %vm702_vm0, 1.0, %v10373_v12 }
 0x133   : > { %8958 = vmatprep.subr.bf16.mxu0 %v9983_v32 }
 0x134   : > { %vm681_vm10 = vcmp.gt.s32.totalorder %v625_v53, 0 }
 0x135   : > { %v11088_v37 = vsel %vm681_vm10, 1.0, %v10373_v12 }
 0x136   : > { %8959 = vmatpush3.bf16.msra.mxu0 %v9983_v32  ;;  %v11075_v32 = vsel %vm678_vm8, 1.0, %v10373_v12  ;;  %vm703_vm8 = vcmp.lt.s32.totalorder %v611_v10, 7 }
 0x137   : > { %8960 = vmatprep.subr.bf16.mxu0 %v9984_v33  ;;  %v11131_v5 = vsel %vm703_vm8, 1.0, %v10373_v12 }
 0x13a   : > { %8961 = vmatpush3.bf16.msra.mxu0 %v9984_v33 }
 0x13b   : > { %8962 = vmatprep.subr.bf16.mxu0 %v9985_v50 }
 0x13e   : > { %8963 = vmatpush3.bf16.msra.mxu0 %v9985_v50 }
 0x13f   : > { %8972 = vmatprep.subr.bf16.mxu0 %v9986_v11 }
 0x141   : > { %8965 = vmatmul.mubr.bf16.vlgmr.msra.gmra.mrb[8].mxu0 %v10800_v58  ;;  %v9990_v58 = vld [vmem:[%s12361_s1 + $0xa0] sm:$0xff]  }
 0x142   : > { %8968 = vmatprep.mubr.bf16.mxu0 %v10803_v59  ;;  %8973 = vmatpush3.bf16.msra.mxu0 %v9986_v11  ;;  %v9991_v59 = vld [vmem:[%s12361_s1 + $0xa8] sm:$0xff]  }
 0x143   : > { %8974 = vmatprep.subr.bf16.mxu0 %v9987_v14 }
 0x146   : > { %8975 = vmatpush3.bf16.msra.mxu0 %v9987_v14  ;;  %v11080_v14 = vsel %vm676_vm9, 1.0, %v10373_v12 }
 0x147   : > { %8976 = vmatprep.subr.bf16.mxu0 %v9988_v55 }
 0x149   : > { %8969 = vmatmul.mubr.bf16.gmra.mrb[12].mxu0 %v1878_v20 }
 0x14a   : > { %8977 = vmatpush3.bf16.msra.mxu0 %v9988_v55  ;;  %8988 = vmatprep.mubr.bf16.mxu0 %v10809_v1  ;;  %v1820_v1 = vld [vmem:[#allocation2 + $0x20] sm:$0x1f]  ;;  %v632_v55 = vand.u32 7, %v11062_v9 }
 0x14b   : > { %8978 = vmatprep.subr.bf16.mxu0 %v9989_v46  ;;  %v2018_v26 = vshrl.u32 %v1820_v1, 16  ;;  %v2021_v24 = vshll.u32 %v1820_v1, 16 }
 0x14c   : > { %vm682_vm12 = vcmp.gt.s32.totalorder %v632_v55, 0  ;;  %vm706_vm9 = vcmp.lt.s32.totalorder %v632_v55, 7 }
 0x14d   : > { %v2020_v39 = vrot.slane %v2018_v26, 4  ;;  %v2023_v42 = vrot.slane %v2021_v24, 5 }
 0x14e   : > { %8979 = vmatpush3.bf16.msra.mxu0 %v9989_v46 }
 0x14f   : > { %8980 = vmatprep.subr.bf16.mxu0 %v9990_v58  ;;  %v2024_v35 = vor.u32 %v2023_v42, %v2020_v39  ;;  %v11091_v39 = vsel %vm679_vm11, 1.0, %v10373_v12 }
 0x152   : > { %8981 = vmatpush3.bf16.msra.mxu0 %v9990_v58 }
 0x153   : > { %8982 = vmatprep.subr.bf16.mxu0 %v9991_v59 }
 0x156   : > { %8983 = vmatpush3.bf16.msra.mxu0 %v9991_v59  ;;  %v618_v59 = vand.u32 7, %v11068_v18 }
 0x157   : > { %8984 = vmatprep.subr.bf16.mxu0 %v9992_v15 }
 0x158   : > { %vm680_vm13 = vcmp.gt.s32.totalorder %v618_v59, 0  ;;  %vm704_vm10 = vcmp.lt.s32.totalorder %v618_v59, 7 }
 0x15a   : > { %8985 = vmatpush3.bf16.msra.mxu0 %v9992_v15 }
 0x15b   : > { %8986 = vmatprep.subr.bf16.mxu0 %v9993_v44 }
 0x15e   : > { %8987 = vmatpush3.bf16.msra.mxu0 %v9993_v44 }
 0x15f   : > { %8996 = vmatprep.subr.bf16.mxu0 %v9994_v25 }
 0x161   : > { %8989 = vmatmul.mubr.bf16.vlgmr.msra.gmra.mrb[8].mxu0 %v10827_v16  ;;  %v2025_v16 = vsel %vm1996_vm5, %v10817_v8, %v2024_v35  ;;  %v10000_v8 = vld [vmem:[%s12361_s1 + $0x230] sm:$0xff]   ;;  %v11098_v35 = vsel %vm680_vm13, 1.0, %v10373_v12 }
 0x162   : > { %8992 = vmatprep.mubr.bf16.mxu0 %v10836_v21  ;;  %8997 = vmatpush3.bf16.msra.mxu0 %v9994_v25 }
 0x163   : > { %8998 = vmatprep.subr.bf16.mxu0 %v9995_v29 }
 0x166   : > { %8999 = vmatpush3.bf16.msra.mxu0 %v9995_v29 }
 0x167   : > { %9000 = vmatprep.subr.bf16.mxu0 %v9996_v43 }
 0x169   : > { %8993 = vmatmul.mubr.bf16.gmra.mrb[12].mxu0 %v2025_v16 }
 0x16a   : > { %9001 = vmatpush3.bf16.msra.mxu0 %v9996_v43  ;;  %9012 = vmatprep.mubr.bf16.mxu0 %v2172_v48  ;;  %v11094_v43 = vsel %vm682_vm12, 1.0, %v10373_v12 }
 0x16b   : > { %9002 = vmatprep.subr.bf16.mxu0 %v9997_v54 }
 0x16e   : > { %9003 = vmatpush3.bf16.msra.mxu0 %v9997_v54 }
 0x16f   : > { %9004 = vmatprep.subr.bf16.mxu0 %v9998_v40 }
 0x172   : > { %9005 = vmatpush3.bf16.msra.mxu0 %v9998_v40 }
 0x173   : > { %9006 = vmatprep.subr.bf16.mxu0 %v9999_v47 }
 0x176   : > { %9007 = vmatpush3.bf16.msra.mxu0 %v9999_v47 }
 0x177   : > { %9008 = vmatprep.subr.bf16.mxu0 %v10000_v8 }
 0x17a   : > { %9009 = vmatpush3.bf16.msra.mxu0 %v10000_v8 }
 0x17b   : > { %9010 = vmatprep.subr.bf16.mxu0 %v10001_v4 }
 0x17e   : > { %9011 = vmatpush3.bf16.msra.mxu0 %v10001_v4 }
 0x181   : > { %9013 = vmatmul.mubr.bf16.vlgmr.msra.gmra.mrb[8].mxu0 %v10836_v21  ;;  %v597_v21 = vand.u32 7, %v11043_v23 }
 0x182   : > { %9016 = vmatprep.mubr.bf16.mxu0 %v10849_v30  ;;  %v583_v30 = vand.u32 7, %v11040_v19 }
 0x183   : > { %vm677_vm6 = vcmp.gt.s32.totalorder %v597_v21, 0  ;;  %vm701_vm14 = vcmp.lt.s32.totalorder %v597_v21, 7 }
 0x184   : > { %vm675_vm7 = vcmp.gt.s32.totalorder %v583_v30, 0  ;;  %v11065_v13 = vsel %vm677_vm6, 1.0, %v10373_v12  ;;  %vm699_vm15 = vcmp.lt.s32.totalorder %v583_v30, 7  ;;  %v11104_v27 = vsel %vm701_vm14, 1.0, %v10373_v12 }
 0x185   : > { %v11071_v38 = vsel %vm675_vm7, 1.0, %v10373_v12  ;;  %vm700_vm6 = vcmp.lt.s32.totalorder %v590_v62, 7  ;;  %v11107_v2 = vsel %vm699_vm15, 1.0, %v10373_v12  ;;  %vm705_vm7 = vcmp.lt.s32.totalorder %v625_v53, 7 }
 0x186   : > { %v11114_v3 = vsel %vm700_vm6, 1.0, %v10373_v12  ;;  %v11140_v53 = vsel %vm706_vm9, 1.0, %v10373_v12 }
 0x189   : > { %9017 = vmatmul.mubr.bf16.gmra.mrb[12].mxu0 %v2189_v51 }
 0x1f3   : > { %v8870_v60 = vpop.f32.mrb[0].mxu0 }
 0x1f4   : > { %v1242_v61 = vpop.f32.mrb[1].mxu0 }
 0x1f5   : > { %v8871_v0 = vpop.f32.mrb[2].mxu0 }
 0x1f6   : > { %v1245_v6 = vpop.f32.mrb[3].mxu0 }
 0x1fb   : > { %v8942_v34 = vpop.f32.mrb[0].mxu1  ;;  %v8874_v50 = vpop.f32.mrb[4].mxu0 }
 0x1fc   : > { %v1806_v33 = vmul.f32 %v8942_v34, %v11065_v13  ;;  %v1765_v11 = vpop.f32.mrb[1].mxu1  ;;  %v1258_v20 = vpop.f32.mrb[5].mxu0 }
 0x1fd   : > { %v1804_v46 = vmul.f32 %v11071_v38, %v1765_v11  ;;  %v8943_v58 = vpop.f32.mrb[2].mxu1  ;;  %v8875_v1 = vpop.f32.mrb[6].mxu0 }
 0x1fe   : > { %v1814_v15 = vadd.f32 %v8870_v60, %v1806_v33  ;;  %v1807_v44 = vmul.f32 %v8943_v58, %v11075_v32  ;;  %v1768_v25 = vpop.f32.mrb[3].mxu1  ;;  %v1261_v29 = vpop.f32.mrb[7].mxu0  ;;  %v11144_v33 = vsel %vm704_vm10, 1.0, %v10373_v12 }
 0x1ff   : > { %v1812_v26 = vadd.f32 %v1804_v46, %v1242_v61  ;;  %v1805_v24 = vmul.f32 %v11080_v14, %v1768_v25 }
 0x200   : > { %v1815_v31 = vadd.f32 %v8871_v0, %v1807_v44  ;;  %v11128_v0 = vsel %vm705_vm7, 1.0, %v10373_v12 }
 0x201   : > { %v1813_v36 = vadd.f32 %v1805_v24, %v1245_v6 }
 0x203   : > { %v8946_v42 = vpop.f32.mrb[4].mxu1 }
 0x204   : > { %v1810_v49 = vmul.f32 %v8946_v42, %v11088_v37  ;;  %v1781_v52 = vpop.f32.mrb[5].mxu1 }
 0x205   : > { %v1808_v63 = vmul.f32 %v11091_v39, %v1781_v52  ;;  %v8947_v54 = vpop.f32.mrb[6].mxu1 }
 0x206   : > { %v1818_v16 = vadd.f32 %v8874_v50, %v1810_v49  ;;  %v1811_v48 = vmul.f32 %v8947_v54, %v11094_v43  ;;  %v1784_v40 = vpop.f32.mrb[7].mxu1 }
 0x207   : > { %v1816_v47 = vadd.f32 %v1808_v63, %v1258_v20  ;;  %v1809_v8 = vmul.f32 %v11098_v35, %v1784_v40 }
 0x208   : > { %v1819_v4 = vadd.f32 %v8875_v1, %v1811_v48 }
 0x209   : > { %v1817_v57 = vadd.f32 %v1809_v8, %v1261_v29 }
 0x254   : > { %v9014_v17 = vpop.f32.mrb[8].mxu0 }
 0x255   : > { %v2317_v41 = vmul.f32 %v9014_v17, %v11104_v27  ;;  %v2276_v51 = vpop.f32.mrb[9].mxu0  ;;  %v10003_v17 = vld [vmem:[%s12364_s4 + $0x108] sm:$0xff]  }
 0x256   : > { %v2315_v23 = vmul.f32 %v11107_v2, %v2276_v51  ;;  %v9015_v45 = vpop.f32.mrb[10].mxu0  ;;  %v10006_v51 = vld [vmem:[%s12364_s4 + $0xc8] sm:$0xff]  }
 0x257   : > { %v11117_v56 = vadd.f32 %v2317_v41, %v1814_v15  ;;  %v2318_v21 = vmul.f32 %v9015_v45, %v11110_v22  ;;  %v2279_v30 = vpop.f32.mrb[11].mxu0  ;;  %v10004_v41 = vld [vmem:[%s12364_s4 + $0xc0] sm:$0xff]   ;;  %v10008_v45 = vld [vmem:[%s12364_s4 + $0xd0] sm:$0xff]  }
 0x258   : > { %v11120_v60 = vadd.f32 %v2315_v23, %v1812_v26  ;;  %v2316_v28 = vmul.f32 %v11114_v3, %v2279_v30  ;;  %9092 = vmatprep.subr.bf16.mxu0 %v10004_v41  ;;  %v10005_v23 = vld [vmem:[%s12364_s4 + $0x110] sm:$0xff]   ;;  %v10010_v30 = vld [vmem:[%s12364_s4 + $0xd8] sm:$0xff]  }
 0x259   : > { %v11123_v61 = vadd.f32 %v2318_v21, %v1815_v31  ;;  %v2350_v50 = vmul.f32 %v11117_v56, %v11117_v56  ;;  %9093 = vmatpush3.bf16.msra.mxu0 %v10004_v41  ;;  %v10007_v21 = vld [vmem:[%s12364_s4 + $0x118] sm:$0xff]  }
 0x25a   : > { %v11125_v62 = vadd.f32 %v2316_v28, %v1813_v36  ;;  %v2348_v6 = vmul.f32 %v11120_v60, %v11120_v60  ;;  %9094 = vmatprep.subr.bf16.mxu0 %v10006_v51  ;;  %v10009_v28 = vld [vmem:[%s12364_s4 + $0x120] sm:$0xff]  }
 0x25b   : > { %v2351_v58 = vmul.f32 %v11123_v61, %v11123_v61 }
 0x25c   : > { %v2331_v7 = vadd.f32 %v11125_v62, %v11120_v60  ;;  %v2349_v9 = vmul.f32 %v11125_v62, %v11125_v62  ;;  %v9018_v18 = vpop.f32.mrb[12].mxu0 }
 0x25d   : > { %v2321_v34 = vmul.f32 %v9018_v18, %v11128_v0  ;;  %v2292_v10 = vpop.f32.mrb[13].mxu0  ;;  %9095 = vmatpush3.bf16.msra.mxu0 %v10006_v51  ;;  %v10013_v18 = vld [vmem:[%s12364_s4 + $0x130] sm:$0xff]  }
 0x25e   : > { %v2332_v11 = vadd.f32 %v2331_v7, %v11117_v56  ;;  %v2356_v55 = vadd.f32 %v2349_v9, %v2348_v6  ;;  %v2319_v46 = vmul.f32 %v11131_v5, %v2292_v10  ;;  %v9019_v20 = vpop.f32.mrb[14].mxu0  ;;  %9096 = vmatprep.subr.bf16.mxu0 %v10008_v45  ;;  %v10012_v6 = vld [vmem:[%s12364_s4 + $0xe0] sm:$0xff]   ;;  %v10011_v7 = vld [vmem:[%s12364_s4 + $0x128] sm:$0xff]   ;;  %v10015_v10 = vld [vmem:[%s12364_s4 + $0x138] sm:$0xff]  }
 0x25f   : > { %v11152_v59 = vadd.f32 %v2321_v34, %v1818_v16  ;;  %v2322_v15 = vmul.f32 %v9019_v20, %v11140_v53  ;;  %v2295_v44 = vpop.f32.mrb[15].mxu0  ;;  %v10014_v9 = vld [vmem:[%s12364_s4 + $0xe8] sm:$0xff]   ;;  %v10016_v34 = vld [vmem:[%s12364_s4 + $0xf0] sm:$0xff]  }
 0x260   : > { %v2357_v1 = vadd.f32 %v2356_v55, %v2350_v50  ;;  %v11155_v12 = vadd.f32 %v2319_v46, %v1816_v47  ;;  %v2333_v25 = vadd.f32 %v2332_v11, %v11123_v61  ;;  %v2320_v26 = vmul.f32 %v11144_v33, %v2295_v44  ;;  %v11223_v50 = vld [vmem:[%s12364_s4 + $0x40] sm:$0xff]   ;;  %v10018_v11 = vld [vmem:[%s12364_s4 + $0xf8] sm:$0xff]  }
 0x261   : > { %v11159_v24 = vadd.f32 %v2322_v15, %v1819_v4  ;;  %v2354_v16 = vmul.f32 %v11152_v59, %v11152_v59  ;;  %9097 = vmatpush3.bf16.msra.mxu0 %v10008_v45  ;;  %v11232_v55 = vld [vmem:[%s12364_s4] sm:$0xff]  }
 0x262   : > { %v2334_v29 = vadd.f32 %v2333_v25, %v11155_v12  ;;  %v2352_v31 = vmul.f32 %v11155_v12, %v11155_v12  ;;  %v11164_v36 = vadd.f32 %v2320_v26, %v1817_v57  ;;  %v2358_v42 = vadd.f32 %v2357_v1, %v2351_v58  ;;  %v10002_v57 = vld [vmem:[%s12364_s4 + $0x100] sm:$0xff]   ;;  %9098 = vmatprep.subr.bf16.mxu0 %v10010_v30 }
 0x263   : > { %v2355_v47 = vmul.f32 %v11159_v24, %v11159_v24  ;;  %9020 = vmatprep.subr.bf16.mxu1 %v10002_v57 }
 0x264   : > { %v2353_v49 = vmul.f32 %v11164_v36, %v11164_v36  ;;  %v2335_v52 = vadd.f32 %v2334_v29, %v11164_v36  ;;  %v2359_v63 = vadd.f32 %v2358_v42, %v2352_v31  ;;  %9021 = vmatpush3.bf16.msra.mxu1 %v10002_v57 }
 0x265   : > { %9022 = vmatprep.subr.bf16.mxu1 %v10003_v17  ;;  %9099 = vmatpush3.bf16.msra.mxu0 %v10010_v30 }
 0x266   : > { %v2336_v54 = vadd.f32 %v2335_v52, %v11152_v59  ;;  %v2360_v48 = vadd.f32 %v2359_v63, %v2353_v49  ;;  %9100 = vmatprep.subr.bf16.mxu0 %v10012_v6 }
 0x268   : > { %v2337_v40 = vadd.f32 %v2336_v54, %v11159_v24  ;;  %v2361_v8 = vadd.f32 %v2360_v48, %v2354_v16  ;;  %9023 = vmatpush3.bf16.msra.mxu1 %v10003_v17 }
 0x269   : > { %9024 = vmatprep.subr.bf16.mxu1 %v10005_v23  ;;  %9101 = vmatpush3.bf16.msra.mxu0 %v10012_v6  ;;  %v7978_v6 = vld [vmem:[%s12362_s2] ss:$0 sm:$0xff] }
 0x26a   : > { %2338 = vadd.xlane.f32.xlu0 %v2337_v40  ;;  %v2362_v4 = vadd.f32 %v2361_v8, %v2355_v47  ;;  %9102 = vmatprep.subr.bf16.mxu0 %v10014_v9 }
 0x26c   : > { %2363 = vadd.xlane.f32.xlu1 %v2362_v4  ;;  %9025 = vmatpush3.bf16.msra.mxu1 %v10005_v23 }
 0x26d   : > { %9026 = vmatprep.subr.bf16.mxu1 %v10007_v21  ;;  %9103 = vmatpush3.bf16.msra.mxu0 %v10014_v9 }
 0x26e   : > { %9104 = vmatprep.subr.bf16.mxu0 %v10016_v34 }
 0x270   : > { %9027 = vmatpush3.bf16.msra.mxu1 %v10007_v21 }
 0x271   : > { %9028 = vmatprep.subr.bf16.mxu1 %v10009_v28  ;;  %9105 = vmatpush3.bf16.msra.mxu0 %v10016_v34 }
 0x272   : > { %9106 = vmatprep.subr.bf16.mxu0 %v10018_v11 }
 0x274   : > { %9029 = vmatpush3.bf16.msra.mxu1 %v10009_v28 }
 0x275   : > { %9030 = vmatprep.subr.bf16.mxu1 %v10011_v7  ;;  %9107 = vmatpush3.bf16.msra.mxu0 %v10018_v11 }
 0x276   : > { %9116 = vmatprep.subr.bf16.mxu0 %v11232_v55 }
 0x278   : > { %9031 = vmatpush3.bf16.msra.mxu1 %v10011_v7 }
 0x279   : > { %9032 = vmatprep.subr.bf16.mxu1 %v10013_v18 }
 0x27c   : > { %9033 = vmatpush3.bf16.msra.mxu1 %v10013_v18 }
 0x27d   : > { %9034 = vmatprep.subr.bf16.mxu1 %v10015_v10 }
 0x280   : > { %9035 = vmatpush3.bf16.msra.mxu1 %v10015_v10 }
 0x281   : > { %9044 = vmatprep.subr.bf16.mxu1 %v11223_v50 }
 0x2f7   : > { %v2339_v46 = vpop.xlane.xlu0 %2338 }
 0x2f8   : > { %v2340_v20 = vrot.slane %v2339_v46, 4 }
 0x2f9   : > { %v2364_v58 = vpop.xlane.xlu1 %2363 }
 0x2fa   : > { %v2341_v15 = vadd.f32 %v2340_v20, %v2339_v46  ;;  %v2365_v44 = vrot.slane %v2364_v58, 4 }
 0x2fc   : > { %v2342_v1 = vrot.slane %v2341_v15, 2  ;;  %v2366_v25 = vadd.f32 %v2365_v44, %v2364_v58 }
 0x2fe   : > { %v2367_v26 = vrot.slane %v2366_v25, 2  ;;  %v2343_v29 = vadd.f32 %v2342_v1, %v2341_v15 }
 0x300   : > { %v2344_v31 = vrot.slane %v2343_v29, 1  ;;  %v2368_v42 = vadd.f32 %v2367_v26, %v2366_v25 }
 0x302   : > { %v2345_v49 = vadd.f32 %v2344_v31, %v2343_v29  ;;  %v2369_v52 = vrot.slane %v2368_v42, 1 }
 0x304   : > { %9860 = vpush %v2345_v49  ;;  %v2370_v63 = vadd.f32 %v2369_v52, %v2368_v42 }
 0x306   : > { %9862 = vpush %v2370_v63 }
 0x335   : > { %s9861_s17 = spop %9860 }
 0x336   : > { %v2347_v54 = vstv %s9861_s17 }
 0x337   : > { %v2373_v16 = vmul.f32 0.00390625, %v2347_v54  ;;  %s9863_s30 = spop %9862 }
 0x338   : > { %v2372_v48 = vstv %s9863_s30 }
 0x339   : > { %v2374_v40 = vmul.f32 0.00390625, %v2372_v48  ;;  %v2375_v47 = vmul.f32 %v2373_v16, %v2373_v16  ;;  %v2377_v57 = vsub.f32 %v11120_v60, %v2373_v16  ;;  %v2378_v17 = vsub.f32 %v11125_v62, %v2373_v16 }
 0x33a   : > { %v2379_v41 = vsub.f32 %v11117_v56, %v2373_v16  ;;  %v2380_v51 = vsub.f32 %v11123_v61, %v2373_v16  ;;  %v2381_v45 = vsub.f32 %v11155_v12, %v2373_v16  ;;  %v2382_v21 = vsub.f32 %v11164_v36, %v2373_v16  ;;  %v7979_v56 = vld [vmem:[%s12363_s3] ss:$0 sm:$0xff] }
 0x33b   : > { %v2376_v8 = vsub.f32 %v2374_v40, %v2375_v47  ;;  %v2383_v30 = vsub.f32 %v11152_v59, %v2373_v16  ;;  %v2384_v28 = vsub.f32 %v11159_v24, %v2373_v16 }
 0x33d   : > { %v2385_v4 = vadd.f32 1e-05, %v2376_v8 }
 0x33f   : > { %10234 = vrsqrt.f32 %v2385_v4 }
 0x349   : > { %v10235_v23 = vpop.eup %10234 }
 0x34a   : > { %v2387_v60 = vmul.f32 %v10235_v23, %v2377_v57  ;;  %v2388_v7 = vmul.f32 %v10235_v23, %v2378_v17  ;;  %v2389_v62 = vmul.f32 %v10235_v23, %v2379_v41  ;;  %v2390_v9 = vmul.f32 %v10235_v23, %v2380_v51 }
 0x34b   : > { %v2391_v61 = vmul.f32 %v10235_v23, %v2381_v45  ;;  %v2392_v12 = vmul.f32 %v10235_v23, %v2382_v21  ;;  %v2393_v18 = vmul.f32 %v10235_v23, %v2383_v30  ;;  %v2394_v36 = vmul.f32 %v10235_v23, %v2384_v28 }
 0x34c   : > { %v2402_v34 = vmul.f32 %v7978_v6, %v2387_v60  ;;  %v2403_v59 = vmul.f32 %v7978_v6, %v2388_v7  ;;  %v2404_v10 = vmul.f32 %v7978_v6, %v2389_v62  ;;  %v2405_v24 = vmul.f32 %v7978_v6, %v2390_v9 }
 0x34d   : > { %v2406_v11 = vmul.f32 %v7978_v6, %v2391_v61  ;;  %v2407_v46 = vmul.f32 %v7978_v6, %v2392_v12  ;;  %v2408_v20 = vmul.f32 %v7978_v6, %v2393_v18  ;;  %v2409_v58 = vmul.f32 %v7978_v6, %v2394_v36 }
 0x34e   : > { %v2417_v15 = vadd.f32 %v7979_v56, %v2402_v34  ;;  %v2418_v44 = vadd.f32 %v7979_v56, %v2403_v59  ;;  %v11249_v1 = vadd.f32 %v7979_v56, %v2404_v10  ;;  %v11251_v25 = vadd.f32 %v7979_v56, %v2405_v24 }
 0x34f   : > { %v11253_v26 = vadd.f32 %v7979_v56, %v2406_v11  ;;  %v11255_v29 = vadd.f32 %v7979_v56, %v2407_v46  ;;  %v11259_v16 = vadd.f32 %v7979_v56, %v2408_v20  ;;  %v11261_v48 = vadd.f32 %v7979_v56, %v2409_v58 }
 0x350   : > { %v2433_v31 = vmul.f32 0.044715, %v2417_v15  ;;  %v2434_v42 = vmul.f32 0.044715, %v2418_v44  ;;  %v2435_v49 = vmul.f32 0.044715, %v11249_v1 }
 0x351   : > { %v2436_v52 = vmul.f32 0.044715, %v11251_v25  ;;  %v2437_v8 = vmul.f32 0.044715, %v11253_v26  ;;  %v2438_v4 = vmul.f32 0.044715, %v11255_v29 }
 0x352   : > { %v2441_v63 = vmul.f32 %v2433_v31, %v2417_v15  ;;  %v2442_v54 = vmul.f32 %v2434_v42, %v2418_v44  ;;  %v2443_v40 = vmul.f32 %v2435_v49, %v11249_v1  ;;  %v2439_v28 = vmul.f32 0.044715, %v11259_v16 }
 0x353   : > { %v2444_v47 = vmul.f32 %v2436_v52, %v11251_v25  ;;  %v2445_v23 = vmul.f32 %v2437_v8, %v11253_v26  ;;  %v2446_v45 = vmul.f32 %v2438_v4, %v11255_v29  ;;  %v2440_v6 = vmul.f32 0.044715, %v11261_v48 }
 0x354   : > { %v2449_v57 = vmul.f32 %v2441_v63, %v2417_v15  ;;  %v2450_v17 = vmul.f32 %v2442_v54, %v2418_v44  ;;  %v2451_v41 = vmul.f32 %v2443_v40, %v11249_v1  ;;  %v2447_v12 = vmul.f32 %v2439_v28, %v11259_v16 }
 0x355   : > { %v2452_v51 = vmul.f32 %v2444_v47, %v11251_v25  ;;  %v2453_v62 = vmul.f32 %v2445_v23, %v11253_v26  ;;  %v2454_v9 = vmul.f32 %v2446_v45, %v11255_v29  ;;  %v2448_v18 = vmul.f32 %v2440_v6, %v11261_v48 }
 0x356   : > { %v2457_v21 = vadd.f32 %v2449_v57, %v2417_v15  ;;  %v2458_v30 = vadd.f32 %v2450_v17, %v2418_v44  ;;  %v2459_v60 = vadd.f32 %v2451_v41, %v11249_v1  ;;  %v2455_v24 = vmul.f32 %v2447_v12, %v11259_v16  ;;  %v2979_v57 = vld [vmem:[#allocation2] sm:$0x80] }
 0x357   : > { %v2460_v7 = vadd.f32 %v2452_v51, %v11251_v25  ;;  %v2461_v59 = vadd.f32 %v2453_v62, %v11253_v26  ;;  %v2462_v10 = vadd.f32 %v2454_v9, %v11255_v29  ;;  %v2456_v11 = vmul.f32 %v2448_v18, %v11261_v48 }
 0x358   : > { %v2465_v56 = vmul.f32 0.7978846, %v2457_v21  ;;  %v2466_v61 = vmul.f32 0.7978846, %v2458_v30  ;;  %v2467_v36 = vmul.f32 0.7978846, %v2459_v60  ;;  %v2463_v58 = vadd.f32 %v2455_v24, %v11259_v16 }
 0x359   : > { %v2468_v34 = vmul.f32 0.7978846, %v2460_v7  ;;  %v2469_v46 = vmul.f32 0.7978846, %v2461_v59  ;;  %v2470_v20 = vmul.f32 0.7978846, %v2462_v10  ;;  %v2464_v31 = vadd.f32 %v2456_v11, %v11261_v48 }
 0x35a   : > { %10236 = vtanh.f32 %v2465_v56  ;;  %v2471_v42 = vmul.f32 0.7978846, %v2463_v58  ;;  %v2425_v54 = vmul.f32 0.5, %v2417_v15  ;;  %v2426_v8 = vmul.f32 0.5, %v2418_v44  ;;  %v2962_v10 = vld [vmem:[#allocation2] sm:$0xf8] }
 0x35b   : > { %10238 = vtanh.f32 %v2466_v61  ;;  %v2472_v49 = vmul.f32 0.7978846, %v2464_v31  ;;  %v2427_v51 = vmul.f32 0.5, %v11249_v1  ;;  %v2428_v30 = vmul.f32 0.5, %v11251_v25 }
 0x35c   : > { %10240 = vtanh.f32 %v2467_v36  ;;  %v2429_v7 = vmul.f32 0.5, %v11253_v26  ;;  %v2998_v62 = vshrl.u32 %v2979_v57, 16  ;;  %v2430_v61 = vmul.f32 0.5, %v11255_v29  ;;  %v10019_v29 = vld [vmem:[%s12364_s4 + $0x48] sm:$0xff]  }
 0x35d   : > { %10242 = vtanh.f32 %v2468_v34  ;;  %v2431_v36 = vmul.f32 0.5, %v11259_v16  ;;  %v2432_v11 = vmul.f32 0.5, %v11261_v48 }
 0x35e   : > { %10244 = vtanh.f32 %v2469_v46  ;;  %v3000_v24 = vrot.slane %v2998_v62, 7 }
 0x35f   : > { %10246 = vtanh.f32 %v2470_v20 }
 0x360   : > { %10248 = vtanh.f32 %v2471_v42 }
 0x361   : > { %10250 = vtanh.f32 %v2472_v49 }
 0x364   : > { %v10237_v52 = vpop.eup %10236 }
 0x365   : > { %v10239_v63 = vpop.eup %10238  ;;  %v2481_v40 = vadd.f32 1.0, %v10237_v52  ;;  %v3151_v52 = vshrl.u32 %v2962_v10, 16 }
 0x366   : > { %v10241_v47 = vpop.eup %10240  ;;  %v2482_v4 = vadd.f32 1.0, %v10239_v63 }
 0x367   : > { %v10243_v17 = vpop.eup %10242  ;;  %v2489_v41 = vmul.f32 %v2481_v40, %v2425_v54  ;;  %v2483_v23 = vadd.f32 1.0, %v10241_v47  ;;  %v10021_v40 = vld [vmem:[%s12364_s4 + $0x50] sm:$0xff]  }
 0x368   : > { %v10245_v45 = vpop.eup %10244  ;;  %v2490_v21 = vmul.f32 %v2482_v4, %v2426_v8  ;;  %v2484_v28 = vadd.f32 1.0, %v10243_v17  ;;  %v3154_v4 = vshll.u32 %v2962_v10, 16 }
 0x369   : > { %v10247_v6 = vpop.eup %10246  ;;  %v2491_v60 = vmul.f32 %v2483_v23, %v2427_v51  ;;  %v2485_v15 = vadd.f32 1.0, %v10245_v45 }
 0x36a   : > { %v10249_v9 = vpop.eup %10248  ;;  %v11288_v44 = vpack.c.bf16 %v2490_v21, %v2489_v41  ;;  %v2492_v56 = vmul.f32 %v2484_v28, %v2428_v30  ;;  %v2486_v12 = vadd.f32 1.0, %v10247_v6  ;;  %v10022_v6 = vld [vmem:[%s12364_s4 + $0x8] sm:$0xff]   ;;  %v3156_v62 = vrot.slane %v3154_v4, 4 }
 0x36b   : > { %v10251_v1 = vpop.eup %10250  ;;  %v2493_v18 = vmul.f32 %v2485_v15, %v2429_v7  ;;  %v2487_v34 = vadd.f32 1.0, %v10249_v9  ;;  %v10023_v15 = vld [vmem:[%s12364_s4 + $0x58] sm:$0xff]  }
 0x36c   : > { %2501 = vst [vmem:[#allocation2 + $0x8] sm:$0xff] %v11288_v44  ;;  %9036 = vmatprep.mubr.bf16.mxu1 %v11288_v44  ;;  %v11295_v25 = vshrl.u32 %v11288_v44, 16  ;;  %v11297_v26 = vpack.c.bf16 %v2492_v56, %v2491_v60  ;;  %v2494_v59 = vmul.f32 %v2486_v12, %v2430_v61  ;;  %v2488_v16 = vadd.f32 1.0, %v10251_v1 }
 0x36d   : > { %v2495_v46 = vmul.f32 %v2487_v34, %v2431_v36  ;;  %v11311_v42 = vshll.u32 %v11288_v44, 16  ;;  %v2676_v21 = vrot.slane %v11288_v44, 4  ;;  %v3153_v60 = vrot.slane %v3151_v52, 3  ;;  %v10036_v44 = vld [vmem:[%s12364_s4 + $0x180] sm:$0xff]  }
 0x36e   : > { %9037 = vmatmul.mubr.bf16.vlgmr.msra.gmra.mrb[8].mxu1 %v11297_v26  ;;  %v11305_v20 = vshrl.u32 %v11297_v26, 16  ;;  %v11307_v58 = vpack.c.bf16 %v2494_v59, %v2493_v18  ;;  %v3004_v31 = vrot.slane %v11295_v25, 7  ;;  %v2496_v49 = vmul.f32 %v2488_v16, %v2432_v11  ;;  %v10024_v18 = vld [vmem:[%s12364_s4 + $0x10] sm:$0xff]   ;;  %v10026_v16 = vld [vmem:[%s12364_s4 + $0x18] sm:$0xff]  }
 0x36f   : > { %9045 = vmatpush3.bf16.msra.mxu1 %v11223_v50  ;;  %v11315_v48 = vshll.u32 %v11297_v26, 16  ;;  %v2517_v50 = vld [vmem:[#allocation2] sm:$0xf0]  ;;  %v3158_v9 = vrot.slane %v11295_v25, 3  ;;  %v3159_v56 = vrot.slane %v11311_v42, 4 }
 0x370   : > { %9040 = vmatprep.mubr.bf16.mxu1 %v11307_v58  ;;  %v11319_v63 = vshrl.u32 %v11307_v58, 16  ;;  %9046 = vmatprep.subr.bf16.mxu1 %v10019_v29  ;;  %v3007_v54 = vor.u32 %v11311_v42, %v3004_v31  ;;  %v3012_v47 = vrot.slane %v11305_v20, 7  ;;  %v11326_v8 = vpack.c.bf16 %v2496_v49, %v2495_v46 }
 0x371   : > { %v11332_v51 = vshll.u32 %v11307_v58, 16  ;;  %v2675_v45 = vrot.slane %v2517_v50, 4  ;;  %v3675_v36 = vshrl.u32 %v2517_v50, 16  ;;  %v3678_v34 = vshll.u32 %v2517_v50, 16 }
 0x372   : > { %v3008_v57 = vsel %vm1316_vm1, %v3000_v24, %v3007_v54  ;;  %v3015_v17 = vor.u32 %v11315_v48, %v3012_v47  ;;  %v3020_v41 = vrot.slane %v11319_v63, 7  ;;  %2504 = vst [vmem:[#allocation2 + $0x20] sm:$0xff] %v11326_v8  ;;  %v11336_v23 = vshrl.u32 %v11326_v8, 16  ;;  %v10027_v54 = vld [vmem:[%s12364_s4 + $0x68] sm:$0xff]  }
 0x373   : > { %9047 = vmatpush3.bf16.msra.mxu1 %v10019_v29  ;;  %9108 = vmatprep.mubr.bf16.mxu0 %v3008_v57  ;;  %v11353_v61 = vshll.u32 %v11326_v8, 16  ;;  %v2677_v1 = vsel %vm993_vm2, %v2675_v45, %v2676_v21  ;;  %v3157_v29 = vor.u32 %v3156_v62, %v3153_v60  ;;  %v11366_v10 = vor.u32 %v3159_v56, %v3158_v9  ;;  %v10029_v60 = vld [vmem:[%s12364_s4 + $0x70] sm:$0xff]  }
 0x374   : > { %9048 = vmatprep.subr.bf16.mxu1 %v10021_v40  ;;  %v3016_v30 = vsel %vm1316_vm1, %v3004_v31, %v3015_v17  ;;  %v3023_v28 = vor.u32 %v11332_v51, %v3020_v41  ;;  %v3028_v7 = vrot.slane %v11336_v23, 7  ;;  %v3541_v24 = vrot.slane %v11311_v42, 1 }
 0x375   : > { %9109 = vmatmul.mubr.bf16.vlgmr.msra.gmra.mrb[16].mxu0 %v3016_v30  ;;  %v3543_v11 = vrot.slane %v11315_v48, 1  ;;  %v3546_v46 = vrot.slane %v11332_v51, 1  ;;  %v3677_v31 = vrot.slane %v3675_v36, 4  ;;  %v3680_v49 = vrot.slane %v3678_v34, 5  ;;  %v10031_v34 = vld [vmem:[%s12364_s4 + $0x78] sm:$0xff]  }
 0x376   : > { %9117 = vmatpush3.bf16.msra.mxu0 %v11232_v55  ;;  %9041 = vmatmul.mubr.bf16.gmra.mrb[12].mxu1 %v11326_v8  ;;  %v3024_v12 = vsel %vm1316_vm1, %v3012_v47, %v3023_v28  ;;  %v10025_v55 = vld [vmem:[%s12364_s4 + $0x60] sm:$0xff]   ;;  %v3031_v59 = vor.u32 %v11353_v61, %v3028_v7  ;;  %v3161_v50 = vsel %vm1470_vm3, %v3157_v29, %v11366_v10  ;;  %v3549_v17 = vrot.slane %v11353_v61, 1 }
 0x377   : > { %9049 = vmatpush3.bf16.msra.mxu1 %v10021_v40  ;;  %9112 = vmatprep.mubr.bf16.mxu0 %v3024_v12  ;;  %v3542_v40 = vor.u32 %v3541_v24, %v11295_v25  ;;  %v3545_v47 = vor.u32 %v3543_v11, %v11305_v20  ;;  %v3548_v4 = vor.u32 %v3546_v46, %v11319_v63  ;;  %v3682_v28 = vrot.slane %v11295_v25, 4 }
 0x378   : > { %9060 = vmatprep.mubr.bf16.mxu1 %v2677_v1  ;;  %9118 = vmatprep.subr.bf16.mxu0 %v10022_v6  ;;  %v3032_v52 = vsel %vm1316_vm1, %v3020_v41, %v3031_v59  ;;  %v10028_v41 = vld [vmem:[%s12364_s4 + $0x20] sm:$0xff]   ;;  %v3681_v30 = vor.u32 %v3680_v49, %v3677_v31  ;;  %v3686_v62 = vrot.slane %v11305_v20, 4  ;;  %v3687_v9 = vrot.slane %v11315_v48, 5  ;;  %v10030_v1 = vld [vmem:[%s12364_s4 + $0x28] sm:$0xff]  }
 0x379   : > { %9050 = vmatprep.subr.bf16.mxu1 %v10023_v15  ;;  %v11384_v57 = vsel %vm1857_vm4, %v3542_v40, %v3543_v11  ;;  %v11391_v45 = vsel %vm1857_vm4, %v3545_v47, %v3546_v46  ;;  %v11399_v7 = vsel %vm1857_vm4, %v3548_v4, %v3549_v17  ;;  %v3690_v25 = vrot.slane %v11319_v63, 4  ;;  %v10032_v11 = vld [vmem:[%s12364_s4 + $0x30] sm:$0xff]   ;;  %v10033_v46 = vld [vmem:[%s12364_s4 + $0x1c0] sm:$0xff]  }
 0x37a   : > { %9119 = vmatpush3.bf16.msra.mxu0 %v10022_v6  ;;  %v3683_v6 = vrot.slane %v11311_v42, 5  ;;  %v3691_v42 = vrot.slane %v11332_v51, 5  ;;  %v11408_v12 = vor.u32 %v3687_v9, %v3686_v62  ;;  %v3854_v59 = vrot.slane %v11336_v23, 4 }
 0x37b   : > { %9051 = vmatpush3.bf16.msra.mxu1 %v10023_v15  ;;  %9120 = vmatprep.subr.bf16.mxu0 %v10024_v18  ;;  %v11402_v15 = vor.u32 %v3549_v17, %v11336_v23  ;;  %v3855_v24 = vrot.slane %v11353_v61, 5  ;;  %v2678_v31 = vrot.slane %v11297_v26, 4  ;;  %v10035_v26 = vld [vmem:[%s12364_s4 + $0x1c8] sm:$0xff]   ;;  %v3162_v40 = vrot.slane %v11305_v20, 3 }
 0x37c   : > { %9052 = vmatprep.subr.bf16.mxu1 %v10025_v55  ;;  %v3684_v56 = vor.u32 %v3683_v6, %v3682_v28  ;;  %v11416_v36 = vor.u32 %v3691_v42, %v3690_v25  ;;  %v3163_v47 = vrot.slane %v11315_v48, 4  ;;  %v3166_v4 = vrot.slane %v11319_v63, 3  ;;  %v10037_v48 = vld [vmem:[%s12364_s4 + $0x1d0] sm:$0xff]   ;;  %v11473_v63 = vld [vmem:[#allocation2 + $0x8] sm:$0xf0] }
 0x37d   : > { %9113 = vmatmul.mubr.bf16.gmra.mrb[20].mxu0 %v3032_v52  ;;  %v11447_v52 = vrot.slane %v11307_v58, 4  ;;  %v2679_v58 = vsel %vm993_vm2, %v2676_v21, %v2678_v31  ;;  %v3167_v17 = vrot.slane %v11332_v51, 4  ;;  %v2828_v9 = vrot.slane %v11473_v63, 4  ;;  %v10038_v25 = vld [vmem:[%s12364_s4 + $0x188] sm:$0xff]  }
 0x37e   : > { %9121 = vmatpush3.bf16.msra.mxu0 %v10024_v18  ;;  %9132 = vmatprep.mubr.bf16.mxu0 %v3161_v50  ;;  %v11414_v18 = vsel %vm1996_vm5, %v3681_v30, %v3684_v56  ;;  %v11429_v29 = vsel %vm1996_vm5, %v11408_v12, %v11416_v36  ;;  %v2521_v50 = vld [vmem:[#allocation2 + $0x20] sm:$0xf]  ;;  %v3296_v30 = vld [vmem:[#allocation2 + $0x8] sm:$0xf8]  ;;  %v3164_v20 = vor.u32 %v3163_v47, %v3162_v40 }
 0x37f   : > { %9053 = vmatpush3.bf16.msra.mxu1 %v10025_v55  ;;  %9122 = vmatprep.subr.bf16.mxu0 %v10026_v16  ;;  %v11423_v55 = vsel %vm1996_vm5, %v3684_v56, %v11408_v12  ;;  %v3171_v51 = vshrl.u32 %v2521_v50, 16  ;;  %v3174_v21 = vshll.u32 %v2521_v50, 16  ;;  %v2682_v28 = vrot.slane %v2521_v50, 4  ;;  %v10041_v40 = vld [vmem:[%s12364_s4 + $0x1e0] sm:$0xff]   ;;  %v10043_v50 = vld [vmem:[%s12364_s4 + $0x1e8] sm:$0xff]  }
 0x380   : > { %9054 = vmatprep.subr.bf16.mxu1 %v10027_v54  ;;  %v11475_v6 = vor.u32 %v3167_v17, %v3166_v4  ;;  %v3318_v62 = vshll.u32 %v3296_v30, 16  ;;  %v3165_v56 = vsel %vm1470_vm3, %v11366_v10, %v3164_v20  ;;  %v10044_v17 = vld [vmem:[%s12364_s4 + $0x1a0] sm:$0xff]  }
 0x381   : > { %v3173_v42 = vrot.slane %v3171_v51, 3  ;;  %v10049_v51 = vld [vmem:[%s12364_s4 + $0x140] sm:$0xff]  }
 0x382   : > { %9123 = vmatpush3.bf16.msra.mxu0 %v10026_v16  ;;  %v11435_v16 = vor.u32 %v3855_v24, %v3854_v59  ;;  %v11487_v59 = vsel %vm1470_vm3, %v3164_v20, %v11475_v6  ;;  %v10039_v24 = vld [vmem:[%s12364_s4 + $0x1d8] sm:$0xff]  }
 0x383   : > { %9055 = vmatpush3.bf16.msra.mxu1 %v10027_v54  ;;  %9124 = vmatprep.subr.bf16.mxu0 %v10028_v41  ;;  %v10034_v54 = vld [vmem:[%s12364_s4 + $0x38] sm:$0xff]  }
 0x384   : > { %9056 = vmatprep.subr.bf16.mxu1 %v10029_v60  ;;  %v11444_v49 = vsel %vm1996_vm5, %v11416_v36, %v11435_v16 }
 0x386   : > { %9125 = vmatpush3.bf16.msra.mxu0 %v10028_v41  ;;  %v11464_v41 = vsel %vm993_vm2, %v2678_v31, %v11447_v52 }
 0x387   : > { %9057 = vmatpush3.bf16.msra.mxu1 %v10029_v60  ;;  %9126 = vmatprep.subr.bf16.mxu0 %v10030_v1  ;;  %v3315_v60 = vshrl.u32 %v3296_v30, 16  ;;  %v10045_v30 = vld [vmem:[%s12364_s4 + $0x1f0] sm:$0xff]  }
 0x388   : > { %9058 = vmatprep.subr.bf16.mxu1 %v10031_v34 }
 0x389   : > { %v3317_v10 = vrot.slane %v3315_v60, 3  ;;  %v10051_v60 = vld [vmem:[%s12364_s4 + $0x148] sm:$0xff]  }
 0x38a   : > { %9127 = vmatpush3.bf16.msra.mxu0 %v10030_v1  ;;  %v3176_v1 = vrot.slane %v3174_v21, 4  ;;  %v2833_v21 = vrot.slane %v11326_v8, 4  ;;  %v3343_v8 = vrot.slane %v11336_v23, 3  ;;  %v10053_v23 = vld [vmem:[%s12364_s4 + $0x158] sm:$0xff]  }
 0x38b   : > { %9059 = vmatpush3.bf16.msra.mxu1 %v10031_v34  ;;  %9128 = vmatprep.subr.bf16.mxu0 %v10032_v11  ;;  %v2683_v34 = vsel %vm993_vm2, %v11447_v52, %v2682_v28  ;;  %v10050_v28 = vld [vmem:[%s12364_s4 + $0x1b8] sm:$0xff]  }
 0x38c   : > { %9068 = vmatprep.subr.bf16.mxu1 %v10033_v46 }
 0x38e   : > { %9061 = vmatmul.mubr.bf16.vlgmr.msra.gmra.mrb[8].mxu1 %v2679_v58  ;;  %9129 = vmatpush3.bf16.msra.mxu0 %v10032_v11  ;;  %v3320_v11 = vrot.slane %v3318_v62, 4  ;;  %v2834_v62 = vsel %vm993_vm2, %v11447_v52, %v2833_v21 }
 0x38f   : > { %9064 = vmatprep.mubr.bf16.mxu1 %v11464_v41  ;;  %9069 = vmatpush3.bf16.msra.mxu1 %v10033_v46  ;;  %v2830_v46 = vsel %vm993_vm2, %v2828_v9, %v2678_v31  ;;  %v10042_v31 = vld [vmem:[%s12364_s4 + $0x198] sm:$0xff]   ;;  %v2805_v9 = vld [vmem:[#allocation2 + $0x28] sm:$0xf] }
 0x390   : > { %9130 = vmatprep.subr.bf16.mxu0 %v10034_v54  ;;  %9070 = vmatprep.subr.bf16.mxu1 %v10035_v26  ;;  %v3321_v47 = vor.u32 %v3320_v11, %v3317_v10 }
 0x392   : > { %9131 = vmatpush3.bf16.msra.mxu0 %v10034_v54  ;;  %v3177_v54 = vor.u32 %v3176_v1, %v3173_v42  ;;  %v3330_v4 = vsel %vm1470_vm3, %v3321_v47, %v3164_v20  ;;  %v10047_v20 = vld [vmem:[%s12364_s4 + $0x1f8] sm:$0xff]   ;;  %v10052_v42 = vld [vmem:[%s12364_s4 + $0x150] sm:$0xff]   ;;  %v3350_v1 = vshrl.u32 %v2805_v9, 16  ;;  %v10059_v47 = vld [vmem:[%s12364_s4 + $0x88] sm:$0xff]  }
 0x393   : > { %9071 = vmatpush3.bf16.msra.mxu1 %v10035_v26  ;;  %9140 = vmatprep.subr.bf16.mxu0 %v10036_v44  ;;  %v10040_v26 = vld [vmem:[%s12364_s4 + $0x190] sm:$0xff]  }
 0x394   : > { %9072 = vmatprep.subr.bf16.mxu1 %v10037_v48  ;;  %v3178_v58 = vsel %vm1470_vm3, %v11475_v6, %v3177_v54 }
 0x395   : > { %9133 = vmatmul.mubr.bf16.vlgmr.msra.gmra.mrb[16].mxu0 %v3165_v56  ;;  %v3346_v56 = vrot.slane %v11353_v61, 4  ;;  %v3352_v61 = vrot.slane %v3350_v1, 3 }
 0x396   : > { %9065 = vmatmul.mubr.bf16.gmra.mrb[12].mxu1 %v2683_v34  ;;  %9136 = vmatprep.mubr.bf16.mxu0 %v11487_v59 }
 0x397   : > { %9141 = vmatpush3.bf16.msra.mxu0 %v10036_v44  ;;  %9073 = vmatpush3.bf16.msra.mxu1 %v10037_v48  ;;  %v10046_v44 = vld [vmem:[%s12364_s4 + $0x1a8] sm:$0xff]   ;;  %v10048_v48 = vld [vmem:[%s12364_s4 + $0x1b0] sm:$0xff]   ;;  %v3347_v34 = vor.u32 %v3346_v56, %v3343_v8 }
 0x398   : > { %9084 = vmatprep.mubr.bf16.mxu1 %v2830_v46  ;;  %9142 = vmatprep.subr.bf16.mxu0 %v10038_v25  ;;  %v10054_v46 = vld [vmem:[%s12364_s4 + $0x160] sm:$0xff]  }
 0x399   : > { %9074 = vmatprep.subr.bf16.mxu1 %v10039_v24  ;;  %v3348_v10 = vsel %vm1470_vm3, %v11475_v6, %v3347_v34  ;;  %v10057_v6 = vld [vmem:[%s12364_s4 + $0x178] sm:$0xff]  }
 0x39b   : > { %9143 = vmatpush3.bf16.msra.mxu0 %v10038_v25  ;;  %9075 = vmatpush3.bf16.msra.mxu1 %v10039_v24  ;;  %v2835_v25 = vrot.slane %v2805_v9, 4 }
 0x39c   : > { %9144 = vmatprep.subr.bf16.mxu0 %v10040_v26  ;;  %9076 = vmatprep.subr.bf16.mxu1 %v10041_v40 }
 0x39d   : > { %9137 = vmatmul.mubr.bf16.gmra.mrb[20].mxu0 %v3178_v58  ;;  %v2836_v52 = vsel %vm993_vm2, %v2833_v21, %v2835_v25  ;;  %v3842_v21 = vshll.u32 %v11473_v63, 16 }
 0x39e   : > { %9156 = vmatprep.mubr.bf16.mxu0 %v3330_v4  ;;  %v10061_v4 = vld [vmem:[%s12364_s4 + $0x98] sm:$0xff]  }
 0x39f   : > { %9145 = vmatpush3.bf16.msra.mxu0 %v10040_v26  ;;  %9077 = vmatpush3.bf16.msra.mxu1 %v10041_v40  ;;  %v10058_v26 = vld [vmem:[%s12364_s4 + $0x80] sm:$0xff]   ;;  %v3518_v40 = vld [vmem:[#allocation2 + $0x28] sm:$0x1]  ;;  %v3844_v8 = vrot.slane %v3842_v21, 5 }
 0x3a0   : > { %9146 = vmatprep.subr.bf16.mxu0 %v10042_v31  ;;  %9078 = vmatprep.subr.bf16.mxu1 %v10043_v50  ;;  %v3553_v58 = vshll.u32 %v3518_v40, 16 }
 0x3a3   : > { %9147 = vmatpush3.bf16.msra.mxu0 %v10042_v31  ;;  %9079 = vmatpush3.bf16.msra.mxu1 %v10043_v50  ;;  %v10060_v31 = vld [vmem:[%s12364_s4 + $0x90] sm:$0xff]   ;;  %v3555_v50 = vrot.slane %v3553_v58, 1 }
 0x3a4   : > { %9148 = vmatprep.subr.bf16.mxu0 %v10044_v17  ;;  %9080 = vmatprep.subr.bf16.mxu1 %v10045_v30 }
 0x3a7   : > { %9149 = vmatpush3.bf16.msra.mxu0 %v10044_v17  ;;  %9081 = vmatpush3.bf16.msra.mxu1 %v10045_v30  ;;  %v3556_v17 = vsel %vm1857_vm4, %v11402_v15, %v3555_v50  ;;  %v10064_v15 = vld [vmem:[%s12364_s4 + $0xb0] sm:$0xff]   ;;  %v3499_v30 = vld [vmem:[#allocation2 + $0x20] sm:$0x1f] }
 0x3a8   : > { %9150 = vmatprep.subr.bf16.mxu0 %v10046_v44  ;;  %9082 = vmatprep.subr.bf16.mxu1 %v10047_v20 }
 0x3ab   : > { %9151 = vmatpush3.bf16.msra.mxu0 %v10046_v44  ;;  %9083 = vmatpush3.bf16.msra.mxu1 %v10047_v20  ;;  %v10066_v44 = vld [vmem:[%s12364_s4 + $0x200] sm:$0xff]   ;;  %v3695_v20 = vshrl.u32 %v3499_v30, 16 }
 0x3ac   : > { %9152 = vmatprep.subr.bf16.mxu0 %v10048_v48  ;;  %9164 = vmatprep.subr.bf16.mxu1 %v10049_v51 }
 0x3ae   : > { %9085 = vmatmul.mubr.bf16.vlgmr.msra.gmra.mrb[8].mxu1 %v11464_v41  ;;  %v3353_v41 = vshll.u32 %v2805_v9, 16 }
 0x3af   : > { %9153 = vmatpush3.bf16.msra.mxu0 %v10048_v48  ;;  %9088 = vmatprep.mubr.bf16.mxu1 %v2834_v62  ;;  %v3698_v48 = vshll.u32 %v3499_v30, 16 }
 0x3b0   : > { %9165 = vmatpush3.bf16.msra.mxu1 %v10049_v51  ;;  %9154 = vmatprep.subr.bf16.mxu0 %v10050_v28  ;;  %v3355_v24 = vrot.slane %v3353_v41, 4  ;;  %v3839_v51 = vshrl.u32 %v11473_v63, 16  ;;  %v10068_v63 = vld [vmem:[%s12364_s4 + $0x210] sm:$0xff]   ;;  %v10070_v41 = vld [vmem:[%s12364_s4 + $0x220] sm:$0xff]  }
 0x3b1   : > { %9166 = vmatprep.subr.bf16.mxu1 %v10051_v60  ;;  %v3700_v62 = vrot.slane %v3698_v48, 5 }
 0x3b2   : > { %v3356_v11 = vor.u32 %v3355_v24, %v3352_v61  ;;  %v3841_v9 = vrot.slane %v3839_v51, 4 }
 0x3b3   : > { %9155 = vmatpush3.bf16.msra.mxu0 %v10050_v28  ;;  %v10067_v28 = vld [vmem:[%s12364_s4 + $0x208] sm:$0xff]  }
 0x3b4   : > { %9167 = vmatpush3.bf16.msra.mxu1 %v10051_v60  ;;  %v3357_v54 = vsel %vm1470_vm3, %v3347_v34, %v3356_v11  ;;  %v3697_v60 = vrot.slane %v3695_v20, 4  ;;  %v3845_v25 = vor.u32 %v3844_v8, %v3841_v9  ;;  %v10071_v34 = vld [vmem:[%s12364_s4 + $0x228] sm:$0xff]  }
 0x3b5   : > { %9168 = vmatprep.subr.bf16.mxu1 %v10052_v42 }
 0x3b6   : > { %9157 = vmatmul.mubr.bf16.vlgmr.msra.gmra.mrb[16].mxu0 %v11487_v59  ;;  %9089 = vmatmul.mubr.bf16.gmra.mrb[12].mxu1 %v2836_v52  ;;  %v10055_v59 = vld [vmem:[%s12364_s4 + $0x168] sm:$0xff]   ;;  %v3701_v56 = vor.u32 %v3700_v62, %v3697_v60  ;;  %v3849_v1 = vsel %vm1996_vm5, %v3845_v25, %v11408_v12  ;;  %v10073_v12 = vld [vmem:[%s12364_s4 + $0x238] sm:$0xff]  }
 0x3b7   : > { %9160 = vmatprep.mubr.bf16.mxu0 %v3348_v10  ;;  %9180 = vmatprep.mubr.bf16.mxu1 %v11384_v57  ;;  %v10056_v57 = vld [vmem:[%s12364_s4 + $0x170] sm:$0xff]   ;;  %v3820_v52 = vld [vmem:[#allocation2 + $0x28] sm:$0x1f] }
 0x3b8   : > { %9169 = vmatpush3.bf16.msra.mxu1 %v10052_v42  ;;  %v10069_v42 = vld [vmem:[%s12364_s4 + $0x218] sm:$0xff]   ;;  %v3862_v61 = vshll.u32 %v3820_v52, 16 }
 0x3b9   : > { %9170 = vmatprep.subr.bf16.mxu1 %v10053_v23 }
 0x3ba   : > { %v3864_v10 = vrot.slane %v3862_v61, 5 }
 0x3bc   : > { %9171 = vmatpush3.bf16.msra.mxu1 %v10053_v23  ;;  %v3859_v23 = vshrl.u32 %v3820_v52, 16 }
 0x3bd   : > { %9172 = vmatprep.subr.bf16.mxu1 %v10054_v46 }
 0x3be   : > { %9161 = vmatmul.mubr.bf16.gmra.mrb[20].mxu0 %v3357_v54  ;;  %v3861_v24 = vrot.slane %v3859_v23, 4 }
 0x3c0   : > { %9173 = vmatpush3.bf16.msra.mxu1 %v10054_v46  ;;  %v3865_v11 = vor.u32 %v3864_v10, %v3861_v24 }
 0x3c1   : > { %9174 = vmatprep.subr.bf16.mxu1 %v10055_v59 }
 0x3c2   : > { %v3866_v46 = vsel %vm1996_vm5, %v11435_v16, %v3865_v11 }
 0x3c4   : > { %9175 = vmatpush3.bf16.msra.mxu1 %v10055_v59 }
 0x3c5   : > { %9176 = vmatprep.subr.bf16.mxu1 %v10056_v57 }
 0x3c8   : > { %9177 = vmatpush3.bf16.msra.mxu1 %v10056_v57 }
 0x3c9   : > { %9178 = vmatprep.subr.bf16.mxu1 %v10057_v6 }
 0x3cc   : > { %9179 = vmatpush3.bf16.msra.mxu1 %v10057_v6 }
 0x3cd   : > { %9188 = vmatprep.subr.bf16.mxu1 %v10058_v26 }
 0x3cf   : > { %9181 = vmatmul.mubr.bf16.vlgmr.msra.gmra.mrb[16].mxu1 %v11391_v45  ;;  %v10062_v45 = vld [vmem:[%s12364_s4 + $0xa0] sm:$0xff]  }
 0x3d0   : > { %9184 = vmatprep.mubr.bf16.mxu1 %v11399_v7  ;;  %9189 = vmatpush3.bf16.msra.mxu1 %v10058_v26  ;;  %v10063_v7 = vld [vmem:[%s12364_s4 + $0xa8] sm:$0xff]  }
 0x3d1   : > { %9190 = vmatprep.subr.bf16.mxu1 %v10059_v47 }
 0x3d4   : > { %9191 = vmatpush3.bf16.msra.mxu1 %v10059_v47 }
 0x3d5   : > { %9192 = vmatprep.subr.bf16.mxu1 %v10060_v31 }
 0x3d7   : > { %9185 = vmatmul.mubr.bf16.gmra.mrb[20].mxu1 %v3556_v17 }
 0x3d8   : > { %9193 = vmatpush3.bf16.msra.mxu1 %v10060_v31  ;;  %9204 = vmatprep.mubr.bf16.mxu1 %v11414_v18  ;;  %v10065_v18 = vld [vmem:[%s12364_s4 + $0xb8] sm:$0xff]  }
 0x3d9   : > { %9194 = vmatprep.subr.bf16.mxu1 %v10061_v4 }
 0x3dc   : > { %9195 = vmatpush3.bf16.msra.mxu1 %v10061_v4 }
 0x3dd   : > { %9196 = vmatprep.subr.bf16.mxu1 %v10062_v45 }
 0x3e0   : > { %9197 = vmatpush3.bf16.msra.mxu1 %v10062_v45 }
 0x3e1   : > { %9198 = vmatprep.subr.bf16.mxu1 %v10063_v7 }
 0x3e4   : > { %9199 = vmatpush3.bf16.msra.mxu1 %v10063_v7 }
 0x3e5   : > { %9200 = vmatprep.subr.bf16.mxu1 %v10064_v15 }
 0x3e8   : > { %9201 = vmatpush3.bf16.msra.mxu1 %v10064_v15 }
 0x3e9   : > { %9202 = vmatprep.subr.bf16.mxu1 %v10065_v18 }
 0x3ec   : > { %9203 = vmatpush3.bf16.msra.mxu1 %v10065_v18 }
 0x3ed   : > { %9212 = vmatprep.subr.bf16.mxu1 %v10066_v44 }
 0x3ef   : > { %9205 = vmatmul.mubr.bf16.vlgmr.msra.gmra.mrb[16].mxu1 %v11423_v55  ;;  %v3702_v55 = vsel %vm1996_vm5, %v11416_v36, %v3701_v56  ;;  %v10072_v36 = vld [vmem:[%s12364_s4 + $0x230] sm:$0xff]  }
 0x3f0   : > { %9208 = vmatprep.mubr.bf16.mxu1 %v11429_v29  ;;  %9213 = vmatpush3.bf16.msra.mxu1 %v10066_v44 }
 0x3f1   : > { %9214 = vmatprep.subr.bf16.mxu1 %v10067_v28 }
 0x3f4   : > { %9215 = vmatpush3.bf16.msra.mxu1 %v10067_v28 }
 0x3f5   : > { %9216 = vmatprep.subr.bf16.mxu1 %v10068_v63 }
 0x3f7   : > { %9209 = vmatmul.mubr.bf16.gmra.mrb[20].mxu1 %v3702_v55 }
 0x3f8   : > { %9217 = vmatpush3.bf16.msra.mxu1 %v10068_v63  ;;  %9228 = vmatprep.mubr.bf16.mxu1 %v3849_v1 }
 0x3f9   : > { %9218 = vmatprep.subr.bf16.mxu1 %v10069_v42 }
 0x3fc   : > { %9219 = vmatpush3.bf16.msra.mxu1 %v10069_v42 }
 0x3fd   : > { %9220 = vmatprep.subr.bf16.mxu1 %v10070_v41 }
 0x400   : > { %9221 = vmatpush3.bf16.msra.mxu1 %v10070_v41 }
 0x401   : > { %9222 = vmatprep.subr.bf16.mxu1 %v10071_v34 }
 0x404   : > { %9223 = vmatpush3.bf16.msra.mxu1 %v10071_v34 }
 0x405   : > { %9224 = vmatprep.subr.bf16.mxu1 %v10072_v36 }
 0x408   : > { %9225 = vmatpush3.bf16.msra.mxu1 %v10072_v36 }
 0x409   : > { %9226 = vmatprep.subr.bf16.mxu1 %v10073_v12 }
 0x40c   : > { %9227 = vmatpush3.bf16.msra.mxu1 %v10073_v12 }
 0x40f   : > { %9229 = vmatmul.mubr.bf16.vlgmr.msra.gmra.mrb[16].mxu1 %v11429_v29 }
 0x410   : > { %9232 = vmatprep.mubr.bf16.mxu1 %v11444_v49 }
 0x417   : > { %9233 = vmatmul.mubr.bf16.gmra.mrb[20].mxu1 %v3866_v46 }
 0x481   : > { %v9086_v54 = vpop.f32.mrb[8].mxu1 }
 0x482   : > { %v2923_v59 = vpop.f32.mrb[9].mxu1 }
 0x483   : > { %v9087_v57 = vpop.f32.mrb[10].mxu1 }
 0x484   : > { %v2926_v6 = vpop.f32.mrb[11].mxu1 }
 0x489   : > { %v9158_v26 = vpop.f32.mrb[16].mxu0  ;;  %v9090_v40 = vpop.f32.mrb[12].mxu1 }
 0x48a   : > { %v3485_v47 = vmul.f32 %v9158_v26, %v11065_v13  ;;  %v3444_v58 = vpop.f32.mrb[17].mxu0  ;;  %v2939_v31 = vpop.f32.mrb[13].mxu1 }
 0x48b   : > { %v3483_v50 = vmul.f32 %v11071_v38, %v3444_v58  ;;  %v9159_v29 = vpop.f32.mrb[18].mxu0  ;;  %v9091_v4 = vpop.f32.mrb[14].mxu1 }
 0x48c   : > { %v3493_v49 = vadd.f32 %v9086_v54, %v3485_v47  ;;  %v3486_v17 = vmul.f32 %v9159_v29, %v11075_v32  ;;  %v3447_v45 = vpop.f32.mrb[19].mxu0  ;;  %v2942_v16 = vpop.f32.mrb[15].mxu1 }
 0x48d   : > { %v3491_v7 = vadd.f32 %v3483_v50, %v2923_v59  ;;  %v3484_v15 = vmul.f32 %v11080_v14, %v3447_v45 }
 0x48e   : > { %v3494_v18 = vadd.f32 %v9087_v57, %v3486_v17 }
 0x48f   : > { %v3492_v30 = vadd.f32 %v3484_v15, %v2926_v6 }
 0x491   : > { %v9162_v44 = vpop.f32.mrb[20].mxu0 }
 0x492   : > { %v3489_v20 = vmul.f32 %v9162_v44, %v11088_v37  ;;  %v3460_v48 = vpop.f32.mrb[21].mxu0 }
 0x493   : > { %v3487_v51 = vmul.f32 %v11091_v39, %v3460_v48  ;;  %v9163_v21 = vpop.f32.mrb[22].mxu0 }
 0x494   : > { %v3497_v28 = vadd.f32 %v9090_v40, %v3489_v20  ;;  %v3490_v60 = vmul.f32 %v9163_v21, %v11094_v43  ;;  %v3463_v62 = vpop.f32.mrb[23].mxu0 }
 0x495   : > { %v3495_v9 = vadd.f32 %v3487_v51, %v2939_v31  ;;  %v3488_v8 = vmul.f32 %v11098_v35, %v3463_v62 }
 0x496   : > { %v3498_v63 = vadd.f32 %v9091_v4, %v3490_v60 }
 0x497   : > { %v3496_v56 = vadd.f32 %v3488_v8, %v2942_v16 }
 0x4e2   : > { %v9230_v25 = vpop.f32.mrb[16].mxu1 }
 0x4e3   : > { %v3994_v42 = vmul.f32 %v9230_v25, %v11104_v27  ;;  %v3953_v55 = vpop.f32.mrb[17].mxu1  ;;  %v10075_v25 = vld [vmem:[#allocation4 + $0x108] sm:$0xff]  }
 0x4e4   : > { %v3992_v1 = vmul.f32 %v11107_v2, %v3953_v55  ;;  %v9231_v41 = vpop.f32.mrb[18].mxu1  ;;  %v10078_v55 = vld [vmem:[#allocation4 + $0xc8] sm:$0xff]  }
 0x4e5   : > { %v11638_v34 = vadd.f32 %v3994_v42, %v3493_v49  ;;  %v3995_v36 = vmul.f32 %v9231_v41, %v11110_v22  ;;  %v3956_v12 = vpop.f32.mrb[19].mxu1  ;;  %v10076_v42 = vld [vmem:[#allocation4 + $0xc0] sm:$0xff]   ;;  %v10080_v41 = vld [vmem:[#allocation4 + $0xd0] sm:$0xff]  }
 0x4e6   : > { %v11641_v52 = vadd.f32 %v3992_v1, %v3491_v7  ;;  %v3993_v23 = vmul.f32 %v11114_v3, %v3956_v12  ;;  %9308 = vmatprep.subr.bf16.mxu1 %v10076_v42  ;;  %v10077_v1 = vld [vmem:[#allocation4 + $0x110] sm:$0xff]   ;;  %v10082_v12 = vld [vmem:[#allocation4 + $0xd8] sm:$0xff]  }
 0x4e7   : > { %v11644_v61 = vadd.f32 %v3995_v36, %v3494_v18  ;;  %v4027_v6 = vmul.f32 %v11638_v34, %v11638_v34  ;;  %9309 = vmatpush3.bf16.msra.mxu1 %v10076_v42  ;;  %v10079_v36 = vld [vmem:[#allocation4 + $0x118] sm:$0xff]   ;;  %v2505_v42 = vld [vmem:[#allocation3] sm:$0xff] }
 0x4e8   : > { %v11646_v24 = vadd.f32 %v3993_v23, %v3492_v30  ;;  %v4025_v10 = vmul.f32 %v11641_v52, %v11641_v52  ;;  %9310 = vmatprep.subr.bf16.mxu1 %v10078_v55  ;;  %v10081_v23 = vld [vmem:[#allocation4 + $0x120] sm:$0xff]  }
 0x4e9   : > { %v4028_v31 = vmul.f32 %v11644_v61, %v11644_v61 }
 0x4ea   : > { %v4008_v11 = vadd.f32 %v11646_v24, %v11641_v52  ;;  %v4026_v46 = vmul.f32 %v11646_v24, %v11646_v24  ;;  %v9234_v54 = vpop.f32.mrb[20].mxu1 }
 0x4eb   : > { %v3998_v59 = vmul.f32 %v9234_v54, %v11128_v0  ;;  %v3969_v57 = vpop.f32.mrb[21].mxu1  ;;  %9311 = vmatpush3.bf16.msra.mxu1 %v10078_v55  ;;  %v10085_v54 = vld [vmem:[#allocation4 + $0x130] sm:$0xff]  }
 0x4ec   : > { %v4009_v26 = vadd.f32 %v4008_v11, %v11638_v34  ;;  %v4033_v40 = vadd.f32 %v4026_v46, %v4025_v10  ;;  %v3996_v47 = vmul.f32 %v11131_v5, %v3969_v57  ;;  %v9235_v58 = vpop.f32.mrb[22].mxu1  ;;  %9312 = vmatprep.subr.bf16.mxu1 %v10080_v41  ;;  %v10084_v10 = vld [vmem:[#allocation4 + $0xe0] sm:$0xff]   ;;  %v10083_v11 = vld [vmem:[#allocation4 + $0x128] sm:$0xff]   ;;  %v10087_v57 = vld [vmem:[#allocation4 + $0x138] sm:$0xff]  }
 0x4ed   : > { %v11661_v50 = vadd.f32 %v3998_v59, %v3497_v28  ;;  %v3999_v29 = vmul.f32 %v9235_v58, %v11140_v53  ;;  %v3972_v4 = vpop.f32.mrb[23].mxu1  ;;  %v10086_v46 = vld [vmem:[#allocation4 + $0xe8] sm:$0xff]   ;;  %v10088_v59 = vld [vmem:[#allocation4 + $0xf0] sm:$0xff]   ;;  %v11687_v58 = vld [vmem:[#allocation4] sm:$0xff]  }
 0x4ee   : > { %v4034_v49 = vadd.f32 %v4033_v40, %v4027_v6  ;;  %v11664_v17 = vadd.f32 %v3996_v47, %v3495_v9  ;;  %v4010_v45 = vadd.f32 %v4009_v26, %v11644_v61  ;;  %v3997_v16 = vmul.f32 %v11144_v33, %v3972_v4  ;;  %v11684_v6 = vld [vmem:[#allocation4 + $0x40] sm:$0xff]   ;;  %v10090_v26 = vld [vmem:[#allocation4 + $0xf8] sm:$0xff]  }
 0x4ef   : > { %v11668_v7 = vadd.f32 %v3999_v29, %v3498_v63  ;;  %v4031_v28 = vmul.f32 %v11661_v50, %v11661_v50  ;;  %9313 = vmatpush3.bf16.msra.mxu1 %v10080_v41 }
 0x4f0   : > { %v4011_v15 = vadd.f32 %v4010_v45, %v11664_v17  ;;  %v4029_v18 = vmul.f32 %v11664_v17, %v11664_v17  ;;  %v11673_v30 = vadd.f32 %v3997_v16, %v3496_v56  ;;  %v4035_v44 = vadd.f32 %v4034_v49, %v4028_v31  ;;  %v10074_v56 = vld [vmem:[#allocation4 + $0x100] sm:$0xff]   ;;  %9314 = vmatprep.subr.bf16.mxu1 %v10082_v12 }
 0x4f1   : > { %v4032_v8 = vmul.f32 %v11668_v7, %v11668_v7  ;;  %9236 = vmatprep.subr.bf16.mxu0 %v10074_v56 }
 0x4f2   : > { %v4030_v20 = vmul.f32 %v11673_v30, %v11673_v30  ;;  %v4012_v48 = vadd.f32 %v4011_v15, %v11673_v30  ;;  %v4036_v51 = vadd.f32 %v4035_v44, %v4029_v18  ;;  %9237 = vmatpush3.bf16.msra.mxu0 %v10074_v56  ;;  %v2507_v56 = vld [vmem:[#allocation3 + $0x10] sm:$0xff] }
 0x4f3   : > { %9238 = vmatprep.subr.bf16.mxu0 %v10075_v25  ;;  %9315 = vmatpush3.bf16.msra.mxu1 %v10082_v12  ;;  %v2513_v55 = vunpack.c.l.bf16 %v2507_v56  ;;  %v2509_v12 = vunpack.c.l.bf16 %v2505_v42 }
 0x4f4   : > { %v4013_v21 = vadd.f32 %v4012_v48, %v11661_v50  ;;  %v4037_v60 = vadd.f32 %v4036_v51, %v4030_v20  ;;  %9316 = vmatprep.subr.bf16.mxu1 %v10084_v10 }
 0x4f6   : > { %v4014_v62 = vadd.f32 %v4013_v21, %v11668_v7  ;;  %v4038_v9 = vadd.f32 %v4037_v60, %v4031_v28  ;;  %9239 = vmatpush3.bf16.msra.mxu0 %v10075_v25  ;;  %v2506_v25 = vld [vmem:[#allocation3 + $0x8] sm:$0xff] }
 0x4f7   : > { %9240 = vmatprep.subr.bf16.mxu0 %v10077_v1  ;;  %9317 = vmatpush3.bf16.msra.mxu1 %v10084_v10  ;;  %v2511_v41 = vunpack.c.l.bf16 %v2506_v25 }
 0x4f8   : > { %4015 = vadd.xlane.f32.xlu0 %v4014_v62  ;;  %v4039_v63 = vadd.f32 %v4038_v9, %v4032_v8  ;;  %9318 = vmatprep.subr.bf16.mxu1 %v10086_v46 }
 0x4fa   : > { %9241 = vmatpush3.bf16.msra.mxu0 %v10077_v1  ;;  %v2514_v1 = vunpack.c.h.bf16 %v2507_v56 }
 0x4fb   : > { %9242 = vmatprep.subr.bf16.mxu0 %v10079_v36  ;;  %9319 = vmatpush3.bf16.msra.mxu1 %v10086_v46 }
 0x4fc   : > { %4040 = vadd.xlane.f32.xlu0 %v4039_v63  ;;  %9320 = vmatprep.subr.bf16.mxu1 %v10088_v59 }
 0x4fe   : > { %9243 = vmatpush3.bf16.msra.mxu0 %v10079_v36  ;;  %v2512_v36 = vunpack.c.h.bf16 %v2506_v25 }
 0x4ff   : > { %9244 = vmatprep.subr.bf16.mxu0 %v10081_v23  ;;  %9321 = vmatpush3.bf16.msra.mxu1 %v10088_v59 }
 0x500   : > { %9322 = vmatprep.subr.bf16.mxu1 %v10090_v26 }
 0x502   : > { %9245 = vmatpush3.bf16.msra.mxu0 %v10081_v23  ;;  %v2510_v23 = vunpack.c.h.bf16 %v2505_v42 }
 0x503   : > { %9246 = vmatprep.subr.bf16.mxu0 %v10083_v11  ;;  %9323 = vmatpush3.bf16.msra.mxu1 %v10090_v26 }
 0x504   : > { %9332 = vmatprep.subr.bf16.mxu1 %v11687_v58 }
 0x506   : > { %9247 = vmatpush3.bf16.msra.mxu0 %v10083_v11 }
 0x507   : > { %9248 = vmatprep.subr.bf16.mxu0 %v10085_v54 }
 0x50a   : > { %9249 = vmatpush3.bf16.msra.mxu0 %v10085_v54 }
 0x50b   : > { %9250 = vmatprep.subr.bf16.mxu0 %v10087_v57 }
 0x50e   : > { %9251 = vmatpush3.bf16.msra.mxu0 %v10087_v57 }
 0x50f   : > { %9260 = vmatprep.subr.bf16.mxu0 %v11684_v6 }
 0x585   : > { %v4016_v40 = vpop.xlane.xlu0 %4015 }
 0x586   : > { %v4017_v47 = vrot.slane %v4016_v40, 4 }
 0x588   : > { %v4018_v31 = vadd.f32 %v4017_v47, %v4016_v40 }
 0x589   : > { %v4041_v29 = vpop.xlane.xlu0 %4040 }
 0x58a   : > { %v4019_v4 = vrot.slane %v4018_v31, 2  ;;  %v4042_v49 = vrot.slane %v4041_v29, 4 }
 0x58c   : > { %v4043_v45 = vadd.f32 %v4042_v49, %v4041_v29  ;;  %v4020_v16 = vadd.f32 %v4019_v4, %v4018_v31  ;;  %v8180_v31 = vld [vmem:[%s12365_s5] ss:$0 sm:$0xff] }
 0x58e   : > { %v4044_v15 = vrot.slane %v4043_v45, 2  ;;  %v4021_v18 = vrot.slane %v4020_v16, 1 }
 0x590   : > { %v4022_v44 = vadd.f32 %v4021_v18, %v4020_v16  ;;  %v4045_v20 = vadd.f32 %v4044_v15, %v4043_v45 }
 0x592   : > { %9864 = vpush %v4022_v44  ;;  %v4046_v48 = vrot.slane %v4045_v20, 1 }
 0x594   : > { %v4047_v51 = vadd.f32 %v4046_v48, %v4045_v20 }
 0x596   : > { %9866 = vpush %v4047_v51 }
 0x5c3   : > { %s9865_s25 = spop %9864 }
 0x5c4   : > { %v4024_v21 = vstv %s9865_s25  ;;  %s568_s25 = scalar_lea.vmem %s12391_s21, %s8349_s23 }
 0x5c5   : > { %v4050_v28 = vmul.f32 0.00390625, %v4024_v21 }
 0x5c7   : > { %s9867_s27 = spop %9866  ;;  %v4052_v9 = vmul.f32 %v4050_v28, %v4050_v28  ;;  %v4054_v10 = vsub.f32 %v11641_v52, %v4050_v28  ;;  %v4055_v11 = vsub.f32 %v11646_v24, %v4050_v28  ;;  %v4056_v46 = vsub.f32 %v11638_v34, %v4050_v28  ;;  %v8181_v34 = vld [vmem:[%s12366_s6] ss:$0 sm:$0xff] }
 0x5c8   : > { %v4049_v60 = vstv %s9867_s27  ;;  %v4057_v54 = vsub.f32 %v11644_v61, %v4050_v28  ;;  %v4058_v57 = vsub.f32 %v11664_v17, %v4050_v28  ;;  %v4059_v26 = vsub.f32 %v11673_v30, %v4050_v28 }
 0x5c9   : > { %v4051_v62 = vmul.f32 0.00390625, %v4049_v60  ;;  %v4060_v40 = vsub.f32 %v11661_v50, %v4050_v28  ;;  %v4061_v47 = vsub.f32 %v11668_v7, %v4050_v28  ;;  %v2508_v60 = vld [vmem:[#allocation3 + $0x18] sm:$0xff] }
 0x5cb   : > { %v4053_v8 = vsub.f32 %v4051_v62, %v4052_v9 }
 0x5cd   : > { %v4062_v63 = vadd.f32 1e-05, %v4053_v8 }
 0x5cf   : > { %10252 = vrsqrt.f32 %v4062_v63 }
 0x5d9   : > { %v10253_v59 = vpop.eup %10252 }
 0x5da   : > { %v4064_v52 = vmul.f32 %v10253_v59, %v4054_v10  ;;  %v4065_v29 = vmul.f32 %v10253_v59, %v4055_v11  ;;  %v4066_v24 = vmul.f32 %v10253_v59, %v4056_v46  ;;  %v4067_v4 = vmul.f32 %v10253_v59, %v4057_v54 }
 0x5db   : > { %v4068_v61 = vmul.f32 %v10253_v59, %v4058_v57  ;;  %v4069_v17 = vmul.f32 %v10253_v59, %v4059_v26  ;;  %v4070_v49 = vmul.f32 %v10253_v59, %v4060_v40  ;;  %v4071_v30 = vmul.f32 %v10253_v59, %v4061_v47 }
 0x5dc   : > { %v4079_v45 = vmul.f32 %v8180_v31, %v4064_v52  ;;  %v4080_v50 = vmul.f32 %v8180_v31, %v4065_v29  ;;  %v4081_v16 = vmul.f32 %v8180_v31, %v4066_v24  ;;  %v4082_v7 = vmul.f32 %v8180_v31, %v4067_v4 }
 0x5dd   : > { %v4083_v15 = vmul.f32 %v8180_v31, %v4068_v61  ;;  %v4084_v18 = vmul.f32 %v8180_v31, %v4069_v17  ;;  %v4085_v44 = vmul.f32 %v8180_v31, %v4070_v49  ;;  %v4086_v20 = vmul.f32 %v8180_v31, %v4071_v30 }
 0x5de   : > { %v4094_v48 = vadd.f32 %v8181_v34, %v4079_v45  ;;  %v4095_v51 = vadd.f32 %v8181_v34, %v4080_v50  ;;  %v4096_v21 = vadd.f32 %v8181_v34, %v4081_v16  ;;  %v4097_v28 = vadd.f32 %v8181_v34, %v4082_v7 }
 0x5df   : > { %v4098_v62 = vadd.f32 %v8181_v34, %v4083_v15  ;;  %v4099_v9 = vadd.f32 %v8181_v34, %v4084_v18  ;;  %v4100_v8 = vadd.f32 %v8181_v34, %v4085_v44  ;;  %v4101_v63 = vadd.f32 %v8181_v34, %v4086_v20 }
 0x5e0   : > { %v4102_v56 = vadd.f32 %v4094_v48, %v2509_v12  ;;  %v4103_v25 = vadd.f32 %v4095_v51, %v2510_v23  ;;  %v11704_v42 = vadd.f32 %v4096_v21, %v2511_v41  ;;  %v11706_v10 = vadd.f32 %v4097_v28, %v2512_v36 }
 0x5e1   : > { %v11708_v11 = vadd.f32 %v4098_v62, %v2513_v55  ;;  %v11710_v46 = vadd.f32 %v4099_v9, %v2514_v1  ;;  %v2515_v54 = vunpack.c.l.bf16 %v2508_v60  ;;  %v2516_v59 = vunpack.c.h.bf16 %v2508_v60 }
 0x5e2   : > { %v4118_v57 = vmul.f32 0.044715, %v4102_v56  ;;  %v4119_v26 = vmul.f32 0.044715, %v4103_v25  ;;  %v4120_v40 = vmul.f32 0.044715, %v11704_v42 }
 0x5e3   : > { %v4121_v47 = vmul.f32 0.044715, %v11706_v10  ;;  %v11714_v12 = vadd.f32 %v4100_v8, %v2515_v54  ;;  %v11716_v41 = vadd.f32 %v4101_v63, %v2516_v59  ;;  %v4122_v1 = vmul.f32 0.044715, %v11708_v11 }
 0x5e4   : > { %v4126_v31 = vmul.f32 %v4118_v57, %v4102_v56  ;;  %v4127_v52 = vmul.f32 %v4119_v26, %v4103_v25  ;;  %v4128_v36 = vmul.f32 %v4120_v40, %v11704_v42  ;;  %v4123_v23 = vmul.f32 0.044715, %v11710_v46 }
 0x5e5   : > { %v4129_v55 = vmul.f32 %v4121_v47, %v11706_v10  ;;  %v4130_v61 = vmul.f32 %v4122_v1, %v11708_v11  ;;  %v4124_v45 = vmul.f32 0.044715, %v11714_v12  ;;  %v4125_v50 = vmul.f32 0.044715, %v11716_v41 }
 0x5e6   : > { %v4134_v29 = vmul.f32 %v4126_v31, %v4102_v56  ;;  %v4135_v24 = vmul.f32 %v4127_v52, %v4103_v25  ;;  %v4136_v4 = vmul.f32 %v4128_v36, %v11704_v42  ;;  %v4131_v17 = vmul.f32 %v4123_v23, %v11710_v46 }
 0x5e7   : > { %v4137_v34 = vmul.f32 %v4129_v55, %v11706_v10  ;;  %v4138_v15 = vmul.f32 %v4130_v61, %v11708_v11  ;;  %v4132_v48 = vmul.f32 %v4124_v45, %v11714_v12  ;;  %v4133_v51 = vmul.f32 %v4125_v50, %v11716_v41 }
 0x5e8   : > { %v4142_v49 = vadd.f32 %v4134_v29, %v4102_v56  ;;  %v4143_v30 = vadd.f32 %v4135_v24, %v4103_v25  ;;  %v4144_v16 = vadd.f32 %v4136_v4, %v11704_v42  ;;  %v4139_v18 = vmul.f32 %v4131_v17, %v11710_v46  ;;  %v4652_v29 = vld [vmem:[#allocation2] sm:$0x80] }
 0x5e9   : > { %v4145_v7 = vadd.f32 %v4137_v34, %v11706_v10  ;;  %v4146_v60 = vadd.f32 %v4138_v15, %v11708_v11  ;;  %v4140_v9 = vmul.f32 %v4132_v48, %v11714_v12  ;;  %v4141_v8 = vmul.f32 %v4133_v51, %v11716_v41 }
 0x5ea   : > { %v4150_v44 = vmul.f32 0.7978846, %v4142_v49  ;;  %v4151_v20 = vmul.f32 0.7978846, %v4143_v30  ;;  %v4152_v21 = vmul.f32 0.7978846, %v4144_v16  ;;  %v4147_v62 = vadd.f32 %v4139_v18, %v11710_v46 }
 0x5eb   : > { %v4153_v28 = vmul.f32 0.7978846, %v4145_v7  ;;  %v4154_v63 = vmul.f32 0.7978846, %v4146_v60  ;;  %v4148_v59 = vadd.f32 %v4140_v9, %v11714_v12  ;;  %v4149_v57 = vadd.f32 %v4141_v8, %v11716_v41  ;;  %v4635_v9 = vld [vmem:[#allocation2] sm:$0xf8] }
 0x5ec   : > { %10254 = vtanh.f32 %v4150_v44  ;;  %v4155_v54 = vmul.f32 0.7978846, %v4147_v62  ;;  %v4110_v52 = vmul.f32 0.5, %v4102_v56  ;;  %v4111_v1 = vmul.f32 0.5, %v4103_v25  ;;  %v10091_v62 = vld [vmem:[#allocation4 + $0x48] sm:$0xff]  }
 0x5ed   : > { %10256 = vtanh.f32 %v4151_v20  ;;  %v4156_v26 = vmul.f32 0.7978846, %v4148_v59  ;;  %v4157_v40 = vmul.f32 0.7978846, %v4149_v57  ;;  %v4112_v34 = vmul.f32 0.5, %v11704_v42 }
 0x5ee   : > { %10258 = vtanh.f32 %v4152_v21  ;;  %v4113_v30 = vmul.f32 0.5, %v11706_v10  ;;  %v4114_v7 = vmul.f32 0.5, %v11708_v11  ;;  %v4671_v15 = vshrl.u32 %v4652_v29, 16 }
 0x5ef   : > { %10260 = vtanh.f32 %v4153_v28  ;;  %v4115_v20 = vmul.f32 0.5, %v11710_v46  ;;  %v4116_v21 = vmul.f32 0.5, %v11714_v12  ;;  %v4117_v46 = vmul.f32 0.5, %v11716_v41 }
 0x5f0   : > { %10262 = vtanh.f32 %v4154_v63  ;;  %v4673_v8 = vrot.slane %v4671_v15, 7 }
 0x5f1   : > { %10264 = vtanh.f32 %v4155_v54 }
 0x5f2   : > { %10266 = vtanh.f32 %v4156_v26 }
 0x5f3   : > { %10268 = vtanh.f32 %v4157_v40 }
 0x5f6   : > { %v10255_v47 = vpop.eup %10254 }
 0x5f7   : > { %v10257_v31 = vpop.eup %10256  ;;  %v4166_v36 = vadd.f32 1.0, %v10255_v47  ;;  %v4824_v47 = vshrl.u32 %v4635_v9, 16 }
 0x5f8   : > { %v10259_v55 = vpop.eup %10258  ;;  %v4167_v23 = vadd.f32 1.0, %v10257_v31 }
 0x5f9   : > { %v10261_v24 = vpop.eup %10260  ;;  %v4174_v4 = vmul.f32 %v4166_v36, %v4110_v52  ;;  %v4168_v61 = vadd.f32 1.0, %v10259_v55  ;;  %v10093_v36 = vld [vmem:[#allocation4 + $0x50] sm:$0xff]  }
 0x5fa   : > { %v10263_v17 = vpop.eup %10262  ;;  %v4175_v49 = vmul.f32 %v4167_v23, %v4111_v1  ;;  %v4169_v45 = vadd.f32 1.0, %v10261_v24  ;;  %v4190_v1 = vld [vmem:[#allocation2] sm:$0xf0] }
 0x5fb   : > { %v10265_v50 = vpop.eup %10264  ;;  %v4176_v16 = vmul.f32 %v4168_v61, %v4112_v34  ;;  %v4170_v56 = vadd.f32 1.0, %v10263_v17  ;;  %v4348_v17 = vrot.slane %v4190_v1, 4 }
 0x5fc   : > { %v10267_v18 = vpop.eup %10266  ;;  %v11743_v25 = vpack.c.bf16 %v4175_v49, %v4174_v4  ;;  %v4177_v44 = vmul.f32 %v4169_v45, %v4113_v30  ;;  %v4171_v48 = vadd.f32 1.0, %v10265_v50  ;;  %v10094_v50 = vld [vmem:[#allocation4 + $0x8] sm:$0xff]  }
 0x5fd   : > { %v10269_v42 = vpop.eup %10268  ;;  %v4178_v51 = vmul.f32 %v4170_v56, %v4114_v7  ;;  %v4172_v28 = vadd.f32 1.0, %v10267_v18  ;;  %v10095_v56 = vld [vmem:[#allocation4 + $0x58] sm:$0xff]  }
 0x5fe   : > { %4186 = vst [vmem:[#allocation2 + $0x8] sm:$0xff] %v11743_v25  ;;  %9252 = vmatprep.mubr.bf16.mxu0 %v11743_v25  ;;  %v11750_v10 = vshrl.u32 %v11743_v25, 16  ;;  %v11752_v11 = vpack.c.bf16 %v4177_v44, %v4176_v16  ;;  %v4179_v60 = vmul.f32 %v4171_v48, %v4115_v20  ;;  %v4173_v63 = vadd.f32 1.0, %v10269_v42 }
 0x5ff   : > { %v4180_v54 = vmul.f32 %v4172_v28, %v4116_v21  ;;  %v11763_v26 = vshll.u32 %v11743_v25, 16  ;;  %v4349_v49 = vrot.slane %v11743_v25, 4  ;;  %v4826_v16 = vrot.slane %v4824_v47, 3 }
 0x600   : > { %9253 = vmatmul.mubr.bf16.vlgmr.msra.gmra.mrb[24].mxu0 %v11752_v11  ;;  %v11757_v12 = vshrl.u32 %v11752_v11, 16  ;;  %v11759_v59 = vpack.c.bf16 %v4179_v60, %v4178_v51  ;;  %v4677_v57 = vrot.slane %v11750_v10, 7  ;;  %v4181_v40 = vmul.f32 %v4173_v63, %v4117_v46  ;;  %v10096_v51 = vld [vmem:[#allocation4 + $0x10] sm:$0xff]   ;;  %v10097_v60 = vld [vmem:[#allocation4 + $0x60] sm:$0xff]   ;;  %v10098_v63 = vld [vmem:[#allocation4 + $0x18] sm:$0xff]  }
 0x601   : > { %9261 = vmatpush3.bf16.msra.mxu0 %v11684_v6  ;;  %v11767_v41 = vshll.u32 %v11752_v11, 16  ;;  %v4827_v6 = vshll.u32 %v4635_v9, 16  ;;  %v4831_v18 = vrot.slane %v11750_v10, 3  ;;  %v4832_v44 = vrot.slane %v11763_v26, 4 }
 0x602   : > { %9256 = vmatprep.mubr.bf16.mxu0 %v11759_v59  ;;  %v11771_v31 = vshrl.u32 %v11759_v59, 16  ;;  %9262 = vmatprep.subr.bf16.mxu0 %v10091_v62  ;;  %v4680_v52 = vor.u32 %v11763_v26, %v4677_v57  ;;  %v4685_v55 = vrot.slane %v11757_v12, 7  ;;  %v11775_v23 = vpack.c.bf16 %v4181_v40, %v4180_v54 }
 0x603   : > { %v11781_v34 = vshll.u32 %v11759_v59, 16  ;;  %v4829_v15 = vrot.slane %v4827_v6, 4  ;;  %v4350_v42 = vsel %vm993_vm2, %v4348_v17, %v4349_v49  ;;  %v5348_v21 = vshrl.u32 %v4190_v1, 16 }
 0x604   : > { %v4681_v29 = vsel %vm1316_vm1, %v4673_v8, %v4680_v52  ;;  %v4688_v24 = vor.u32 %v11767_v41, %v4685_v55  ;;  %v4693_v4 = vrot.slane %v11771_v31, 7  ;;  %4189 = vst [vmem:[#allocation2 + $0x20] sm:$0xff] %v11775_v23  ;;  %v11785_v61 = vshrl.u32 %v11775_v23, 16  ;;  %v10099_v52 = vld [vmem:[#allocation4 + $0x68] sm:$0xff]  }
 0x605   : > { %9263 = vmatpush3.bf16.msra.mxu0 %v10091_v62  ;;  %9324 = vmatprep.mubr.bf16.mxu1 %v4681_v29  ;;  %v11796_v20 = vshll.u32 %v11775_v23, 16  ;;  %v5351_v28 = vshll.u32 %v4190_v1, 16  ;;  %v4830_v62 = vor.u32 %v4829_v15, %v4826_v16  ;;  %v11803_v9 = vor.u32 %v4832_v44, %v4831_v18  ;;  %v10101_v16 = vld [vmem:[#allocation4 + $0x70] sm:$0xff]  }
 0x606   : > { %9264 = vmatprep.subr.bf16.mxu0 %v10093_v36  ;;  %v4689_v30 = vsel %vm1316_vm1, %v4677_v57, %v4688_v24  ;;  %v4696_v45 = vor.u32 %v11781_v34, %v4693_v4  ;;  %v4701_v7 = vrot.slane %v11785_v61, 7  ;;  %v5214_v8 = vrot.slane %v11763_v26, 1 }
 0x607   : > { %9325 = vmatmul.mubr.bf16.vlgmr.msra.gmra.mrb[24].mxu1 %v4689_v30  ;;  %v5216_v46 = vrot.slane %v11767_v41, 1  ;;  %v5219_v54 = vrot.slane %v11781_v34, 1  ;;  %v5350_v57 = vrot.slane %v5348_v21, 4  ;;  %v5353_v40 = vrot.slane %v5351_v28, 5  ;;  %v10103_v28 = vld [vmem:[#allocation4 + $0x78] sm:$0xff]  }
 0x608   : > { %9333 = vmatpush3.bf16.msra.mxu1 %v11687_v58  ;;  %9257 = vmatmul.mubr.bf16.gmra.mrb[28].mxu0 %v11775_v23  ;;  %v4697_v48 = vsel %vm1316_vm1, %v4685_v55, %v4696_v45  ;;  %v4704_v58 = vor.u32 %v11796_v20, %v4701_v7  ;;  %v4834_v1 = vsel %vm1470_vm3, %v4830_v62, %v11803_v9  ;;  %v5222_v24 = vrot.slane %v11796_v20, 1 }
 0x609   : > { %9265 = vmatpush3.bf16.msra.mxu0 %v10093_v36  ;;  %9328 = vmatprep.mubr.bf16.mxu1 %v4697_v48  ;;  %v5215_v36 = vor.u32 %v5214_v8, %v11750_v10  ;;  %v5218_v55 = vor.u32 %v5216_v46, %v11757_v12  ;;  %v5221_v6 = vor.u32 %v5219_v54, %v11771_v31  ;;  %v5355_v45 = vrot.slane %v11750_v10, 4 }
 0x60a   : > { %9276 = vmatprep.mubr.bf16.mxu0 %v4350_v42  ;;  %9334 = vmatprep.subr.bf16.mxu1 %v10094_v50  ;;  %v4705_v47 = vsel %vm1316_vm1, %v4693_v4, %v4704_v58  ;;  %v10100_v4 = vld [vmem:[#allocation4 + $0x20] sm:$0xff]   ;;  %v5354_v30 = vor.u32 %v5353_v40, %v5350_v57  ;;  %v5359_v15 = vrot.slane %v11757_v12, 4  ;;  %v5360_v18 = vrot.slane %v11767_v41, 5 }
 0x60b   : > { %9266 = vmatprep.subr.bf16.mxu0 %v10095_v56  ;;  %v11815_v29 = vsel %vm1857_vm4, %v5215_v36, %v5216_v46  ;;  %v11819_v17 = vsel %vm1857_vm4, %v5218_v55, %v5219_v54  ;;  %v11824_v7 = vsel %vm1857_vm4, %v5221_v6, %v5222_v24  ;;  %v5363_v48 = vrot.slane %v11771_v31, 4  ;;  %v10104_v46 = vld [vmem:[#allocation4 + $0x30] sm:$0xff]   ;;  %v10105_v54 = vld [vmem:[#allocation4 + $0x1c0] sm:$0xff]   ;;  %v10107_v36 = vld [vmem:[#allocation4 + $0x1c8] sm:$0xff]  }
 0x60c   : > { %9335 = vmatpush3.bf16.msra.mxu1 %v10094_v50  ;;  %v5356_v50 = vrot.slane %v11763_v26, 5  ;;  %v5364_v42 = vrot.slane %v11781_v34, 5  ;;  %v11833_v10 = vor.u32 %v5360_v18, %v5359_v15  ;;  %v10102_v26 = vld [vmem:[#allocation4 + $0x28] sm:$0xff]   ;;  %v5527_v58 = vrot.slane %v11785_v61, 4  ;;  %v4194_v6 = vld [vmem:[#allocation2 + $0x20] sm:$0xf] }
 0x60d   : > { %9267 = vmatpush3.bf16.msra.mxu0 %v10095_v56  ;;  %9336 = vmatprep.subr.bf16.mxu1 %v10096_v51  ;;  %v11827_v56 = vor.u32 %v5222_v24, %v11785_v61  ;;  %v5528_v8 = vrot.slane %v11796_v20, 5  ;;  %v4351_v57 = vrot.slane %v11752_v11, 4  ;;  %v4835_v55 = vrot.slane %v11757_v12, 3  ;;  %v10108_v12 = vld [vmem:[#allocation4 + $0x180] sm:$0xff]  }
 0x60e   : > { %9268 = vmatprep.subr.bf16.mxu0 %v10097_v60  ;;  %v5357_v44 = vor.u32 %v5356_v50, %v5355_v45  ;;  %v11838_v21 = vor.u32 %v5364_v42, %v5363_v48  ;;  %v4839_v24 = vrot.slane %v11771_v31, 3  ;;  %v4844_v31 = vshrl.u32 %v4194_v6, 16  ;;  %v10110_v48 = vld [vmem:[#allocation4 + $0x188] sm:$0xff]  }
 0x60f   : > { %9329 = vmatmul.mubr.bf16.gmra.mrb[28].mxu1 %v4705_v47  ;;  %v11860_v47 = vrot.slane %v11759_v59, 4  ;;  %v4352_v11 = vsel %vm993_vm2, %v4349_v49, %v4351_v57  ;;  %v11874_v49 = vld [vmem:[#allocation2 + $0x8] sm:$0xf0]  ;;  %v4847_v45 = vshll.u32 %v4194_v6, 16 }
 0x610   : > { %9337 = vmatpush3.bf16.msra.mxu1 %v10096_v51  ;;  %9348 = vmatprep.mubr.bf16.mxu1 %v4834_v1  ;;  %v11836_v51 = vsel %vm1996_vm5, %v5354_v30, %v5357_v44  ;;  %v11848_v62 = vsel %vm1996_vm5, %v11833_v10, %v11838_v21  ;;  %v4836_v1 = vrot.slane %v11767_v41, 4  ;;  %v4969_v30 = vld [vmem:[#allocation2 + $0x8] sm:$0xf8]  ;;  %v10109_v41 = vld [vmem:[#allocation4 + $0x1d0] sm:$0xff]   ;;  %v4501_v18 = vrot.slane %v11874_v49, 4 }
 0x611   : > { %9269 = vmatpush3.bf16.msra.mxu0 %v10097_v60  ;;  %9338 = vmatprep.subr.bf16.mxu1 %v10098_v63  ;;  %v11842_v60 = vsel %vm1996_vm5, %v5357_v44, %v11833_v10  ;;  %v11871_v59 = vsel %vm993_vm2, %v4351_v57, %v11860_v47  ;;  %v4991_v15 = vshll.u32 %v4969_v30, 16  ;;  %v4846_v42 = vrot.slane %v4844_v31, 3  ;;  %v10120_v31 = vld [vmem:[#allocation4 + $0x1b0] sm:$0xff]  }
 0x612   : > { %9270 = vmatprep.subr.bf16.mxu0 %v10099_v52  ;;  %v4837_v25 = vor.u32 %v4836_v1, %v4835_v55  ;;  %v10113_v55 = vld [vmem:[#allocation4 + $0x1e0] sm:$0xff]  }
 0x614   : > { %9339 = vmatpush3.bf16.msra.mxu1 %v10098_v63  ;;  %v11851_v63 = vor.u32 %v5528_v8, %v5527_v58  ;;  %v4838_v44 = vsel %vm1470_vm3, %v11803_v9, %v4837_v25  ;;  %v10111_v8 = vld [vmem:[#allocation4 + $0x1d8] sm:$0xff]   ;;  %v4503_v9 = vsel %vm993_vm2, %v4501_v18, %v4351_v57  ;;  %v10116_v57 = vld [vmem:[#allocation4 + $0x1a0] sm:$0xff]  }
 0x615   : > { %9271 = vmatpush3.bf16.msra.mxu0 %v10099_v52  ;;  %9340 = vmatprep.subr.bf16.mxu1 %v10100_v4  ;;  %v10106_v52 = vld [vmem:[#allocation4 + $0x38] sm:$0xff]  }
 0x616   : > { %9272 = vmatprep.subr.bf16.mxu0 %v10101_v16  ;;  %v11857_v40 = vsel %vm1996_vm5, %v11838_v21, %v11851_v63  ;;  %v4478_v18 = vld [vmem:[#allocation2 + $0x28] sm:$0xf] }
 0x618   : > { %9341 = vmatpush3.bf16.msra.mxu1 %v10100_v4  ;;  %v4840_v4 = vrot.slane %v11781_v34, 4  ;;  %v4355_v34 = vrot.slane %v4194_v6, 4  ;;  %v10114_v6 = vld [vmem:[#allocation4 + $0x198] sm:$0xff]  }
 0x619   : > { %9273 = vmatpush3.bf16.msra.mxu0 %v10101_v16  ;;  %9342 = vmatprep.subr.bf16.mxu1 %v10102_v26  ;;  %v4988_v16 = vshrl.u32 %v4969_v30, 16  ;;  %v10117_v30 = vld [vmem:[#allocation4 + $0x1f0] sm:$0xff]  }
 0x61a   : > { %9274 = vmatprep.subr.bf16.mxu0 %v10103_v28  ;;  %v11876_v50 = vor.u32 %v4840_v4, %v4839_v24  ;;  %v10115_v24 = vld [vmem:[#allocation4 + $0x1e8] sm:$0xff]  }
 0x61c   : > { %9343 = vmatpush3.bf16.msra.mxu1 %v10102_v26  ;;  %v4849_v26 = vrot.slane %v4847_v45, 4  ;;  %v11885_v58 = vsel %vm1470_vm3, %v4837_v25, %v11876_v50  ;;  %v10121_v45 = vld [vmem:[#allocation4 + $0x140] sm:$0xff]  }
 0x61d   : > { %9275 = vmatpush3.bf16.msra.mxu0 %v10103_v28  ;;  %9344 = vmatprep.subr.bf16.mxu1 %v10104_v46  ;;  %v4356_v28 = vsel %vm993_vm2, %v11860_v47, %v4355_v34  ;;  %v10122_v34 = vld [vmem:[#allocation4 + $0x1b8] sm:$0xff]  }
 0x61e   : > { %9284 = vmatprep.subr.bf16.mxu0 %v10105_v54 }
 0x620   : > { %9277 = vmatmul.mubr.bf16.vlgmr.msra.gmra.mrb[24].mxu0 %v4352_v11  ;;  %9345 = vmatpush3.bf16.msra.mxu1 %v10104_v46  ;;  %v4990_v46 = vrot.slane %v4988_v16, 3  ;;  %v10123_v16 = vld [vmem:[#allocation4 + $0x148] sm:$0xff]  }
 0x621   : > { %9280 = vmatprep.mubr.bf16.mxu0 %v11871_v59  ;;  %9285 = vmatpush3.bf16.msra.mxu0 %v10105_v54  ;;  %v4993_v54 = vrot.slane %v4991_v15, 4 }
 0x622   : > { %9346 = vmatprep.subr.bf16.mxu1 %v10106_v52  ;;  %9286 = vmatprep.subr.bf16.mxu0 %v10107_v36 }
 0x623   : > { %v4994_v1 = vor.u32 %v4993_v54, %v4990_v46 }
 0x624   : > { %9347 = vmatpush3.bf16.msra.mxu1 %v10106_v52  ;;  %v4850_v52 = vor.u32 %v4849_v26, %v4846_v42  ;;  %v10124_v42 = vld [vmem:[#allocation4 + $0x150] sm:$0xff]   ;;  %v5023_v26 = vshrl.u32 %v4478_v18, 16 }
 0x625   : > { %9287 = vmatpush3.bf16.msra.mxu0 %v10107_v36  ;;  %9356 = vmatprep.subr.bf16.mxu1 %v10108_v12  ;;  %v10112_v36 = vld [vmem:[#allocation4 + $0x190] sm:$0xff]   ;;  %v5003_v4 = vsel %vm1470_vm3, %v4994_v1, %v4837_v25  ;;  %v4506_v25 = vrot.slane %v11775_v23, 4  ;;  %v4508_v23 = vrot.slane %v4478_v18, 4  ;;  %v10131_v1 = vld [vmem:[#allocation4 + $0x88] sm:$0xff]  }
 0x626   : > { %9288 = vmatprep.subr.bf16.mxu0 %v10109_v41  ;;  %v4851_v11 = vsel %vm1470_vm3, %v11876_v50, %v4850_v52  ;;  %v5025_v46 = vrot.slane %v5023_v26, 3  ;;  %v10141_v26 = vld [vmem:[#allocation4 + $0x218] sm:$0xff]  }
 0x627   : > { %9349 = vmatmul.mubr.bf16.vlgmr.msra.gmra.mrb[24].mxu1 %v4838_v44  ;;  %v4507_v15 = vsel %vm993_vm2, %v11860_v47, %v4506_v25  ;;  %v5016_v44 = vrot.slane %v11785_v61, 3  ;;  %v10125_v47 = vld [vmem:[#allocation4 + $0x158] sm:$0xff]  }
 0x628   : > { %9281 = vmatmul.mubr.bf16.gmra.mrb[28].mxu0 %v4356_v28  ;;  %9352 = vmatprep.mubr.bf16.mxu1 %v11885_v58  ;;  %v5026_v28 = vshll.u32 %v4478_v18, 16 }
 0x629   : > { %9357 = vmatpush3.bf16.msra.mxu1 %v10108_v12  ;;  %9289 = vmatpush3.bf16.msra.mxu0 %v10109_v41  ;;  %v10118_v12 = vld [vmem:[#allocation4 + $0x1a8] sm:$0xff]   ;;  %v10119_v41 = vld [vmem:[#allocation4 + $0x1f8] sm:$0xff]  }
 0x62a   : > { %9300 = vmatprep.mubr.bf16.mxu0 %v4503_v9  ;;  %9358 = vmatprep.subr.bf16.mxu1 %v10110_v48  ;;  %v5028_v61 = vrot.slane %v5026_v28, 4  ;;  %v10126_v9 = vld [vmem:[#allocation4 + $0x160] sm:$0xff]  }
 0x62b   : > { %9290 = vmatprep.subr.bf16.mxu0 %v10111_v8 }
 0x62c   : > { %v5029_v54 = vor.u32 %v5028_v61, %v5025_v46  ;;  %v5493_v46 = vld [vmem:[#allocation2 + $0x28] sm:$0x1f] }
 0x62d   : > { %9359 = vmatpush3.bf16.msra.mxu1 %v10110_v48  ;;  %9291 = vmatpush3.bf16.msra.mxu0 %v10111_v8  ;;  %v5019_v48 = vrot.slane %v11796_v20, 4  ;;  %v5535_v61 = vshll.u32 %v5493_v46, 16 }
 0x62e   : > { %9360 = vmatprep.subr.bf16.mxu1 %v10112_v36  ;;  %9292 = vmatprep.subr.bf16.mxu0 %v10113_v55 }
 0x62f   : > { %9353 = vmatmul.mubr.bf16.gmra.mrb[28].mxu1 %v4851_v11  ;;  %v5020_v8 = vor.u32 %v5019_v48, %v5016_v44  ;;  %v10140_v48 = vld [vmem:[#allocation4 + $0x210] sm:$0xff]  }
 0x630   : > { %9372 = vmatprep.mubr.bf16.mxu1 %v5003_v4  ;;  %v10133_v4 = vld [vmem:[#allocation4 + $0x98] sm:$0xff]  }
 0x631   : > { %9361 = vmatpush3.bf16.msra.mxu1 %v10112_v36  ;;  %9293 = vmatpush3.bf16.msra.mxu0 %v10113_v55  ;;  %v5021_v20 = vsel %vm1470_vm3, %v11876_v50, %v5020_v8  ;;  %v5030_v52 = vsel %vm1470_vm3, %v5020_v8, %v5029_v54  ;;  %v10127_v36 = vld [vmem:[#allocation4 + $0x168] sm:$0xff]   ;;  %v10129_v55 = vld [vmem:[#allocation4 + $0x178] sm:$0xff]   ;;  %v10130_v50 = vld [vmem:[#allocation4 + $0x80] sm:$0xff]  }
 0x632   : > { %9362 = vmatprep.subr.bf16.mxu1 %v10114_v6  ;;  %9294 = vmatprep.subr.bf16.mxu0 %v10115_v24  ;;  %v10143_v8 = vld [vmem:[#allocation4 + $0x228] sm:$0xff]  }
 0x635   : > { %9363 = vmatpush3.bf16.msra.mxu1 %v10114_v6  ;;  %9295 = vmatpush3.bf16.msra.mxu0 %v10115_v24  ;;  %v10132_v6 = vld [vmem:[#allocation4 + $0x90] sm:$0xff]  }
 0x636   : > { %9364 = vmatprep.subr.bf16.mxu1 %v10116_v57  ;;  %9296 = vmatprep.subr.bf16.mxu0 %v10117_v30 }
 0x639   : > { %9365 = vmatpush3.bf16.msra.mxu1 %v10116_v57  ;;  %9297 = vmatpush3.bf16.msra.mxu0 %v10117_v30  ;;  %v10134_v30 = vld [vmem:[#allocation4 + $0xa0] sm:$0xff]  }
 0x63a   : > { %9366 = vmatprep.subr.bf16.mxu1 %v10118_v12  ;;  %9298 = vmatprep.subr.bf16.mxu0 %v10119_v41 }
 0x63d   : > { %9367 = vmatpush3.bf16.msra.mxu1 %v10118_v12  ;;  %9299 = vmatpush3.bf16.msra.mxu0 %v10119_v41  ;;  %v10137_v12 = vld [vmem:[#allocation4 + $0xb8] sm:$0xff]   ;;  %v5172_v41 = vld [vmem:[#allocation2 + $0x20] sm:$0x1f] }
 0x63e   : > { %9368 = vmatprep.subr.bf16.mxu1 %v10120_v31  ;;  %9380 = vmatprep.subr.bf16.mxu0 %v10121_v45 }
 0x640   : > { %9301 = vmatmul.mubr.bf16.vlgmr.msra.gmra.mrb[24].mxu0 %v11871_v59  ;;  %v4509_v59 = vsel %vm993_vm2, %v4506_v25, %v4508_v23  ;;  %v5512_v25 = vshrl.u32 %v11874_v49, 16 }
 0x641   : > { %9369 = vmatpush3.bf16.msra.mxu1 %v10120_v31  ;;  %9304 = vmatprep.mubr.bf16.mxu0 %v4507_v15  ;;  %v10138_v31 = vld [vmem:[#allocation4 + $0x200] sm:$0xff]  }
 0x642   : > { %9381 = vmatpush3.bf16.msra.mxu0 %v10121_v45  ;;  %9370 = vmatprep.subr.bf16.mxu1 %v10122_v34  ;;  %v5371_v45 = vshll.u32 %v5172_v41, 16  ;;  %v5514_v18 = vrot.slane %v5512_v25, 4 }
 0x643   : > { %9382 = vmatprep.subr.bf16.mxu0 %v10123_v16 }
 0x644   : > { %v5373_v15 = vrot.slane %v5371_v45, 5 }
 0x645   : > { %9371 = vmatpush3.bf16.msra.mxu1 %v10122_v34  ;;  %v10139_v34 = vld [vmem:[#allocation4 + $0x208] sm:$0xff]  }
 0x646   : > { %9383 = vmatpush3.bf16.msra.mxu0 %v10123_v16 }
 0x647   : > { %9384 = vmatprep.subr.bf16.mxu0 %v10124_v42 }
 0x648   : > { %9373 = vmatmul.mubr.bf16.vlgmr.msra.gmra.mrb[24].mxu1 %v11885_v58  ;;  %9305 = vmatmul.mubr.bf16.gmra.mrb[28].mxu0 %v4509_v59  ;;  %v10128_v58 = vld [vmem:[#allocation4 + $0x170] sm:$0xff]  }
 0x649   : > { %9376 = vmatprep.mubr.bf16.mxu1 %v5021_v20  ;;  %9396 = vmatprep.mubr.bf16.mxu0 %v11815_v29  ;;  %v5191_v29 = vld [vmem:[#allocation2 + $0x28] sm:$0x1]  ;;  %v10144_v59 = vld [vmem:[#allocation4 + $0x230] sm:$0xff]   ;;  %v5537_v20 = vrot.slane %v5535_v61, 5 }
 0x64a   : > { %9385 = vmatpush3.bf16.msra.mxu0 %v10124_v42  ;;  %v5226_v11 = vshll.u32 %v5191_v29, 16 }
 0x64b   : > { %9386 = vmatprep.subr.bf16.mxu0 %v10125_v47 }
 0x64c   : > { %v5228_v24 = vrot.slane %v5226_v11, 1 }
 0x64e   : > { %9387 = vmatpush3.bf16.msra.mxu0 %v10125_v47  ;;  %v5229_v57 = vsel %vm1857_vm4, %v11827_v56, %v5228_v24  ;;  %v5368_v56 = vshrl.u32 %v5172_v41, 16  ;;  %v10145_v47 = vld [vmem:[#allocation4 + $0x238] sm:$0xff]  }
 0x64f   : > { %9388 = vmatprep.subr.bf16.mxu0 %v10126_v9 }
 0x650   : > { %9377 = vmatmul.mubr.bf16.gmra.mrb[28].mxu1 %v5030_v52  ;;  %v5370_v16 = vrot.slane %v5368_v56, 4 }
 0x652   : > { %9389 = vmatpush3.bf16.msra.mxu0 %v10126_v9  ;;  %v5374_v23 = vor.u32 %v5373_v15, %v5370_v16 }
 0x653   : > { %9390 = vmatprep.subr.bf16.mxu0 %v10127_v36 }
 0x656   : > { %9391 = vmatpush3.bf16.msra.mxu0 %v10127_v36 }
 0x657   : > { %9392 = vmatprep.subr.bf16.mxu0 %v10128_v58 }
 0x65a   : > { %9393 = vmatpush3.bf16.msra.mxu0 %v10128_v58 }
 0x65b   : > { %9394 = vmatprep.subr.bf16.mxu0 %v10129_v55 }
 0x65e   : > { %9395 = vmatpush3.bf16.msra.mxu0 %v10129_v55 }
 0x65f   : > { %9404 = vmatprep.subr.bf16.mxu0 %v10130_v50 }
 0x661   : > { %9397 = vmatmul.mubr.bf16.vlgmr.msra.gmra.mrb[32].mxu0 %v11819_v17  ;;  %v10135_v17 = vld [vmem:[#allocation4 + $0xa8] sm:$0xff]  }
 0x662   : > { %9400 = vmatprep.mubr.bf16.mxu0 %v11824_v7  ;;  %9405 = vmatpush3.bf16.msra.mxu0 %v10130_v50  ;;  %v10136_v7 = vld [vmem:[#allocation4 + $0xb0] sm:$0xff]  }
 0x663   : > { %9406 = vmatprep.subr.bf16.mxu0 %v10131_v1 }
 0x666   : > { %9407 = vmatpush3.bf16.msra.mxu0 %v10131_v1 }
 0x667   : > { %9408 = vmatprep.subr.bf16.mxu0 %v10132_v6 }
 0x669   : > { %9401 = vmatmul.mubr.bf16.gmra.mrb[36].mxu0 %v5229_v57 }
 0x66a   : > { %9409 = vmatpush3.bf16.msra.mxu0 %v10132_v6  ;;  %9420 = vmatprep.mubr.bf16.mxu0 %v11836_v51  ;;  %v5515_v51 = vshll.u32 %v11874_v49, 16  ;;  %v5375_v49 = vsel %vm1996_vm5, %v11838_v21, %v5374_v23  ;;  %v5532_v21 = vshrl.u32 %v5493_v46, 16 }
 0x66b   : > { %9410 = vmatprep.subr.bf16.mxu0 %v10133_v4 }
 0x66c   : > { %v5517_v44 = vrot.slane %v5515_v51, 5 }
 0x66e   : > { %9411 = vmatpush3.bf16.msra.mxu0 %v10133_v4  ;;  %v5518_v42 = vor.u32 %v5517_v44, %v5514_v18 }
 0x66f   : > { %9412 = vmatprep.subr.bf16.mxu0 %v10134_v30 }
 0x670   : > { %v5522_v28 = vsel %vm1996_vm5, %v5518_v42, %v11833_v10  ;;  %v5534_v10 = vrot.slane %v5532_v21, 4 }
 0x672   : > { %9413 = vmatpush3.bf16.msra.mxu0 %v10134_v30  ;;  %v5538_v54 = vor.u32 %v5537_v20, %v5534_v10 }
 0x673   : > { %9414 = vmatprep.subr.bf16.mxu0 %v10135_v17 }
 0x674   : > { %v5539_v9 = vsel %vm1996_vm5, %v11851_v63, %v5538_v54 }
 0x676   : > { %9415 = vmatpush3.bf16.msra.mxu0 %v10135_v17 }
 0x677   : > { %9416 = vmatprep.subr.bf16.mxu0 %v10136_v7 }
 0x67a   : > { %9417 = vmatpush3.bf16.msra.mxu0 %v10136_v7 }
 0x67b   : > { %9418 = vmatprep.subr.bf16.mxu0 %v10137_v12 }
 0x67e   : > { %9419 = vmatpush3.bf16.msra.mxu0 %v10137_v12 }
 0x67f   : > { %9428 = vmatprep.subr.bf16.mxu0 %v10138_v31 }
 0x681   : > { %9421 = vmatmul.mubr.bf16.vlgmr.msra.gmra.mrb[32].mxu0 %v11842_v60  ;;  %v10142_v60 = vld [vmem:[#allocation4 + $0x220] sm:$0xff]  }
 0x682   : > { %9424 = vmatprep.mubr.bf16.mxu0 %v11848_v62  ;;  %9429 = vmatpush3.bf16.msra.mxu0 %v10138_v31 }
 0x683   : > { %9430 = vmatprep.subr.bf16.mxu0 %v10139_v34 }
 0x686   : > { %9431 = vmatpush3.bf16.msra.mxu0 %v10139_v34 }
 0x687   : > { %9432 = vmatprep.subr.bf16.mxu0 %v10140_v48 }
 0x689   : > { %9425 = vmatmul.mubr.bf16.gmra.mrb[36].mxu0 %v5375_v49 }
 0x68a   : > { %9433 = vmatpush3.bf16.msra.mxu0 %v10140_v48  ;;  %9444 = vmatprep.mubr.bf16.mxu0 %v5522_v28 }
 0x68b   : > { %9434 = vmatprep.subr.bf16.mxu0 %v10141_v26 }
 0x68e   : > { %9435 = vmatpush3.bf16.msra.mxu0 %v10141_v26 }
 0x68f   : > { %9436 = vmatprep.subr.bf16.mxu0 %v10142_v60 }
 0x692   : > { %9437 = vmatpush3.bf16.msra.mxu0 %v10142_v60 }
 0x693   : > { %9438 = vmatprep.subr.bf16.mxu0 %v10143_v8 }
 0x696   : > { %9439 = vmatpush3.bf16.msra.mxu0 %v10143_v8 }
 0x697   : > { %9440 = vmatprep.subr.bf16.mxu0 %v10144_v59 }
 0x69a   : > { %9441 = vmatpush3.bf16.msra.mxu0 %v10144_v59 }
 0x69b   : > { %9442 = vmatprep.subr.bf16.mxu0 %v10145_v47 }
 0x69e   : > { %9443 = vmatpush3.bf16.msra.mxu0 %v10145_v47 }
 0x6a1   : > { %9445 = vmatmul.mubr.bf16.vlgmr.msra.gmra.mrb[32].mxu0 %v11848_v62 }
 0x6a2   : > { %9448 = vmatprep.mubr.bf16.mxu0 %v11857_v40 }
 0x6a9   : > { %9449 = vmatmul.mubr.bf16.gmra.mrb[36].mxu0 %v5539_v9 }
 0x713   : > { %v9302_v52 = vpop.f32.mrb[24].mxu0 }
 0x714   : > { %v4596_v36 = vpop.f32.mrb[25].mxu0 }
 0x715   : > { %v9303_v58 = vpop.f32.mrb[26].mxu0 }
 0x716   : > { %v4599_v55 = vpop.f32.mrb[27].mxu0 }
 0x71b   : > { %v9374_v50 = vpop.f32.mrb[24].mxu1  ;;  %v9306_v29 = vpop.f32.mrb[28].mxu0 }
 0x71c   : > { %v5158_v1 = vmul.f32 %v9374_v50, %v11065_v13  ;;  %v5117_v11 = vpop.f32.mrb[25].mxu1  ;;  %v4612_v6 = vpop.f32.mrb[29].mxu0 }
 0x71d   : > { %v5156_v24 = vmul.f32 %v11071_v38, %v5117_v11  ;;  %v9375_v62 = vpop.f32.mrb[26].mxu1  ;;  %v9307_v4 = vpop.f32.mrb[30].mxu0 }
 0x71e   : > { %v5166_v40 = vadd.f32 %v9302_v52, %v5158_v1  ;;  %v5159_v57 = vmul.f32 %v9375_v62, %v11075_v32  ;;  %v5120_v30 = vpop.f32.mrb[27].mxu1  ;;  %v4615_v63 = vpop.f32.mrb[31].mxu0 }
 0x71f   : > { %v5164_v17 = vadd.f32 %v5156_v24, %v4596_v36  ;;  %v5157_v7 = vmul.f32 %v11080_v14, %v5120_v30 }
 0x720   : > { %v5167_v12 = vadd.f32 %v9303_v58, %v5159_v57 }
 0x721   : > { %v5165_v41 = vadd.f32 %v5157_v7, %v4599_v55 }
 0x723   : > { %v9378_v31 = vpop.f32.mrb[28].mxu1 }
 0x724   : > { %v5162_v56 = vmul.f32 %v9378_v31, %v11088_v37  ;;  %v5133_v45 = vpop.f32.mrb[29].mxu1 }
 0x725   : > { %v5160_v25 = vmul.f32 %v11091_v39, %v5133_v45  ;;  %v9379_v51 = vpop.f32.mrb[30].mxu1 }
 0x726   : > { %v5170_v34 = vadd.f32 %v9306_v29, %v5162_v56  ;;  %v5163_v16 = vmul.f32 %v9379_v51, %v11094_v43  ;;  %v5136_v15 = vpop.f32.mrb[31].mxu1 }
 0x727   : > { %v5168_v18 = vadd.f32 %v5160_v25, %v4612_v6  ;;  %v5161_v44 = vmul.f32 %v11098_v35, %v5136_v15 }
 0x728   : > { %v5171_v48 = vadd.f32 %v9307_v4, %v5163_v16 }
 0x729   : > { %v5169_v23 = vadd.f32 %v5161_v44, %v4615_v63 }
 0x774   : > { %v9446_v42 = vpop.f32.mrb[32].mxu0 }
 0x775   : > { %v5667_v26 = vmul.f32 %v9446_v42, %v11104_v27  ;;  %v5626_v49 = vpop.f32.mrb[33].mxu0  ;;  %v10147_v42 = vld [vmem:[#allocation6 + $0x108] sm:$0xff]  }
 0x776   : > { %v5665_v28 = vmul.f32 %v11107_v2, %v5626_v49  ;;  %v9447_v60 = vpop.f32.mrb[34].mxu0  ;;  %v10150_v49 = vld [vmem:[#allocation6 + $0xc8] sm:$0xff]  }
 0x777   : > { %v11931_v8 = vadd.f32 %v5667_v26, %v5166_v40  ;;  %v5668_v59 = vmul.f32 %v9447_v60, %v11110_v22  ;;  %v5629_v47 = vpop.f32.mrb[35].mxu0  ;;  %v10148_v26 = vld [vmem:[#allocation6 + $0xc0] sm:$0xff]   ;;  %v10152_v60 = vld [vmem:[#allocation6 + $0xd0] sm:$0xff]  }
 0x778   : > { %v11934_v46 = vadd.f32 %v5665_v28, %v5164_v17  ;;  %v5666_v21 = vmul.f32 %v11114_v3, %v5629_v47  ;;  %9524 = vmatprep.subr.bf16.mxu0 %v10148_v26  ;;  %v10149_v28 = vld [vmem:[#allocation6 + $0x110] sm:$0xff]   ;;  %v10154_v47 = vld [vmem:[#allocation6 + $0xd8] sm:$0xff]  }
 0x779   : > { %v11937_v61 = vadd.f32 %v5668_v59, %v5167_v12  ;;  %v5700_v55 = vmul.f32 %v11931_v8, %v11931_v8  ;;  %9525 = vmatpush3.bf16.msra.mxu0 %v10148_v26  ;;  %v10151_v59 = vld [vmem:[#allocation6 + $0x118] sm:$0xff]  }
 0x77a   : > { %v11939_v10 = vadd.f32 %v5666_v21, %v5165_v41  ;;  %v5698_v20 = vmul.f32 %v11934_v46, %v11934_v46  ;;  %9526 = vmatprep.subr.bf16.mxu0 %v10150_v49  ;;  %v10153_v21 = vld [vmem:[#allocation6 + $0x120] sm:$0xff]  }
 0x77b   : > { %v5701_v6 = vmul.f32 %v11937_v61, %v11937_v61 }
 0x77c   : > { %v5681_v54 = vadd.f32 %v11939_v10, %v11934_v46  ;;  %v5699_v9 = vmul.f32 %v11939_v10, %v11939_v10  ;;  %v9450_v52 = vpop.f32.mrb[36].mxu0 }
 0x77d   : > { %v5671_v36 = vmul.f32 %v9450_v52, %v11128_v0  ;;  %v5642_v58 = vpop.f32.mrb[37].mxu0  ;;  %9527 = vmatpush3.bf16.msra.mxu0 %v10150_v49  ;;  %v10157_v52 = vld [vmem:[#allocation6 + $0x130] sm:$0xff]  }
 0x77e   : > { %v5682_v50 = vadd.f32 %v5681_v54, %v11931_v8  ;;  %v5706_v29 = vadd.f32 %v5699_v9, %v5698_v20  ;;  %v5669_v1 = vmul.f32 %v11131_v5, %v5642_v58  ;;  %v9451_v11 = vpop.f32.mrb[38].mxu0  ;;  %9528 = vmatprep.subr.bf16.mxu0 %v10152_v60  ;;  %v10156_v20 = vld [vmem:[#allocation6 + $0xe0] sm:$0xff]   ;;  %v10155_v54 = vld [vmem:[#allocation6 + $0x128] sm:$0xff]   ;;  %v10159_v58 = vld [vmem:[#allocation6 + $0x138] sm:$0xff]  }
 0x77f   : > { %v11954_v24 = vadd.f32 %v5671_v36, %v5170_v34  ;;  %v5672_v62 = vmul.f32 %v9451_v11, %v11140_v53  ;;  %v5645_v4 = vpop.f32.mrb[39].mxu0  ;;  %v10158_v9 = vld [vmem:[#allocation6 + $0xe8] sm:$0xff]   ;;  %v10160_v36 = vld [vmem:[#allocation6 + $0xf0] sm:$0xff]  }
 0x780   : > { %v5707_v40 = vadd.f32 %v5706_v29, %v5700_v55  ;;  %v11957_v57 = vadd.f32 %v5669_v1, %v5168_v18  ;;  %v5683_v30 = vadd.f32 %v5682_v50, %v11937_v61  ;;  %v5670_v63 = vmul.f32 %v11144_v33, %v5645_v4  ;;  %v11977_v55 = vld [vmem:[#allocation6 + $0x40] sm:$0xff]   ;;  %v10162_v50 = vld [vmem:[#allocation6 + $0xf8] sm:$0xff]  }
 0x781   : > { %v11961_v17 = vadd.f32 %v5672_v62, %v5171_v48  ;;  %v5704_v34 = vmul.f32 %v11954_v24, %v11954_v24  ;;  %9529 = vmatpush3.bf16.msra.mxu0 %v10152_v60  ;;  %v11980_v29 = vld [vmem:[#allocation6] sm:$0xff]  }
 0x782   : > { %v5684_v7 = vadd.f32 %v5683_v30, %v11957_v57  ;;  %v5702_v12 = vmul.f32 %v11957_v57, %v11957_v57  ;;  %v11966_v41 = vadd.f32 %v5670_v63, %v5169_v23  ;;  %v5708_v31 = vadd.f32 %v5707_v40, %v5701_v6  ;;  %v10146_v23 = vld [vmem:[#allocation6 + $0x100] sm:$0xff]   ;;  %9530 = vmatprep.subr.bf16.mxu0 %v10154_v47 }
 0x783   : > { %v5705_v18 = vmul.f32 %v11961_v17, %v11961_v17  ;;  %9452 = vmatprep.subr.bf16.mxu1 %v10146_v23 }
 0x784   : > { %v5703_v56 = vmul.f32 %v11966_v41, %v11966_v41  ;;  %v5685_v45 = vadd.f32 %v5684_v7, %v11966_v41  ;;  %v5709_v25 = vadd.f32 %v5708_v31, %v5702_v12  ;;  %9453 = vmatpush3.bf16.msra.mxu1 %v10146_v23 }
 0x785   : > { %9454 = vmatprep.subr.bf16.mxu1 %v10147_v42  ;;  %9531 = vmatpush3.bf16.msra.mxu0 %v10154_v47 }
 0x786   : > { %v5686_v51 = vadd.f32 %v5685_v45, %v11954_v24  ;;  %v5710_v16 = vadd.f32 %v5709_v25, %v5703_v56  ;;  %9532 = vmatprep.subr.bf16.mxu0 %v10156_v20 }
 0x788   : > { %v5687_v15 = vadd.f32 %v5686_v51, %v11961_v17  ;;  %v5711_v44 = vadd.f32 %v5710_v16, %v5704_v34  ;;  %9455 = vmatpush3.bf16.msra.mxu1 %v10147_v42 }
 0x789   : > { %9456 = vmatprep.subr.bf16.mxu1 %v10149_v28  ;;  %9533 = vmatpush3.bf16.msra.mxu0 %v10156_v20  ;;  %v8254_v20 = vld [vmem:[%s12368_s8] ss:$0 sm:$0xff] }
 0x78a   : > { %5688 = vadd.xlane.f32.xlu1 %v5687_v15  ;;  %v5712_v48 = vadd.f32 %v5711_v44, %v5705_v18  ;;  %9534 = vmatprep.subr.bf16.mxu0 %v10158_v9 }
 0x78c   : > { %5713 = vadd.xlane.f32.xlu0 %v5712_v48  ;;  %9457 = vmatpush3.bf16.msra.mxu1 %v10149_v28 }
 0x78d   : > { %9458 = vmatprep.subr.bf16.mxu1 %v10151_v59  ;;  %9535 = vmatpush3.bf16.msra.mxu0 %v10158_v9 }
 0x78e   : > { %9536 = vmatprep.subr.bf16.mxu0 %v10160_v36 }
 0x790   : > { %9459 = vmatpush3.bf16.msra.mxu1 %v10151_v59 }
 0x791   : > { %9460 = vmatprep.subr.bf16.mxu1 %v10153_v21  ;;  %9537 = vmatpush3.bf16.msra.mxu0 %v10160_v36 }
 0x792   : > { %9538 = vmatprep.subr.bf16.mxu0 %v10162_v50 }
 0x794   : > { %9461 = vmatpush3.bf16.msra.mxu1 %v10153_v21 }
 0x795   : > { %9462 = vmatprep.subr.bf16.mxu1 %v10155_v54  ;;  %9539 = vmatpush3.bf16.msra.mxu0 %v10162_v50 }
 0x796   : > { %9548 = vmatprep.subr.bf16.mxu0 %v11980_v29 }
 0x798   : > { %9463 = vmatpush3.bf16.msra.mxu1 %v10155_v54 }
 0x799   : > { %9464 = vmatprep.subr.bf16.mxu1 %v10157_v52 }
 0x79c   : > { %9465 = vmatpush3.bf16.msra.mxu1 %v10157_v52 }
 0x79d   : > { %9466 = vmatprep.subr.bf16.mxu1 %v10159_v58 }
 0x7a0   : > { %9467 = vmatpush3.bf16.msra.mxu1 %v10159_v58 }
 0x7a1   : > { %9476 = vmatprep.subr.bf16.mxu1 %v11977_v55 }
 0x817   : > { %v5689_v1 = vpop.xlane.xlu1 %5688 }
 0x818   : > { %v5690_v11 = vrot.slane %v5689_v1, 4 }
 0x819   : > { %v5714_v6 = vpop.xlane.xlu0 %5713 }
 0x81a   : > { %v5691_v62 = vadd.f32 %v5690_v11, %v5689_v1  ;;  %v5715_v4 = vrot.slane %v5714_v6, 4 }
 0x81c   : > { %v5692_v40 = vrot.slane %v5691_v62, 2  ;;  %v5716_v30 = vadd.f32 %v5715_v4, %v5714_v6 }
 0x81e   : > { %v5717_v63 = vrot.slane %v5716_v30, 2  ;;  %v5693_v7 = vadd.f32 %v5692_v40, %v5691_v62 }
 0x820   : > { %v5694_v12 = vrot.slane %v5693_v7, 1  ;;  %v5718_v31 = vadd.f32 %v5717_v63, %v5716_v30 }
 0x822   : > { %v5695_v56 = vadd.f32 %v5694_v12, %v5693_v7  ;;  %v5719_v45 = vrot.slane %v5718_v31, 1 }
 0x824   : > { %9868 = vpush %v5695_v56  ;;  %v5720_v25 = vadd.f32 %v5719_v45, %v5718_v31 }
 0x826   : > { %9870 = vpush %v5720_v25 }
 0x855   : > { %s9869_s17 = spop %9868 }
 0x856   : > { %v5697_v51 = vstv %s9869_s17 }
 0x857   : > { %v5723_v34 = vmul.f32 0.001953125, %v5697_v51  ;;  %s9871_s30 = spop %9870 }
 0x858   : > { %v5722_v16 = vstv %s9871_s30  ;;  %s7751_s30 = sshll.u32 %s12394_s22, 1 }
 0x859   : > { %v5724_v15 = vmul.f32 0.001953125, %v5722_v16  ;;  %v5725_v18 = vmul.f32 %v5723_v34, %v5723_v34  ;;  %v5727_v23 = vsub.f32 %v11934_v46, %v5723_v34  ;;  %v5728_v42 = vsub.f32 %v11939_v10, %v5723_v34  ;;  %s563_s20 = scalar_lea.vmem %s12373_s13, %s7751_s30 }
 0x85a   : > { %v5729_v26 = vsub.f32 %v11931_v8, %v5723_v34  ;;  %v5730_v49 = vsub.f32 %v11937_v61, %v5723_v34  ;;  %v5731_v60 = vsub.f32 %v11957_v57, %v5723_v34  ;;  %v5732_v59 = vsub.f32 %v11966_v41, %v5723_v34  ;;  %v8255_v8 = vld [vmem:[%s12369_s9] ss:$0 sm:$0xff] }
 0x85b   : > { %v5726_v44 = vsub.f32 %v5724_v15, %v5725_v18  ;;  %v5733_v47 = vsub.f32 %v11954_v24, %v5723_v34  ;;  %v5734_v21 = vsub.f32 %v11961_v17, %v5723_v34 }
 0x85d   : > { %v5735_v48 = vadd.f32 1e-05, %v5726_v44 }
 0x85f   : > { %10270 = vrsqrt.f32 %v5735_v48 }
 0x869   : > { %v10271_v28 = vpop.eup %10270 }
 0x86a   : > { %v5737_v46 = vmul.f32 %v10271_v28, %v5727_v23  ;;  %v5738_v54 = vmul.f32 %v10271_v28, %v5728_v42  ;;  %v5739_v10 = vmul.f32 %v10271_v28, %v5729_v26  ;;  %v5740_v9 = vmul.f32 %v10271_v28, %v5730_v49 }
 0x86b   : > { %v5741_v61 = vmul.f32 %v10271_v28, %v5731_v60  ;;  %v5742_v57 = vmul.f32 %v10271_v28, %v5732_v59  ;;  %v5743_v52 = vmul.f32 %v10271_v28, %v5733_v47  ;;  %v5744_v41 = vmul.f32 %v10271_v28, %v5734_v21 }
 0x86c   : > { %v5752_v36 = vmul.f32 %v8254_v20, %v5737_v46  ;;  %v5753_v24 = vmul.f32 %v8254_v20, %v5738_v54  ;;  %v5754_v58 = vmul.f32 %v8254_v20, %v5739_v10  ;;  %v5755_v17 = vmul.f32 %v8254_v20, %v5740_v9 }
 0x86d   : > { %v5756_v50 = vmul.f32 %v8254_v20, %v5741_v61  ;;  %v5757_v1 = vmul.f32 %v8254_v20, %v5742_v57  ;;  %v5758_v11 = vmul.f32 %v8254_v20, %v5743_v52  ;;  %v5759_v6 = vmul.f32 %v8254_v20, %v5744_v41 }
 0x86e   : > { %v5767_v62 = vadd.f32 %v8255_v8, %v5752_v36  ;;  %v5768_v4 = vadd.f32 %v8255_v8, %v5753_v24  ;;  %v11997_v40 = vadd.f32 %v8255_v8, %v5754_v58  ;;  %v11999_v30 = vadd.f32 %v8255_v8, %v5755_v17 }
 0x86f   : > { %v12001_v63 = vadd.f32 %v8255_v8, %v5756_v50  ;;  %v12003_v7 = vadd.f32 %v8255_v8, %v5757_v1  ;;  %v12007_v34 = vadd.f32 %v8255_v8, %v5758_v11  ;;  %v12009_v16 = vadd.f32 %v8255_v8, %v5759_v6 }
 0x870   : > { %v5783_v12 = vmul.f32 0.044715, %v5767_v62  ;;  %v5784_v31 = vmul.f32 0.044715, %v5768_v4  ;;  %v5785_v56 = vmul.f32 0.044715, %v11997_v40 }
 0x871   : > { %v5786_v45 = vmul.f32 0.044715, %v11999_v30  ;;  %v5787_v44 = vmul.f32 0.044715, %v12001_v63  ;;  %v5788_v48 = vmul.f32 0.044715, %v12003_v7 }
 0x872   : > { %v5791_v25 = vmul.f32 %v5783_v12, %v5767_v62  ;;  %v5792_v51 = vmul.f32 %v5784_v31, %v5768_v4  ;;  %v5793_v15 = vmul.f32 %v5785_v56, %v11997_v40  ;;  %v5789_v21 = vmul.f32 0.044715, %v12007_v34 }
 0x873   : > { %v5794_v18 = vmul.f32 %v5786_v45, %v11999_v30  ;;  %v5795_v28 = vmul.f32 %v5787_v44, %v12001_v63  ;;  %v5796_v60 = vmul.f32 %v5788_v48, %v12003_v7  ;;  %v5790_v20 = vmul.f32 0.044715, %v12009_v16 }
 0x874   : > { %v5799_v23 = vmul.f32 %v5791_v25, %v5767_v62  ;;  %v5800_v42 = vmul.f32 %v5792_v51, %v5768_v4  ;;  %v5801_v26 = vmul.f32 %v5793_v15, %v11997_v40  ;;  %v5797_v57 = vmul.f32 %v5789_v21, %v12007_v34  ;;  %v6317_v21 = vld [vmem:[#allocation2] sm:$0x80] }
 0x875   : > { %v5802_v49 = vmul.f32 %v5794_v18, %v11999_v30  ;;  %v5803_v10 = vmul.f32 %v5795_v28, %v12001_v63  ;;  %v5804_v9 = vmul.f32 %v5796_v60, %v12003_v7  ;;  %v5798_v52 = vmul.f32 %v5790_v20, %v12009_v16 }
 0x876   : > { %v5807_v59 = vadd.f32 %v5799_v23, %v5767_v62  ;;  %v5808_v47 = vadd.f32 %v5800_v42, %v5768_v4  ;;  %v5809_v46 = vadd.f32 %v5801_v26, %v11997_v40  ;;  %v5805_v17 = vmul.f32 %v5797_v57, %v12007_v34 }
 0x877   : > { %v5810_v54 = vadd.f32 %v5802_v49, %v11999_v30  ;;  %v5811_v24 = vadd.f32 %v5803_v10, %v12001_v63  ;;  %v5812_v58 = vadd.f32 %v5804_v9, %v12003_v7  ;;  %v5806_v50 = vmul.f32 %v5798_v52, %v12009_v16 }
 0x878   : > { %v5815_v8 = vmul.f32 0.7978846, %v5807_v59  ;;  %v5816_v61 = vmul.f32 0.7978846, %v5808_v47  ;;  %v5817_v41 = vmul.f32 0.7978846, %v5809_v46  ;;  %v5813_v6 = vadd.f32 %v5805_v17, %v12007_v34 }
 0x879   : > { %v5818_v36 = vmul.f32 0.7978846, %v5810_v54  ;;  %v5819_v1 = vmul.f32 0.7978846, %v5811_v24  ;;  %v5820_v11 = vmul.f32 0.7978846, %v5812_v58  ;;  %v5814_v12 = vadd.f32 %v5806_v50, %v12009_v16 }
 0x87a   : > { %10272 = vtanh.f32 %v5815_v8  ;;  %v5821_v31 = vmul.f32 0.7978846, %v5813_v6  ;;  %v5775_v51 = vmul.f32 0.5, %v5767_v62  ;;  %v5776_v44 = vmul.f32 0.5, %v5768_v4  ;;  %v10163_v58 = vld [vmem:[#allocation6 + $0x48] sm:$0xff]  }
 0x87b   : > { %10274 = vtanh.f32 %v5816_v61  ;;  %v5822_v56 = vmul.f32 0.7978846, %v5814_v12  ;;  %v5777_v26 = vmul.f32 0.5, %v11997_v40  ;;  %v5778_v59 = vmul.f32 0.5, %v11999_v30 }
 0x87c   : > { %10276 = vtanh.f32 %v5817_v41  ;;  %v5779_v54 = vmul.f32 0.5, %v12001_v63  ;;  %v5780_v8 = vmul.f32 0.5, %v12003_v7  ;;  %v6336_v52 = vshrl.u32 %v6317_v21, 16 }
 0x87d   : > { %10278 = vtanh.f32 %v5818_v36  ;;  %v5781_v41 = vmul.f32 0.5, %v12007_v34  ;;  %v5782_v7 = vmul.f32 0.5, %v12009_v16 }
 0x87e   : > { %10280 = vtanh.f32 %v5819_v1  ;;  %v6300_v1 = vld [vmem:[#allocation2] sm:$0xf8]  ;;  %v6338_v12 = vrot.slane %v6336_v52, 7 }
 0x87f   : > { %10282 = vtanh.f32 %v5820_v11  ;;  %v10168_v52 = vld [vmem:[#allocation6 + $0x10] sm:$0xff]  }
 0x880   : > { %10284 = vtanh.f32 %v5821_v31  ;;  %v10165_v31 = vld [vmem:[#allocation6 + $0x50] sm:$0xff]  }
 0x881   : > { %10286 = vtanh.f32 %v5822_v56 }
 0x884   : > { %v10273_v45 = vpop.eup %10272 }
 0x885   : > { %v10275_v25 = vpop.eup %10274  ;;  %v5831_v15 = vadd.f32 1.0, %v10273_v45 }
 0x886   : > { %v10277_v18 = vpop.eup %10276  ;;  %v5832_v48 = vadd.f32 1.0, %v10275_v25 }
 0x887   : > { %v10279_v23 = vpop.eup %10278  ;;  %v5839_v42 = vmul.f32 %v5831_v15, %v5775_v51  ;;  %v5833_v49 = vadd.f32 1.0, %v10277_v18  ;;  %v5855_v15 = vld [vmem:[#allocation2] sm:$0xf0] }
 0x888   : > { %v10281_v28 = vpop.eup %10280  ;;  %v5840_v60 = vmul.f32 %v5832_v48, %v5776_v44  ;;  %v5834_v47 = vadd.f32 1.0, %v10279_v23  ;;  %v6492_v48 = vshll.u32 %v6300_v1, 16 }
 0x889   : > { %v10283_v20 = vpop.eup %10282  ;;  %v5841_v46 = vmul.f32 %v5833_v49, %v5777_v26  ;;  %v5835_v62 = vadd.f32 1.0, %v10281_v28 }
 0x88a   : > { %v10285_v10 = vpop.eup %10284  ;;  %v12036_v9 = vpack.c.bf16 %v5840_v60, %v5839_v42  ;;  %v5842_v4 = vmul.f32 %v5834_v47, %v5778_v59  ;;  %v5836_v61 = vadd.f32 1.0, %v10283_v20  ;;  %v6013_v60 = vrot.slane %v5855_v15, 4  ;;  %v10166_v20 = vld [vmem:[#allocation6 + $0x8] sm:$0xff]  }
 0x88b   : > { %v10287_v40 = vpop.eup %10286  ;;  %v5843_v57 = vmul.f32 %v5835_v62, %v5779_v54  ;;  %v5837_v30 = vadd.f32 1.0, %v10285_v10  ;;  %v10167_v62 = vld [vmem:[#allocation6 + $0x58] sm:$0xff]   ;;  %v6494_v10 = vrot.slane %v6492_v48, 4 }
 0x88c   : > { %5851 = vst [vmem:[#allocation2 + $0x8] sm:$0xff] %v12036_v9  ;;  %9468 = vmatprep.mubr.bf16.mxu1 %v12036_v9  ;;  %v12043_v63 = vshrl.u32 %v12036_v9, 16  ;;  %v12045_v36 = vpack.c.bf16 %v5842_v4, %v5841_v46  ;;  %v5844_v24 = vmul.f32 %v5836_v61, %v5780_v8  ;;  %v5838_v17 = vadd.f32 1.0, %v10287_v40 }
 0x88d   : > { %v5845_v50 = vmul.f32 %v5837_v30, %v5781_v41  ;;  %v12056_v6 = vshll.u32 %v12036_v9, 16  ;;  %v6014_v59 = vrot.slane %v12036_v9, 4  ;;  %v7013_v41 = vshrl.u32 %v5855_v15, 16 }
 0x88e   : > { %5852 = vst [vmem:[#allocation2 + $0x10] sm:$0xff] %v12045_v36  ;;  %9469 = vmatmul.mubr.bf16.vlgmr.msra.gmra.mrb[32].mxu1 %v12045_v36  ;;  %v12051_v34 = vshrl.u32 %v12045_v36, 16  ;;  %v12053_v11 = vpack.c.bf16 %v5844_v24, %v5843_v57  ;;  %v6342_v16 = vrot.slane %v12043_v63, 7  ;;  %v5846_v56 = vmul.f32 %v5838_v17, %v5782_v7 }
 0x88f   : > { %9477 = vmatpush3.bf16.msra.mxu1 %v11977_v55  ;;  %v12061_v45 = vshll.u32 %v12045_v36, 16  ;;  %v6489_v55 = vshrl.u32 %v6300_v1, 16  ;;  %v6496_v4 = vrot.slane %v12043_v63, 3  ;;  %v6497_v8 = vrot.slane %v12056_v6, 4  ;;  %v10170_v1 = vld [vmem:[#allocation6 + $0x18] sm:$0xff]  }
 0x890   : > { %5853 = vst [vmem:[#allocation2 + $0x18] sm:$0xff] %v12053_v11  ;;  %9472 = vmatprep.mubr.bf16.mxu1 %v12053_v11  ;;  %v12066_v25 = vshrl.u32 %v12053_v11, 16  ;;  %9478 = vmatprep.subr.bf16.mxu1 %v10163_v58  ;;  %v6350_v51 = vrot.slane %v12051_v34, 7  ;;  %v6345_v18 = vor.u32 %v12056_v6, %v6342_v16  ;;  %v12070_v44 = vpack.c.bf16 %v5846_v56, %v5845_v50 }
 0x891   : > { %v12073_v23 = vshll.u32 %v12053_v11, 16  ;;  %v6491_v46 = vrot.slane %v6489_v55, 3  ;;  %v6015_v57 = vsel %vm993_vm2, %v6013_v60, %v6014_v59  ;;  %v7016_v30 = vshll.u32 %v5855_v15, 16 }
 0x892   : > { %v6353_v42 = vor.u32 %v12061_v45, %v6350_v51  ;;  %v6358_v26 = vrot.slane %v12066_v25, 7  ;;  %v6346_v49 = vsel %vm1316_vm1, %v6338_v12, %v6345_v18  ;;  %5854 = vst [vmem:[#allocation2 + $0x20] sm:$0xff] %v12070_v44  ;;  %v12080_v28 = vshrl.u32 %v12070_v44, 16 }
 0x893   : > { %9479 = vmatpush3.bf16.msra.mxu1 %v10163_v58  ;;  %9540 = vmatprep.mubr.bf16.mxu0 %v6346_v49  ;;  %v12091_v61 = vshll.u32 %v12070_v44, 16  ;;  %v6495_v58 = vor.u32 %v6494_v10, %v6491_v46  ;;  %v12098_v7 = vor.u32 %v6497_v8, %v6496_v4  ;;  %v6879_v17 = vrot.slane %v12056_v6, 1  ;;  %v10173_v46 = vld [vmem:[#allocation6 + $0x70] sm:$0xff]  }
 0x894   : > { %9480 = vmatprep.subr.bf16.mxu1 %v10165_v31  ;;  %v6354_v47 = vsel %vm1316_vm1, %v6342_v16, %v6353_v42  ;;  %v6361_v21 = vor.u32 %v12073_v23, %v6358_v26  ;;  %v6366_v54 = vrot.slane %v12080_v28, 7  ;;  %v6881_v50 = vrot.slane %v12061_v45, 1 }
 0x895   : > { %9541 = vmatmul.mubr.bf16.vlgmr.msra.gmra.mrb[40].mxu0 %v6354_v47  ;;  %v6884_v12 = vrot.slane %v12073_v23, 1  ;;  %v7015_v16 = vrot.slane %v7013_v41, 4  ;;  %v6880_v15 = vor.u32 %v6879_v17, %v12043_v63  ;;  %v6499_v18 = vsel %vm1470_vm3, %v6495_v58, %v12098_v7  ;;  %v10175_v58 = vld [vmem:[#allocation6 + $0x78] sm:$0xff]  }
 0x896   : > { %9549 = vmatpush3.bf16.msra.mxu0 %v11980_v29  ;;  %9473 = vmatmul.mubr.bf16.gmra.mrb[36].mxu1 %v12070_v44  ;;  %v6362_v40 = vsel %vm1316_vm1, %v6350_v51, %v6361_v21  ;;  %v6369_v24 = vor.u32 %v12091_v61, %v6366_v54  ;;  %v10169_v29 = vld [vmem:[#allocation6 + $0x60] sm:$0xff]   ;;  %v10171_v51 = vld [vmem:[#allocation6 + $0x68] sm:$0xff]   ;;  %v6883_v55 = vor.u32 %v6881_v50, %v12051_v34  ;;  %v6887_v49 = vrot.slane %v12091_v61, 1  ;;  %v12118_v54 = vld [vmem:[#allocation2 + $0x8] sm:$0xf0] }
 0x897   : > { %9481 = vmatpush3.bf16.msra.mxu1 %v10165_v31  ;;  %9544 = vmatprep.mubr.bf16.mxu0 %v6362_v40  ;;  %v7018_v31 = vrot.slane %v7016_v30, 5  ;;  %v6886_v48 = vor.u32 %v6884_v12, %v12066_v25  ;;  %v12110_v42 = vsel %vm1857_vm4, %v6880_v15, %v6881_v50  ;;  %v7020_v21 = vrot.slane %v12043_v63, 4 }
 0x898   : > { %9492 = vmatprep.mubr.bf16.mxu1 %v6015_v57  ;;  %9550 = vmatprep.subr.bf16.mxu0 %v10166_v20  ;;  %v6370_v56 = vsel %vm1316_vm1, %v6358_v26, %v6369_v24  ;;  %v10172_v26 = vld [vmem:[#allocation6 + $0x20] sm:$0xff]   ;;  %v12114_v60 = vsel %vm1857_vm4, %v6883_v55, %v6884_v12  ;;  %v12124_v10 = vor.u32 %v6887_v49, %v12080_v28  ;;  %v7024_v4 = vrot.slane %v12051_v34, 4 }
 0x899   : > { %9482 = vmatprep.subr.bf16.mxu1 %v10167_v62  ;;  %v7019_v47 = vor.u32 %v7018_v31, %v7015_v16  ;;  %v7025_v8 = vrot.slane %v12061_v45, 5  ;;  %v7028_v57 = vrot.slane %v12066_v25, 4  ;;  %v7029_v63 = vrot.slane %v12073_v23, 5  ;;  %v10177_v55 = vld [vmem:[#allocation6 + $0x1c0] sm:$0xff]  }
 0x89a   : > { %9551 = vmatpush3.bf16.msra.mxu0 %v10166_v20  ;;  %v7021_v20 = vrot.slane %v12056_v6, 5  ;;  %v7177_v24 = vshrl.u32 %v12118_v54, 16  ;;  %v7192_v50 = vrot.slane %v12080_v28, 4  ;;  %v7193_v31 = vrot.slane %v12091_v61, 5 }
 0x89b   : > { %9483 = vmatpush3.bf16.msra.mxu1 %v10167_v62  ;;  %9552 = vmatprep.subr.bf16.mxu0 %v10168_v52  ;;  %v12121_v62 = vsel %vm1857_vm4, %v6886_v48, %v6887_v49  ;;  %v7026_v6 = vor.u32 %v7025_v8, %v7024_v4  ;;  %v12133_v30 = vor.u32 %v7029_v63, %v7028_v57  ;;  %v5859_v4 = vld [vmem:[#allocation2 + $0x20] sm:$0xf]  ;;  %v6504_v8 = vrot.slane %v12066_v25, 3  ;;  %v6634_v57 = vld [vmem:[#allocation2 + $0x8] sm:$0xf8] }
 0x89c   : > { %9484 = vmatprep.subr.bf16.mxu1 %v10169_v29  ;;  %v7022_v40 = vor.u32 %v7021_v20, %v7020_v21  ;;  %v7179_v12 = vrot.slane %v7177_v24, 4  ;;  %v12146_v15 = vor.u32 %v7193_v31, %v7192_v50  ;;  %v10179_v21 = vld [vmem:[#allocation6 + $0x1c8] sm:$0xff]   ;;  %v6500_v20 = vrot.slane %v12051_v34, 3  ;;  %v10180_v34 = vld [vmem:[#allocation6 + $0x180] sm:$0xff]  }
 0x89d   : > { %9545 = vmatmul.mubr.bf16.gmra.mrb[44].mxu0 %v6370_v56  ;;  %v10176_v56 = vld [vmem:[#allocation6 + $0x30] sm:$0xff]   ;;  %v6512_v63 = vshll.u32 %v5859_v4, 16  ;;  %v6020_v25 = vrot.slane %v5859_v4, 4  ;;  %v6166_v24 = vrot.slane %v12118_v54, 4  ;;  %vm7642_vm1 = vcmask 64512  }
 0x89e   : > { %9553 = vmatpush3.bf16.msra.mxu0 %v10168_v52  ;;  %9564 = vmatprep.mubr.bf16.mxu0 %v6499_v18  ;;  %v10174_v52 = vld [vmem:[#allocation6 + $0x28] sm:$0xff]   ;;  %v12131_v41 = vsel %vm1996_vm5, %v7019_v47, %v7022_v40  ;;  %v12138_v17 = vsel %vm1996_vm5, %v7022_v40, %v7026_v6  ;;  %v6016_v18 = vrot.slane %v12045_v36, 4  ;;  %v12155_v49 = vsel %vm1996_vm5, %v12133_v30, %v12146_v15  ;;  %v10178_v47 = vld [vmem:[#allocation6 + $0x38] sm:$0xff]  }
 0x89f   : > { %9485 = vmatpush3.bf16.msra.mxu1 %v10169_v29  ;;  %9554 = vmatprep.subr.bf16.mxu0 %v10170_v1  ;;  %v7180_v29 = vshll.u32 %v12118_v54, 16  ;;  %v6501_v36 = vrot.slane %v12061_v45, 4  ;;  %v6505_v40 = vrot.slane %v12073_v23, 4  ;;  %v10181_v45 = vld [vmem:[#allocation6 + $0x1d0] sm:$0xff]   ;;  %v6653_v23 = vshrl.u32 %v6634_v57, 16 }
 0x8a0   : > { %9486 = vmatprep.subr.bf16.mxu1 %v10171_v51 }
 0x8a1   : > { %v7182_v16 = vrot.slane %v7180_v29, 5  ;;  %v6502_v9 = vor.u32 %v6501_v36, %v6500_v20 }
 0x8a2   : > { %9555 = vmatpush3.bf16.msra.mxu0 %v10170_v1  ;;  %v12143_v1 = vsel %vm1996_vm5, %v7026_v6, %v12133_v30 }
 0x8a3   : > { %9487 = vmatpush3.bf16.msra.mxu1 %v10171_v51  ;;  %9556 = vmatprep.subr.bf16.mxu0 %v10172_v26  ;;  %v7183_v51 = vor.u32 %v7182_v16, %v7179_v12  ;;  %v6503_v29 = vsel %vm1470_vm3, %v12098_v7, %v6502_v9  ;;  %v6514_v12 = vrot.slane %v6512_v63, 4  ;;  %v6168_v7 = vsel %vm993_vm2, %v6166_v24, %v6016_v18  ;;  %v10194_v63 = vld [vmem:[#allocation6 + $0x1b8] sm:$0xff]  }
 0x8a4   : > { %9488 = vmatprep.subr.bf16.mxu1 %v10173_v46  ;;  %v6681_v24 = vrot.slane %v12080_v28, 3 }
 0x8a5   : > { %v12150_v48 = vsel %vm1996_vm5, %v7183_v51, %v7026_v6  ;;  %v12172_v6 = vor.u32 %v6505_v40, %v6504_v8  ;;  %v6655_v51 = vrot.slane %v6653_v23, 3  ;;  %v10189_v40 = vld [vmem:[#allocation6 + $0x1f0] sm:$0xff]  }
 0x8a6   : > { %9557 = vmatpush3.bf16.msra.mxu0 %v10172_v26  ;;  %v12158_v26 = vrot.slane %v12053_v11, 4 }
 0x8a7   : > { %9489 = vmatpush3.bf16.msra.mxu1 %v10173_v46  ;;  %9558 = vmatprep.subr.bf16.mxu0 %v10174_v52  ;;  %v6017_v46 = vsel %vm993_vm2, %v6014_v59, %v6016_v18  ;;  %v6509_v59 = vshrl.u32 %v5859_v4, 16  ;;  %v12181_v31 = vsel %vm1470_vm3, %v6502_v9, %v12172_v6  ;;  %v10187_v4 = vld [vmem:[#allocation6 + $0x1e8] sm:$0xff]  }
 0x8a8   : > { %9490 = vmatprep.subr.bf16.mxu1 %v10175_v58  ;;  %v12169_v11 = vsel %vm993_vm2, %v6016_v18, %v12158_v26  ;;  %v6021_v16 = vsel %vm993_vm2, %v12158_v26, %v6020_v25  ;;  %v10188_v18 = vld [vmem:[#allocation6 + $0x1a0] sm:$0xff]   ;;  %v10195_v25 = vld [vmem:[#allocation6 + $0x148] sm:$0xff]  }
 0x8a9   : > { %v6511_v50 = vrot.slane %v6509_v59, 3  ;;  %v10193_v59 = vld [vmem:[#allocation6 + $0x140] sm:$0xff]  }
 0x8aa   : > { %9559 = vmatpush3.bf16.msra.mxu0 %v10174_v52  ;;  %v6656_v52 = vshll.u32 %v6634_v57, 16  ;;  %v10190_v57 = vld [vmem:[#allocation6 + $0x1a8] sm:$0xff]  }
 0x8ab   : > { %9491 = vmatpush3.bf16.msra.mxu1 %v10175_v58  ;;  %9560 = vmatprep.subr.bf16.mxu0 %v10176_v56  ;;  %v10182_v58 = vld [vmem:[#allocation6 + $0x188] sm:$0xff]   ;;  %v6515_v54 = vor.u32 %v6514_v12, %v6511_v50 }
 0x8ac   : > { %9500 = vmatprep.subr.bf16.mxu1 %v10177_v55 }
 0x8ad   : > { %v6516_v36 = vsel %vm1470_vm3, %v12172_v6, %v6515_v54  ;;  %v10199_v54 = vld [vmem:[#allocation6 + $0x168] sm:$0xff]  }
 0x8ae   : > { %9493 = vmatmul.mubr.bf16.vlgmr.msra.gmra.mrb[32].mxu1 %v6017_v46  ;;  %9561 = vmatpush3.bf16.msra.mxu0 %v10176_v56  ;;  %v10183_v56 = vld [vmem:[#allocation6 + $0x1d8] sm:$0xff]  }
 0x8af   : > { %9496 = vmatprep.mubr.bf16.mxu1 %v12169_v11  ;;  %9501 = vmatpush3.bf16.msra.mxu1 %v10177_v55  ;;  %v6658_v55 = vrot.slane %v6656_v52, 4  ;;  %v10186_v46 = vld [vmem:[#allocation6 + $0x198] sm:$0xff]  }
 0x8b0   : > { %9562 = vmatprep.subr.bf16.mxu0 %v10178_v47  ;;  %9502 = vmatprep.subr.bf16.mxu1 %v10179_v21  ;;  %v6143_v52 = vld [vmem:[#allocation2 + $0x28] sm:$0xf] }
 0x8b1   : > { %v6659_v20 = vor.u32 %v6658_v55, %v6655_v51  ;;  %v6688_v50 = vshrl.u32 %v6143_v52, 16  ;;  %v6691_v12 = vshll.u32 %v6143_v52, 16  ;;  %v10198_v55 = vld [vmem:[#allocation6 + $0x160] sm:$0xff]  }
 0x8b2   : > { %9563 = vmatpush3.bf16.msra.mxu0 %v10178_v47  ;;  %v10184_v47 = vld [vmem:[#allocation6 + $0x190] sm:$0xff]  }
 0x8b3   : > { %9503 = vmatpush3.bf16.msra.mxu1 %v10179_v21  ;;  %9572 = vmatprep.subr.bf16.mxu0 %v10180_v34  ;;  %v10185_v21 = vld [vmem:[#allocation6 + $0x1e0] sm:$0xff]   ;;  %v6668_v8 = vsel %vm1470_vm3, %v6659_v20, %v6502_v9  ;;  %v6171_v9 = vrot.slane %v12070_v44, 4  ;;  %v6173_v44 = vrot.slane %v6143_v52, 4  ;;  %v6693_v28 = vrot.slane %v6691_v12, 4 }
 0x8b4   : > { %9504 = vmatprep.subr.bf16.mxu1 %v10181_v45 }
 0x8b5   : > { %9565 = vmatmul.mubr.bf16.vlgmr.msra.gmra.mrb[40].mxu0 %v6503_v29  ;;  %v6172_v23 = vsel %vm993_vm2, %v12158_v26, %v6171_v9  ;;  %v6684_v29 = vrot.slane %v12091_v61, 4  ;;  %v10197_v26 = vld [vmem:[#allocation6 + $0x158] sm:$0xff]  }
 0x8b6   : > { %9497 = vmatmul.mubr.bf16.gmra.mrb[36].mxu1 %v6021_v16  ;;  %9568 = vmatprep.mubr.bf16.mxu0 %v12181_v31 }
 0x8b7   : > { %9573 = vmatpush3.bf16.msra.mxu0 %v10180_v34  ;;  %9505 = vmatpush3.bf16.msra.mxu1 %v10181_v45  ;;  %v10191_v34 = vld [vmem:[#allocation6 + $0x1f8] sm:$0xff]   ;;  %v10192_v45 = vld [vmem:[#allocation6 + $0x1b0] sm:$0xff]   ;;  %v6685_v16 = vor.u32 %v6684_v29, %v6681_v24  ;;  %v10214_v24 = vld [vmem:[#allocation6 + $0x220] sm:$0xff]  }
 0x8b8   : > { %9516 = vmatprep.mubr.bf16.mxu1 %v6168_v7  ;;  %9574 = vmatprep.subr.bf16.mxu0 %v10182_v58  ;;  %v10216_v29 = vld [vmem:[#allocation6 + $0x230] sm:$0xff]  }
 0x8b9   : > { %9506 = vmatprep.subr.bf16.mxu1 %v10183_v56  ;;  %v6686_v61 = vsel %vm1470_vm3, %v12172_v6, %v6685_v16  ;;  %v10202_v6 = vld [vmem:[#allocation6 + $0x80] sm:$0xff]  }
 0x8bb   : > { %9575 = vmatpush3.bf16.msra.mxu0 %v10182_v58  ;;  %9507 = vmatpush3.bf16.msra.mxu1 %v10183_v56  ;;  %v10196_v58 = vld [vmem:[#allocation6 + $0x150] sm:$0xff]   ;;  %v6690_v56 = vrot.slane %v6688_v50, 3 }
 0x8bc   : > { %9576 = vmatprep.subr.bf16.mxu0 %v10184_v47  ;;  %9508 = vmatprep.subr.bf16.mxu1 %v10185_v21 }
 0x8bd   : > { %9569 = vmatmul.mubr.bf16.gmra.mrb[44].mxu0 %v6516_v36  ;;  %v6694_v51 = vor.u32 %v6693_v28, %v6690_v56  ;;  %v10204_v36 = vld [vmem:[#allocation6 + $0x90] sm:$0xff]   ;;  %v10223_v28 = vld [vmem:[%s12374_s14 + $0x10] sm:$0xff]  }
 0x8be   : > { %9588 = vmatprep.mubr.bf16.mxu0 %v6668_v8  ;;  %v10219_v56 = vld [vmem:[%s12374_s14] sm:$0xff]  }
 0x8bf   : > { %9577 = vmatpush3.bf16.msra.mxu0 %v10184_v47  ;;  %9509 = vmatpush3.bf16.msra.mxu1 %v10185_v21  ;;  %v6695_v7 = vsel %vm1470_vm3, %v6685_v16, %v6694_v51  ;;  %v10201_v47 = vld [vmem:[#allocation6 + $0x178] sm:$0xff]   ;;  %v10203_v21 = vld [vmem:[#allocation6 + $0x88] sm:$0xff]  }
 0x8c0   : > { %9578 = vmatprep.subr.bf16.mxu0 %v10186_v46  ;;  %9510 = vmatprep.subr.bf16.mxu1 %v10187_v4  ;;  %v10224_v51 = vld [vmem:[%s12374_s14 + $0x58] sm:$0xff]  }
 0x8c3   : > { %9579 = vmatpush3.bf16.msra.mxu0 %v10186_v46  ;;  %9511 = vmatpush3.bf16.msra.mxu1 %v10187_v4  ;;  %v10205_v4 = vld [vmem:[#allocation6 + $0x98] sm:$0xff]  }
 0x8c4   : > { %9580 = vmatprep.subr.bf16.mxu0 %v10188_v18  ;;  %9512 = vmatprep.subr.bf16.mxu1 %v10189_v40 }
 0x8c7   : > { %9581 = vmatpush3.bf16.msra.mxu0 %v10188_v18  ;;  %9513 = vmatpush3.bf16.msra.mxu1 %v10189_v40  ;;  %v10206_v18 = vld [vmem:[#allocation6 + $0xa0] sm:$0xff]   ;;  %v10209_v40 = vld [vmem:[#allocation6 + $0xb8] sm:$0xff]  }
 0x8c8   : > { %9582 = vmatprep.subr.bf16.mxu0 %v10190_v57  ;;  %9514 = vmatprep.subr.bf16.mxu1 %v10191_v34 }
 0x8cb   : > { %9583 = vmatpush3.bf16.msra.mxu0 %v10190_v57  ;;  %9515 = vmatpush3.bf16.msra.mxu1 %v10191_v34  ;;  %v6837_v57 = vld [vmem:[#allocation2 + $0x20] sm:$0x1f]  ;;  %v10210_v34 = vld [vmem:[#allocation6 + $0x200] sm:$0xff]  }
 0x8cc   : > { %9584 = vmatprep.subr.bf16.mxu0 %v10192_v45  ;;  %9596 = vmatprep.subr.bf16.mxu1 %v10193_v59 }
 0x8ce   : > { %9517 = vmatmul.mubr.bf16.vlgmr.msra.gmra.mrb[32].mxu1 %v12169_v11  ;;  %v6174_v11 = vsel %vm993_vm2, %v6171_v9, %v6173_v44  ;;  %v10217_v44 = vld [vmem:[#allocation6 + $0x238] sm:$0xff]  }
 0x8cf   : > { %9585 = vmatpush3.bf16.msra.mxu0 %v10192_v45  ;;  %9520 = vmatprep.mubr.bf16.mxu1 %v6172_v23  ;;  %v7036_v45 = vshll.u32 %v6837_v57, 16  ;;  %v10213_v23 = vld [vmem:[#allocation6 + $0x218] sm:$0xff]  }
 0x8d0   : > { %9597 = vmatpush3.bf16.msra.mxu1 %v10193_v59  ;;  %9586 = vmatprep.subr.bf16.mxu0 %v10194_v63 }
 0x8d1   : > { %9598 = vmatprep.subr.bf16.mxu1 %v10195_v25  ;;  %v7038_v9 = vrot.slane %v7036_v45, 5 }
 0x8d3   : > { %9587 = vmatpush3.bf16.msra.mxu0 %v10194_v63  ;;  %v10212_v63 = vld [vmem:[#allocation6 + $0x210] sm:$0xff]  }
 0x8d4   : > { %9599 = vmatpush3.bf16.msra.mxu1 %v10195_v25 }
 0x8d5   : > { %9600 = vmatprep.subr.bf16.mxu1 %v10196_v58 }
 0x8d6   : > { %9589 = vmatmul.mubr.bf16.vlgmr.msra.gmra.mrb[40].mxu0 %v12181_v31  ;;  %9521 = vmatmul.mubr.bf16.gmra.mrb[36].mxu1 %v6174_v11  ;;  %v10200_v31 = vld [vmem:[#allocation6 + $0x170] sm:$0xff]  }
 0x8d7   : > { %9592 = vmatprep.mubr.bf16.mxu0 %v6686_v61  ;;  %9612 = vmatprep.mubr.bf16.mxu1 %v12110_v42  ;;  %v6856_v42 = vld [vmem:[#allocation2 + $0x28] sm:$0x1]  ;;  %v7440_v61 = vld [vmem:[%s563_s20] sm:$0x3] }
 0x8d8   : > { %9601 = vmatpush3.bf16.msra.mxu1 %v10196_v58  ;;  %v6891_v20 = vshll.u32 %v6856_v42, 16  ;;  %v7158_v58 = vld [vmem:[#allocation2 + $0x28] sm:$0x1f] }
 0x8d9   : > { %9602 = vmatprep.subr.bf16.mxu1 %v10197_v26  ;;  %v7197_v50 = vshrl.u32 %v7158_v58, 16  ;;  %v10229_v42 = vld [vmem:[%s12374_s14 + $0x28] sm:$0xff]  }
 0x8da   : > { %v6893_v46 = vrot.slane %v6891_v20, 1 }
 0x8db   : > { %v7199_v12 = vrot.slane %v7197_v50, 4 }
 0x8dc   : > { %9603 = vmatpush3.bf16.msra.mxu1 %v10197_v26  ;;  %v6894_v8 = vsel %vm1857_vm4, %v12124_v10, %v6893_v46  ;;  %v7033_v10 = vshrl.u32 %v6837_v57, 16  ;;  %v10218_v26 = vld [vmem:[%s12374_s14 + $0x40] sm:$0xff]  }
 0x8dd   : > { %9604 = vmatprep.subr.bf16.mxu1 %v10198_v55  ;;  %8782 = vmatprep.subr.bf16.mxu0 %v10218_v26 }
 0x8de   : > { %9593 = vmatmul.mubr.bf16.gmra.mrb[44].mxu0 %v6695_v7  ;;  %v7035_v59 = vrot.slane %v7033_v10, 4 }
 0x8df   : > { %8783 = vmatpush3.bf16.msra.mxu0 %v10219_v56 }
 0x8e0   : > { %9605 = vmatpush3.bf16.msra.mxu1 %v10198_v55  ;;  %v7039_v25 = vor.u32 %v7038_v9, %v7035_v59  ;;  %v7441_v55 = vsub.f32 0.0, %v7440_v61 }
 0x8e1   : > { %9606 = vmatprep.subr.bf16.mxu1 %v10199_v54 }
 0x8e2   : > { %v7040_v52 = vsel %vm1996_vm5, %v12133_v30, %v7039_v25  ;;  %v7200_v30 = vshll.u32 %v7158_v58, 16  ;;  %v7442_v7 = vmul.f32 1.442695, %v7441_v55  ;;  %v7451_v25 = vsub.s32 0, %v11040_v19 }
 0x8e4   : > { %9607 = vmatpush3.bf16.msra.mxu1 %v10199_v54  ;;  %v10225_v54 = vld [vmem:[%s12374_s14 + $0x18] sm:$0xff]   ;;  %10288 = vpow2.f32 %v7442_v7 }
 0x8e5   : > { %9608 = vmatprep.subr.bf16.mxu1 %v10200_v31 }
 0x8e8   : > { %9609 = vmatpush3.bf16.msra.mxu1 %v10200_v31  ;;  %v10226_v31 = vld [vmem:[%s12374_s14 + $0x60] sm:$0xff]  }
 0x8e9   : > { %9610 = vmatprep.subr.bf16.mxu1 %v10201_v47 }
 0x8ec   : > { %9611 = vmatpush3.bf16.msra.mxu1 %v10201_v47  ;;  %v10227_v47 = vld [vmem:[%s12374_s14 + $0x20] sm:$0xff]  }
 0x8ed   : > { %9620 = vmatprep.subr.bf16.mxu1 %v10202_v6 }
 0x8ee   : > { %v10289_v20 = vpop.eup %10288 }
 0x8ef   : > { %9613 = vmatmul.mubr.bf16.vlgmr.msra.gmra.mrb[40].mxu1 %v12114_v60  ;;  %v10207_v60 = vld [vmem:[#allocation6 + $0xa8] sm:$0xff]   ;;  %v7444_v46 = vadd.f32 1.0, %v10289_v20 }
 0x8f0   : > { %9616 = vmatprep.mubr.bf16.mxu1 %v12121_v62  ;;  %9621 = vmatpush3.bf16.msra.mxu1 %v10202_v6  ;;  %v10208_v62 = vld [vmem:[#allocation6 + $0xb0] sm:$0xff]   ;;  %v10228_v6 = vld [vmem:[%s12374_s14 + $0x68] sm:$0xff]  }
 0x8f1   : > { %9622 = vmatprep.subr.bf16.mxu1 %v10203_v21  ;;  %10290 = vrcp.f32 %v7444_v46 }
 0x8f4   : > { %9623 = vmatpush3.bf16.msra.mxu1 %v10203_v21  ;;  %v10230_v21 = vld [vmem:[%s12374_s14 + $0x70] sm:$0xff]  }
 0x8f5   : > { %9624 = vmatprep.subr.bf16.mxu1 %v10204_v36 }
 0x8f7   : > { %9617 = vmatmul.mubr.bf16.gmra.mrb[44].mxu1 %v6894_v8  ;;  %v10232_v8 = vld [vmem:[%s12374_s14 + $0x78] sm:$0xff]  }
 0x8f8   : > { %9625 = vmatpush3.bf16.msra.mxu1 %v10204_v36  ;;  %9636 = vmatprep.mubr.bf16.mxu1 %v12131_v41  ;;  %v10211_v41 = vld [vmem:[#allocation6 + $0x208] sm:$0xff]   ;;  %v10231_v36 = vld [vmem:[%s12374_s14 + $0x30] sm:$0xff]  }
 0x8f9   : > { %9626 = vmatprep.subr.bf16.mxu1 %v10205_v4 }
 0x8fc   : > { %9627 = vmatpush3.bf16.msra.mxu1 %v10205_v4 }
 0x8fd   : > { %9628 = vmatprep.subr.bf16.mxu1 %v10206_v18 }
 0x900   : > { %9629 = vmatpush3.bf16.msra.mxu1 %v10206_v18 }
 0x901   : > { %9630 = vmatprep.subr.bf16.mxu1 %v10207_v60 }
 0x904   : > { %9631 = vmatpush3.bf16.msra.mxu1 %v10207_v60 }
 0x905   : > { %9632 = vmatprep.subr.bf16.mxu1 %v10208_v62 }
 0x908   : > { %9633 = vmatpush3.bf16.msra.mxu1 %v10208_v62 }
 0x909   : > { %9634 = vmatprep.subr.bf16.mxu1 %v10209_v40 }
 0x90c   : > { %9635 = vmatpush3.bf16.msra.mxu1 %v10209_v40  ;;  %v10233_v40 = vld [vmem:[%s12374_s14 + $0x38] sm:$0xff]  }
 0x90d   : > { %9644 = vmatprep.subr.bf16.mxu1 %v10210_v34 }
 0x90f   : > { %9637 = vmatmul.mubr.bf16.vlgmr.msra.gmra.mrb[40].mxu1 %v12138_v17  ;;  %v10215_v17 = vld [vmem:[#allocation6 + $0x228] sm:$0xff]  }
 0x910   : > { %9640 = vmatprep.mubr.bf16.mxu1 %v12143_v1  ;;  %9645 = vmatpush3.bf16.msra.mxu1 %v10210_v34 }
 0x911   : > { %9646 = vmatprep.subr.bf16.mxu1 %v10211_v41 }
 0x914   : > { %9647 = vmatpush3.bf16.msra.mxu1 %v10211_v41 }
 0x915   : > { %9648 = vmatprep.subr.bf16.mxu1 %v10212_v63 }
 0x917   : > { %9641 = vmatmul.mubr.bf16.gmra.mrb[44].mxu1 %v7040_v52  ;;  %v10291_v52 = vpop.eup %10290 }
 0x918   : > { %9649 = vmatpush3.bf16.msra.mxu1 %v10212_v63  ;;  %9660 = vmatprep.mubr.bf16.mxu1 %v12150_v48  ;;  %v7202_v48 = vrot.slane %v7200_v30, 5 }
 0x919   : > { %9650 = vmatprep.subr.bf16.mxu1 %v10213_v23 }
 0x91a   : > { %v7203_v16 = vor.u32 %v7202_v48, %v7199_v12 }
 0x91c   : > { %9651 = vmatpush3.bf16.msra.mxu1 %v10213_v23  ;;  %v7204_v11 = vsel %vm1996_vm5, %v12146_v15, %v7203_v16  ;;  %v10221_v15 = vld [vmem:[%s12374_s14 + $0x8] sm:$0xff]   ;;  %v7455_v23 = vsub.s32 1, %v11040_v19 }
 0x91d   : > { %9652 = vmatprep.subr.bf16.mxu1 %v10214_v24 }
 0x920   : > { %9653 = vmatpush3.bf16.msra.mxu1 %v10214_v24 }
 0x921   : > { %9654 = vmatprep.subr.bf16.mxu1 %v10215_v17 }
 0x924   : > { %9655 = vmatpush3.bf16.msra.mxu1 %v10215_v17 }
 0x925   : > { %9656 = vmatprep.subr.bf16.mxu1 %v10216_v29 }
 0x928   : > { %9657 = vmatpush3.bf16.msra.mxu1 %v10216_v29 }
 0x929   : > { %9658 = vmatprep.subr.bf16.mxu1 %v10217_v44 }
 0x92c   : > { %9659 = vmatpush3.bf16.msra.mxu1 %v10217_v44 }
 0x92f   : > { %9661 = vmatmul.mubr.bf16.vlgmr.msra.gmra.mrb[40].mxu1 %v12143_v1  ;;  %v10220_v1 = vld [vmem:[%s12374_s14 + $0x48] sm:$0xff]  }
 0x930   : > { %9664 = vmatprep.mubr.bf16.mxu1 %v12155_v49  ;;  %8784 = vmatprep.subr.bf16.mxu0 %v10220_v1  ;;  %v10222_v49 = vld [vmem:[%s12374_s14 + $0x50] sm:$0xff]  }
 0x931   : > { %8785 = vmatpush3.bf16.msra.mxu0 %v10221_v15 }
 0x932   : > { %8786 = vmatprep.subr.bf16.mxu0 %v10222_v49 }
 0x935   : > { %8787 = vmatpush3.bf16.msra.mxu0 %v10223_v28 }
 0x936   : > { %8788 = vmatprep.subr.bf16.mxu0 %v10224_v51 }
 0x937   : > { %9665 = vmatmul.mubr.bf16.gmra.mrb[44].mxu1 %v7204_v11 }
 0x939   : > { %8789 = vmatpush3.bf16.msra.mxu0 %v10225_v54 }
 0x93a   : > { %8790 = vmatprep.subr.bf16.mxu0 %v10226_v31 }
 0x93d   : > { %8791 = vmatpush3.bf16.msra.mxu0 %v10227_v47 }
 0x93e   : > { %8792 = vmatprep.subr.bf16.mxu0 %v10228_v6 }
 0x941   : > { %8793 = vmatpush3.bf16.msra.mxu0 %v10229_v42 }
 0x942   : > { %8794 = vmatprep.subr.bf16.mxu0 %v10230_v21 }
 0x945   : > { %8795 = vmatpush3.bf16.msra.mxu0 %v10231_v36 }
 0x946   : > { %8796 = vmatprep.subr.bf16.mxu0 %v10232_v8 }
 0x949   : > { %8797 = vmatpush3.bf16.msra.mxu0 %v10233_v40 }
 0x9a1   : > { %v9518_v4 = vpop.f32.mrb[32].mxu1 }
 0x9a2   : > { %v6261_v18 = vpop.f32.mrb[33].mxu1 }
 0x9a3   : > { %v9519_v60 = vpop.f32.mrb[34].mxu1 }
 0x9a4   : > { %v6264_v62 = vpop.f32.mrb[35].mxu1 }
 0x9a9   : > { %v9590_v57 = vpop.f32.mrb[40].mxu0  ;;  %v9522_v34 = vpop.f32.mrb[36].mxu1 }
 0x9aa   : > { %v6823_v10 = vmul.f32 %v9590_v57, %v11065_v13  ;;  %v6782_v45 = vpop.f32.mrb[41].mxu0  ;;  %v6277_v41 = vpop.f32.mrb[37].mxu1  ;;  %v7447_v13 = vmul.f32 %v10291_v52, %v7440_v61 }
 0x9ab   : > { %v6821_v59 = vmul.f32 %v11071_v38, %v6782_v45  ;;  %v9591_v9 = vpop.f32.mrb[42].mxu0  ;;  %v9523_v63 = vpop.f32.mrb[38].mxu1 }
 0x9ac   : > { %v6831_v24 = vadd.f32 %v9518_v4, %v6823_v10  ;;  %v6824_v17 = vmul.f32 %v9591_v9, %v11075_v32  ;;  %v6785_v29 = vpop.f32.mrb[43].mxu0  ;;  %v6280_v44 = vpop.f32.mrb[39].mxu1  ;;  %v7452_v38 = vrot.slane %v7447_v13, %v7451_v25  ;;  %v7456_v48 = vrot.slane %v7447_v13, %v7455_v23 }
 0x9ad   : > { %v6829_v58 = vadd.f32 %v6821_v59, %v6261_v18  ;;  %v6822_v50 = vmul.f32 %v11080_v14, %v6785_v29 }
 0x9ae   : > { %v6832_v30 = vadd.f32 %v9519_v60, %v6824_v17  ;;  %v7459_v11 = vpack.c.bf16 %v7452_v38, %v7452_v38  ;;  %v7460_v26 = vpack.c.bf16 %v7456_v48, %v7456_v48 }
 0x9af   : > { %v6830_v12 = vadd.f32 %v6822_v50, %v6264_v62 }
 0x9b0   : > { %7622 = vmatprep.mubr.bf16.mxu0 %v7460_v26 }
 0x9b1   : > { %v9594_v16 = vpop.f32.mrb[44].mxu0  ;;  %7623 = vmatmul.mubr.bf16.vlgmr.msra.gmra.mrb[48].mxu0 %v7459_v11 }
 0x9b2   : > { %v6827_v56 = vmul.f32 %v9594_v16, %v11088_v37  ;;  %v6798_v1 = vpop.f32.mrb[45].mxu0 }
 0x9b3   : > { %v6825_v32 = vmul.f32 %v11091_v39, %v6798_v1  ;;  %v9595_v15 = vpop.f32.mrb[46].mxu0 }
 0x9b4   : > { %v6835_v49 = vadd.f32 %v9522_v34, %v6827_v56  ;;  %v6828_v14 = vmul.f32 %v9595_v15, %v11094_v43  ;;  %v6801_v28 = vpop.f32.mrb[47].mxu0 }
 0x9b5   : > { %v6833_v61 = vadd.f32 %v6825_v32, %v6277_v41  ;;  %v6826_v51 = vmul.f32 %v11098_v35, %v6801_v28 }
 0x9b6   : > { %v6836_v55 = vadd.f32 %v9523_v63, %v6828_v14 }
 0x9b7   : > { %v6834_v7 = vadd.f32 %v6826_v51, %v6280_v44 }
 0xa02   : > { %v9662_v54 = vpop.f32.mrb[40].mxu1 }
 0xa03   : > { %v7332_v31 = vmul.f32 %v9662_v54, %v11104_v27  ;;  %v7291_v47 = vpop.f32.mrb[41].mxu1 }
 0xa04   : > { %v7330_v37 = vmul.f32 %v11107_v2, %v7291_v47  ;;  %v9663_v6 = vpop.f32.mrb[42].mxu1 }
 0xa05   : > { %v12280_v39 = vadd.f32 %v7332_v31, %v6831_v24  ;;  %v7333_v42 = vmul.f32 %v9663_v6, %v11110_v22  ;;  %v7294_v21 = vpop.f32.mrb[43].mxu1 }
 0xa06   : > { %v12283_v43 = vadd.f32 %v7330_v37, %v6829_v58  ;;  %v7331_v20 = vmul.f32 %v11114_v3, %v7294_v21 }
 0xa07   : > { %v12286_v36 = vadd.f32 %v7333_v42, %v6832_v30  ;;  %v7365_v3 = vmul.f32 %v12280_v39, %v12280_v39 }
 0xa08   : > { %v12288_v35 = vadd.f32 %v7331_v20, %v6830_v12  ;;  %v7363_v27 = vmul.f32 %v12283_v43, %v12283_v43 }
 0xa09   : > { %v7366_v57 = vmul.f32 %v12286_v36, %v12286_v36 }
 0xa0a   : > { %v7346_v2 = vadd.f32 %v12288_v35, %v12283_v43  ;;  %v7364_v46 = vmul.f32 %v12288_v35, %v12288_v35  ;;  %v9666_v4 = vpop.f32.mrb[44].mxu1 }
 0xa0b   : > { %v7336_v22 = vmul.f32 %v9666_v4, %v11128_v0  ;;  %v7307_v8 = vpop.f32.mrb[45].mxu1 }
 0xa0c   : > { %v7347_v18 = vadd.f32 %v7346_v2, %v12280_v39  ;;  %v7371_v60 = vadd.f32 %v7364_v46, %v7363_v27  ;;  %v7334_v62 = vmul.f32 %v11131_v5, %v7307_v8  ;;  %v9667_v40 = vpop.f32.mrb[46].mxu1  ;;  %v7493_v46 = vld [vmem:[%s12375_s15] sm:$0x1] }
 0xa0d   : > { %v12303_v34 = vadd.f32 %v7336_v22, %v6835_v49  ;;  %v7337_v10 = vmul.f32 %v9667_v40, %v11140_v53  ;;  %v7310_v45 = vpop.f32.mrb[47].mxu1 }
 0xa0e   : > { %v7372_v41 = vadd.f32 %v7371_v60, %v7365_v3  ;;  %v12306_v0 = vadd.f32 %v7334_v62, %v6833_v61  ;;  %v7348_v59 = vadd.f32 %v7347_v18, %v12286_v36  ;;  %v7335_v9 = vmul.f32 %v11144_v33, %v7310_v45 }
 0xa0f   : > { %v12310_v63 = vadd.f32 %v7337_v10, %v6836_v55  ;;  %v7369_v33 = vmul.f32 %v12303_v34, %v12303_v34 }
 0xa10   : > { %v7349_v5 = vadd.f32 %v7348_v59, %v12306_v0  ;;  %v7367_v23 = vmul.f32 %v12306_v0, %v12306_v0  ;;  %v12315_v52 = vadd.f32 %v7335_v9, %v6834_v7  ;;  %v7373_v24 = vadd.f32 %v7372_v41, %v7366_v57 }
 0xa11   : > { %v7370_v13 = vmul.f32 %v12310_v63, %v12310_v63 }
 0xa12   : > { %v7368_v53 = vmul.f32 %v12315_v52, %v12315_v52  ;;  %v7350_v17 = vadd.f32 %v7349_v5, %v12315_v52  ;;  %v7374_v29 = vadd.f32 %v7373_v24, %v7367_v23 }
 0xa14   : > { %v7351_v44 = vadd.f32 %v7350_v17, %v12303_v34  ;;  %v7375_v58 = vadd.f32 %v7374_v29, %v7368_v53 }
 0xa16   : > { %v7352_v50 = vadd.f32 %v7351_v44, %v12310_v63  ;;  %v7376_v30 = vadd.f32 %v7375_v58, %v7369_v33 }
 0xa18   : > { %7353 = vadd.xlane.f32.xlu1 %v7352_v50  ;;  %v7377_v12 = vadd.f32 %v7376_v30, %v7370_v13 }
 0xa1a   : > { %7378 = vadd.xlane.f32.xlu0 %v7377_v12 }
 0xa84   : > { %v8798_v38 = vpop.f32.mrb[48].mxu0 }
 0xa85   : > { %v8799_v48 = vpop.f32.mrb[49].mxu0 }
 0xa86   : > { %v8800_v16 = vadd.f32 %v8799_v48, %v8798_v38  ;;  %v8801_v11 = vpop.f32.mrb[50].mxu0 }
 0xa87   : > { %v8802_v26 = vpop.f32.mrb[51].mxu0 }
 0xa88   : > { %v7625_v4 = vadd.f32 %v8800_v16, %v7493_v46 }
 0xa8a   : > { %v7633_v22 = vrot.slane %v7625_v4, %v7451_v25  ;;  %v8328_v25 = vld [vmem:[%s12371_s11] ss:$0 sm:$0xff] }
 0xaa5   : > { %v7354_v56 = vpop.xlane.xlu1 %7353 }
 0xaa6   : > { %v7355_v1 = vrot.slane %v7354_v56, 4 }
 0xaa7   : > { %v7379_v32 = vpop.xlane.xlu0 %7378 }
 0xaa8   : > { %v7356_v15 = vadd.f32 %v7355_v1, %v7354_v56  ;;  %v7380_v49 = vrot.slane %v7379_v32, 4 }
 0xaaa   : > { %v7357_v14 = vrot.slane %v7356_v15, 2  ;;  %v7381_v28 = vadd.f32 %v7380_v49, %v7379_v32 }
 0xaac   : > { %v7358_v61 = vadd.f32 %v7357_v14, %v7356_v15  ;;  %v7382_v51 = vrot.slane %v7381_v28, 2 }
 0xaae   : > { %v7383_v55 = vadd.f32 %v7382_v51, %v7381_v28  ;;  %v7359_v7 = vrot.slane %v7358_v61, 1 }
 0xab0   : > { %v7360_v54 = vadd.f32 %v7359_v7, %v7358_v61  ;;  %v7384_v31 = vrot.slane %v7383_v55, 1 }
 0xab2   : > { %9872 = vpush %v7360_v54  ;;  %v7385_v47 = vadd.f32 %v7384_v31, %v7383_v55 }
 0xab4   : > { %9874 = vpush %v7385_v47 }
 0xae3   : > { %s9873_s26 = spop %9872 }
 0xae4   : > { %v7362_v37 = vstv %s9873_s26 }
 0xae5   : > { %v7388_v6 = vmul.f32 0.001953125, %v7362_v37  ;;  %s9875_s29 = spop %9874 }
 0xae6   : > { %v7387_v42 = vstv %s9875_s29 }
 0xae7   : > { %v7389_v21 = vmul.f32 0.001953125, %v7387_v42  ;;  %v7390_v20 = vmul.f32 %v7388_v6, %v7388_v6  ;;  %v7392_v8 = vsub.f32 %v12283_v43, %v7388_v6  ;;  %v7393_v3 = vsub.f32 %v12288_v35, %v7388_v6 }
 0xae8   : > { %v7394_v18 = vsub.f32 %v12280_v39, %v7388_v6  ;;  %v7395_v60 = vsub.f32 %v12286_v36, %v7388_v6  ;;  %v7396_v40 = vsub.f32 %v12306_v0, %v7388_v6  ;;  %v7397_v57 = vsub.f32 %v12315_v52, %v7388_v6  ;;  %v8329_v0 = vld [vmem:[%s12372_s12] ss:$0 sm:$0xff] }
 0xae9   : > { %v7391_v27 = vsub.f32 %v7389_v21, %v7390_v20  ;;  %v7398_v10 = vsub.f32 %v12303_v34, %v7388_v6  ;;  %v7399_v19 = vsub.f32 %v12310_v63, %v7388_v6 }
 0xaeb   : > { %v7400_v2 = vadd.f32 1e-05, %v7391_v27 }
 0xaed   : > { %10292 = vrsqrt.f32 %v7400_v2 }
 0xaf7   : > { %v10293_v62 = vpop.eup %10292 }
 0xaf8   : > { %v7402_v43 = vmul.f32 %v10293_v62, %v7392_v8  ;;  %v7403_v35 = vmul.f32 %v10293_v62, %v7393_v3  ;;  %v7404_v45 = vmul.f32 %v10293_v62, %v7394_v18  ;;  %v7405_v39 = vmul.f32 %v10293_v62, %v7395_v60 }
 0xaf9   : > { %v7406_v41 = vmul.f32 %v10293_v62, %v7396_v40  ;;  %v7407_v36 = vmul.f32 %v10293_v62, %v7397_v57  ;;  %v7408_v59 = vmul.f32 %v10293_v62, %v7398_v10  ;;  %v7409_v9 = vmul.f32 %v10293_v62, %v7399_v19 }
 0xafa   : > { %v7417_v34 = vmul.f32 %v8328_v25, %v7402_v43  ;;  %v7418_v5 = vmul.f32 %v8328_v25, %v7403_v35  ;;  %v7419_v63 = vmul.f32 %v8328_v25, %v7404_v45  ;;  %v7420_v23 = vmul.f32 %v8328_v25, %v7405_v39 }
 0xafb   : > { %v7421_v52 = vmul.f32 %v8328_v25, %v7406_v41  ;;  %v7422_v24 = vmul.f32 %v8328_v25, %v7407_v36  ;;  %v7423_v53 = vmul.f32 %v8328_v25, %v7408_v59  ;;  %v7424_v17 = vmul.f32 %v8328_v25, %v7409_v9 }
 0xafc   : > { %v7432_v29 = vadd.f32 %v8329_v0, %v7417_v34  ;;  %v7433_v44 = vadd.f32 %v8329_v0, %v7418_v5  ;;  %v7434_v33 = vadd.f32 %v8329_v0, %v7419_v63  ;;  %v7435_v58 = vadd.f32 %v8329_v0, %v7420_v23 }
 0xafd   : > { %v7436_v50 = vadd.f32 %v8329_v0, %v7421_v52  ;;  %v7437_v13 = vadd.f32 %v8329_v0, %v7422_v24  ;;  %v7438_v30 = vadd.f32 %v8329_v0, %v7423_v53  ;;  %v7439_v12 = vadd.f32 %v8329_v0, %v7424_v17 }
 0xafe   : > { %v7634_v38 = vadd.f32 %v7633_v22, %v7432_v29  ;;  %v7635_v48 = vadd.f32 %v7633_v22, %v7433_v44  ;;  %v7636_v16 = vadd.f32 %v7633_v22, %v7434_v33  ;;  %v7637_v11 = vadd.f32 %v7633_v22, %v7435_v58 }
 0xaff   : > { %v7638_v26 = vadd.f32 %v7633_v22, %v7436_v50  ;;  %v7639_v56 = vadd.f32 %v7633_v22, %v7437_v13  ;;  %v7640_v1 = vadd.f32 %v7633_v22, %v7438_v30  ;;  %v7641_v32 = vadd.f32 %v7633_v22, %v7439_v12 }
 0xb00   : > { %7643 = vst.msk [vmem:[%s568_s25] sm:$0xff] %vm7642_vm1, %v7634_v38  ;;  %7644 = vst.msk [vmem:[%s568_s25 + $0x8] sm:$0xff] %vm7642_vm1, %v7635_v48 }
 0xb01   : > { %7645 = vst.msk [vmem:[%s568_s25 + $0x10] sm:$0xff] %vm7642_vm1, %v7636_v16  ;;  %7646 = vst.msk [vmem:[%s568_s25 + $0x18] sm:$0xff] %vm7642_vm1, %v7637_v11 }
 0xb02   : > { %7647 = vst.msk [vmem:[%s568_s25 + $0x20] sm:$0xff] %vm7642_vm1, %v7638_v26  ;;  %7648 = vst.msk [vmem:[%s568_s25 + $0x28] sm:$0xff] %vm7642_vm1, %v7639_v56 }
 0xb03   : > { %7649 = vst.msk [vmem:[%s568_s25 + $0x30] sm:$0xff] %vm7642_vm1, %v7640_v1  ;;  %7650 = vst.msk [vmem:[%s568_s25 + $0x38] sm:$0xff] %vm7642_vm1, %v7641_v32 }
 0xb04 PF: > { %s12392_s22 = sld [smem:[#allocation10_spill]] }
 0xb0a   : > { %s28_s21 = sadd.s32 1, %s12392_s22  }
 0xb0b   : > { %p25_p5 = scmp.ge.s32.totalorder %s28_s21, 4  }
 0xb0d   :  { %27 = sbr.rel (!%p25_p5) target bundleno = 5 (0x5), region = 159 }
 0xb14   :  { %7672 = vsyncpa [#allocation5], 1 }
 0xb15   :  { %7674 = vsyncpa [#allocation5 + $0x1], 1 }
 0xb16   :  { %7675 = vsyncpa [#allocation7], 1 }

</bundles_post_ra>
